<compile_context>
chip_gen: v6e
topology: v6e:2x2x1
jax: 0.10.0
libtpu: 0.0.40
codegen_flags: <defaults>
</compile_context>

<pallas_src>
import functools

import numpy as np
import jax
import jax.numpy as jnp
from jax.experimental import pallas as pl
from jax.experimental.pallas import tpu as pltpu

LEAKY_SLOPE = 0.01   # nn.LeakyReLU default negative_slope
GN_EPS = 1e-5        # nn.GroupNorm default eps
GROUPS = 8


# ---------------------------------------------------------------------------
# Fused kernel.
# ---------------------------------------------------------------------------
def _fused_kernel(x_ref, g1_ref, b1_ref, g2_ref, b2_ref, sel_ref, selt_ref,
                  mask_ref, w1_ref, w2_ref, o_ref, pad_ref, *, D, H, W, C, G):
    DH = D * H
    WC = W * C
    Hp = H + 2                     # padded h extent
    Rz = D * Hp                    # rows of the padded-row conv result
    Rp = pad_ref.shape[0]          # (D+2)*Hp + slack
    n_cnt = float(D * H * W * (C // G))
    cdtype = pad_ref.dtype         # conv operand dtype (f32 or bf16)

    sel = sel_ref[...]             # (WC, G) channel -> group one-hot
    selt = selt_ref[...]           # (G, WC) group   -> channel broadcast

    def gn_scale_shift(s1, s2, gamma, beta):
        # One-pass stats: per-group mean and E[x^2] via two tiny MXU dots.
        gmean = jnp.dot(s1, sel, preferred_element_type=jnp.float32) / n_cnt   # (1, G)
        gmsq = jnp.dot(s2, sel, preferred_element_type=jnp.float32) / n_cnt    # (1, G)
        ginv = jax.lax.rsqrt(gmsq - gmean * gmean + GN_EPS)                    # (1, G)
        cmean = jnp.dot(gmean, selt, preferred_element_type=jnp.float32)       # (1, WC)
        cinv = jnp.dot(ginv, selt, preferred_element_type=jnp.float32)         # (1, WC)
        scale = cinv * gamma
        shift = beta - cmean * scale
        return scale, shift

    def lrelu(v):
        return jnp.where(v >= 0, v, LEAKY_SLOPE * v)

    def zero_halo():
        # Zero ONLY the halo-border rows; the interior is always overwritten.
        pad_ref[pl.ds(0, Hp + 1), :] = jnp.zeros((Hp + 1, WC), cdtype)          # head
        for d in range(1, D):
            pad_ref[pl.ds(d * Hp + H + 1, 2), :] = jnp.zeros((2, WC), cdtype)   # h-halo pairs
        tail = D * Hp + H + 1
        pad_ref[pl.ds(tail, Rp - tail), :] = jnp.zeros((Rp - tail, WC), cdtype)  # tail

    def conv(w_ref):
        # 3x3x3 conv (pad 1, no bias) in padded-row space: each (kd, kh) tap is a
        # contiguous row-shifted slice; kw is folded into the banded contraction.
        z = jnp.zeros((Rz, WC), jnp.float32)
        for kd in range(3):
            for kh in range(3):
                patch = pad_ref[pl.ds(kd * Hp + kh, Rz), :]
                z = z + jnp.dot(patch, w_ref[kd * 3 + kh],
                                preferred_element_type=jnp.float32)
        return z

    x = x_ref[...]                                             # (DH, WC) f32, also the skip

    # --- GroupNorm 1 + LeakyReLU (compact rows, no junk) -----------------------------
    s1 = jnp.sum(x, axis=0, keepdims=True)
    s2 = jnp.sum(x * x, axis=0, keepdims=True)
    scale, shift = gn_scale_shift(s1, s2, g1_ref[...], b1_ref[...])
    a1 = lrelu(x * scale + shift).astype(cdtype)

    # Scatter activation into the scratch interior, then zero the halo border.
    for d in range(D):
        pad_ref[pl.ds((d + 1) * Hp + 1, H), :] = a1[d * H:(d + 1) * H, :]
    zero_halo()

    # --- Conv 1 -----------------------------------------------------------------------
    z1 = conv(w1_ref)                                          # (Rz, WC) f32 (junk rows at h in {H, H+1})

    # --- GroupNorm 2 + LeakyReLU on padded rows (junk masked out of the stats) --------
    mask = mask_ref[...]                                       # (Rz, WC) 1.0 on valid rows
    zm = z1 * mask
    s1 = jnp.sum(zm, axis=0, keepdims=True)
    s2 = jnp.sum(zm * z1, axis=0, keepdims=True)
    scale, shift = gn_scale_shift(s1, s2, g2_ref[...], b2_ref[...])
    a2 = lrelu(z1 * scale + shift).astype(cdtype)

    # One contiguous store: valid rows land exactly on the interior, junk rows land on
    # halo positions, which are re-zeroed immediately after.
    pad_ref[pl.ds(Hp + 1, Rz), :] = a2
    zero_halo()

    # --- Conv 2 + residual --------------------------------------------------------------
    z2 = conv(w2_ref)
    z2 = z2.reshape(D, Hp, WC)[:, :H, :].reshape(DH, WC)       # drop junk (halo) rows
    o_ref[...] = (z2 + x).astype(o_ref.dtype)                  # downsample=None -> skip = x


def _const_spec(block_shape, index_map, single_buffer=False):
    if single_buffer:
        # Single-buffer constant blocks (index_map independent of the grid) to halve
        # their resident VMEM.  Fall back gracefully if pipeline_mode is unsupported.
        try:
            return pl.BlockSpec(block_shape, index_map, pipeline_mode=pl.Buffered(1))
        except TypeError:
            pass
    return pl.BlockSpec(block_shape, index_map)


def fused_no_bottleneck(x_f, prep, *, D, H, W, C, G=GROUPS):
    N, DH, WC = x_f.shape
    Hp = H + 2
    Rz = D * Hp
    Rp = (D + 2) * Hp + 8
    cdtype = prep["w1_band"].dtype
    kernel = functools.partial(_fused_kernel, D=D, H=H, W=W, C=C, G=G)

    wbytes = 2 * 9 * WC * WC * cdtype.itemsize
    cost = pl.CostEstimate(
        flops=int(N * (2 * 9 * 2 * Rz * WC * WC + 10 * DH * WC)),
        transcendentals=int(N * 2 * G),
        bytes_accessed=int(2 * N * DH * WC * 4 + wbytes + (Rz + WC + 2 * G + 4) * WC * 4),
    )

    const2 = lambda n: (0, 0)
    const3 = lambda n: (0, 0, 0)

    return pl.pallas_call(
        kernel,
        out_shape=jax.ShapeDtypeStruct((N, DH, WC), jnp.float32),
        grid_spec=pltpu.PrefetchScalarGridSpec(
            num_scalar_prefetch=0,
            grid=(N,),
            in_specs=[
                pl.BlockSpec((None, DH, WC), lambda n: (n, 0, 0)),        # x (and skip)
                _const_spec((1, WC), const2),                             # gn1 gamma (lane-tiled)
                _const_spec((1, WC), const2),                             # gn1 beta
                _const_spec((1, WC), const2),                             # gn2 gamma
                _const_spec((1, WC), const2),                             # gn2 beta
                _const_spec((WC, G), const2),                             # channel->group one-hot
                _const_spec((G, WC), const2),                             # group->channel broadcast
                _const_spec((Rz, WC), const2),                            # GN2 valid-row mask
                _const_spec((9, WC, WC), const3, single_buffer=True),     # conv1 band weights
                _const_spec((9, WC, WC), const3, single_buffer=True),     # conv2 band weights
            ],
            out_specs=pl.BlockSpec((None, DH, WC), lambda n: (n, 0, 0)),
            scratch_shapes=[pltpu.VMEM((Rp, WC), cdtype)],                # padded-row halo scratch
        ),
        input_output_aliases={0: 0},
        cost_estimate=cost,
        compiler_params=pltpu.CompilerParams(dimension_semantics=("parallel",)),
    )(x_f, prep["g1"], prep["b1"], prep["g2"], prep["b2"],
      prep["sel"], prep["selt"], prep["mask"], prep["w1_band"], prep["w2_band"])


# ---------------------------------------------------------------------------
# One-time, host-side parameter lowering.
# Band weights: B[kd*3+kh, wi*Cin + ci, wo*Cout + co] = w[kd, kh, wi-wo+1, ci, co]
# when |wi - wo| <= 1, else 0  -> folds kw and the W zero-padding into the MXU dot.
# ---------------------------------------------------------------------------
def _band_weights(w_dhwio, W, dtype=jnp.float32):
    w = np.asarray(w_dhwio, dtype=np.float32)
    kD, kH, kW, cin, cout = w.shape
    assert (kD, kH, kW) == (3, 3, 3)
    B = np.zeros((kD * kH, W * cin, W * cout), np.float32)
    for kd in range(kD):
        for kh in range(kH):
            blk = B[kd * kH + kh]
            for kw in range(kW):
                for wo in range(W):
                    wi = wo + kw - 1
                    if 0 <= wi < W:
                        blk[wi * cin:(wi + 1) * cin, wo * cout:(wo + 1) * cout] = w[kd, kh, kw]
    return jnp.asarray(B, dtype=dtype)


def prepare_params(params, D, H, W, conv_dtype=jnp.float32):
    C = int(np.shape(params["gn1_gamma"])[0])
    P = int(np.shape(params["gn2_gamma"])[0])
    assert C == P, "downsample=None path requires inplanes == planes"
    assert C % GROUPS == 0, "GroupNorm(8, C) requires C % 8 == 0"
    WC = W * C
    assert WC % 128 == 0, "W*C must be a multiple of 128 for the lane-dense layout"
    G = GROUPS
    gs = C // G
    Hp = H + 2
    Rz = D * Hp

    def tile_lane(v):
        return jnp.asarray(np.tile(np.asarray(v, np.float32), W).reshape(1, WC))

    lane = np.arange(WC)
    sel = ((lane[:, None] % C) // gs == np.arange(G)[None, :]).astype(np.float32)   # (WC, G)
    mask = (np.arange(Rz)[:, None] % Hp < H).astype(np.float32)                     # (Rz, 1)
    mask = np.ascontiguousarray(np.broadcast_to(mask, (Rz, WC)))

    return {
        "g1": tile_lane(params["gn1_gamma"]),
        "b1": tile_lane(params["gn1_beta"]),
        "g2": tile_lane(params["gn2_gamma"]),
        "b2": tile_lane(params["gn2_beta"]),
        "sel": jnp.asarray(sel),
        "selt": jnp.asarray(np.ascontiguousarray(sel.T)),
        "mask": jnp.asarray(mask),
        "w1_band": _band_weights(params["w1"], W, conv_dtype),
        "w2_band": _band_weights(params["w2"], W, conv_dtype),
    }


# ---------------------------------------------------------------------------
# NoBottleneck forward (inplanes == planes, stride 1, dilation 1, downsample=None).
# NCDHW at the boundary for parity with the PyTorch module.
# ---------------------------------------------------------------------------
def no_bottleneck_forward(x_ncdhw, prep):
    N, C, D, H, W = x_ncdhw.shape
    x_f = jnp.transpose(x_ncdhw, (0, 2, 3, 4, 1)).reshape(N, D * H, W * C)
    out_f = fused_no_bottleneck(x_f, prep, D=D, H=H, W=W, C=C)
    return jnp.transpose(out_f.reshape(N, D, H, W, C), (0, 4, 1, 2, 3))


# ---------------------------------------------------------------------------
# Pure-JAX reference for correctness checking.
# ---------------------------------------------------------------------------
def reference(x_ncdhw, params):
    x = jnp.transpose(x_ncdhw, (0, 2, 3, 4, 1))

    def gn(x5, gamma, beta):
        N, D, H, W, C = x5.shape
        g = C // GROUPS
        xg = x5.reshape(N, D * H * W, GROUPS, g)
        mean = xg.mean(axis=(1, 3), keepdims=True)
        var = ((xg - mean) ** 2).mean(axis=(1, 3), keepdims=True)
        y = ((xg - mean) / jnp.sqrt(var + GN_EPS)).reshape(N, D, H, W, C)
        y = y * gamma + beta
        return jnp.where(y >= 0, y, LEAKY_SLOPE * y)

    def conv(x5, w):
        return jax.lax.conv_general_dilated(
            x5, w, window_strides=(1, 1, 1),
            padding=((1, 1), (1, 1), (1, 1)),
            dimension_numbers=("NDHWC", "DHWIO", "NDHWC"))

    seg = gn(x, params["gn1_gamma"], params["gn1_beta"])
    seg = conv(seg, params["w1"])
    seg = gn(seg, params["gn2_gamma"], params["gn2_beta"])
    seg = conv(seg, params["w2"]) + x
    return jnp.transpose(seg, (0, 4, 1, 2, 3))


if __name__ == "__main__":
    key = jax.random.PRNGKey(0)
    N, C, D, H, W = 2, 16, 8, 8, 8       # inplanes = planes = 16 (8 groups), W*C = 128
    planes = 16
    ks = jax.random.split(key, 7)
    x = jax.random.normal(ks[0], (N, C, D, H, W), jnp.float32)
    params = {
        "gn1_gamma": 1.0 + 0.1 * jax.random.normal(ks[1], (C,), jnp.float32),
        "gn1_beta": 0.1 * jax.random.normal(ks[2], (C,), jnp.float32),
        "gn2_gamma": 1.0 + 0.1 * jax.random.normal(ks[3], (planes,), jnp.float32),
        "gn2_beta": 0.1 * jax.random.normal(ks[4], (planes,), jnp.float32),
        # conv weights in DHWIO layout: (3, 3, 3, Cin, Cout)
        "w1": 0.1 * jax.random.normal(ks[5], (3, 3, 3, C, planes), jnp.float32),
        "w2": 0.1 * jax.random.normal(ks[6], (3, 3, 3, planes, planes), jnp.float32),
    }

    ref = reference(x, params)

    # Exact f32 conv path (strict parity with the PyTorch module semantics).
    prep32 = prepare_params(params, D, H, W, conv_dtype=jnp.float32)
    out32 = jax.jit(no_bottleneck_forward)(x, prep32)
    jax.block_until_ready(out32)
    assert out32.shape == (N, C, D, H, W)
    err32 = float(jnp.max(jnp.abs(out32 - ref)))
    assert jnp.allclose(out32, ref, atol=1e-3, rtol=1e-3), err32

    # Fast bf16 conv path (bf16 band weights / activations, f32 accumulation).
    prep16 = prepare_params(params, D, H, W, conv_dtype=jnp.bfloat16)
    out16 = jax.jit(no_bottleneck_forward)(x, prep16)
    jax.block_until_ready(out16)
    err16 = float(jnp.max(jnp.abs(out16 - ref)))
    assert np.isfinite(err16) and err16 < 0.3, err16

    print("KERNEL_OK")
</pallas_src>

<mosaic_0001>
module attributes {stable_mosaic.version = 11 : i64} {
  func.func @_fused_kernel(%arg0: i32, %arg1: memref<1x64x128xf32, #tpu.memory_space<vmem>>, %arg2: memref<1x128xf32, #tpu.memory_space<vmem>>, %arg3: memref<1x128xf32, #tpu.memory_space<vmem>>, %arg4: memref<1x128xf32, #tpu.memory_space<vmem>>, %arg5: memref<1x128xf32, #tpu.memory_space<vmem>>, %arg6: memref<128x8xf32, #tpu.memory_space<vmem>>, %arg7: memref<8x128xf32, #tpu.memory_space<vmem>>, %arg8: memref<80x128xf32, #tpu.memory_space<vmem>>, %arg9: memref<9x128x128xf32, #tpu.memory_space<vmem>>, %arg10: memref<9x128x128xf32, #tpu.memory_space<vmem>>, %arg11: memref<1x64x128xf32, #tpu.memory_space<vmem>>, %arg12: memref<108x128xf32, #tpu.memory_space<vmem>>) attributes {dimension_semantics = [#tpu.dimension_semantics<parallel>], iteration_bounds = array<i64: 2>, scalar_prefetch = 0 : i64, scratch_operands = 1 : i64, tpu.core_type = #tpu.core_type<tc>, window_params = [{transform_indices = @transform_0, window_bounds = array<i64: 1, 64, 128>}, {pipeline_mode = #tpu.pipeline_mode<synchronous>, transform_indices = @transform_1, window_bounds = array<i64: 1, 128>}, {pipeline_mode = #tpu.pipeline_mode<synchronous>, transform_indices = @transform_2, window_bounds = array<i64: 1, 128>}, {pipeline_mode = #tpu.pipeline_mode<synchronous>, transform_indices = @transform_3, window_bounds = array<i64: 1, 128>}, {pipeline_mode = #tpu.pipeline_mode<synchronous>, transform_indices = @transform_4, window_bounds = array<i64: 1, 128>}, {pipeline_mode = #tpu.pipeline_mode<synchronous>, transform_indices = @transform_5, window_bounds = array<i64: 128, 8>}, {pipeline_mode = #tpu.pipeline_mode<synchronous>, transform_indices = @transform_6, window_bounds = array<i64: 8, 128>}, {pipeline_mode = #tpu.pipeline_mode<synchronous>, transform_indices = @transform_7, window_bounds = array<i64: 80, 128>}, {pipeline_mode = #tpu.pipeline_mode<synchronous>, transform_indices = @transform_8, window_bounds = array<i64: 9, 128, 128>}, {pipeline_mode = #tpu.pipeline_mode<synchronous>, transform_indices = @transform_9, window_bounds = array<i64: 9, 128, 128>}, {transform_indices = @transform_10, window_bounds = array<i64: 1, 64, 128>}]} {
    %c0 = arith.constant 0 : index
    %c0_0 = arith.constant 0 : index
    %0 = vector.load %arg6[%c0, %c0_0] : memref<128x8xf32, #tpu.memory_space<vmem>>, vector<128x8xf32>
    %c0_1 = arith.constant 0 : index
    %c0_2 = arith.constant 0 : index
    %1 = vector.load %arg7[%c0_1, %c0_2] : memref<8x128xf32, #tpu.memory_space<vmem>>, vector<8x128xf32>
    %c0_3 = arith.constant 0 : index
    %c0_4 = arith.constant 0 : index
    %c0_5 = arith.constant 0 : index
    %2 = vector.load %arg1[%c0_3, %c0_4, %c0_5] : memref<1x64x128xf32, #tpu.memory_space<vmem>>, vector<1x64x128xf32>
    %3 = vector.shape_cast %2 : vector<1x64x128xf32> to vector<64x128xf32>
    %cst = arith.constant dense<0.000000e+00> : vector<128xf32>
    %4 = vector.multi_reduction <add>, %3, %cst [0] : vector<64x128xf32> to vector<128xf32>
    %5 = vector.shape_cast %4 : vector<128xf32> to vector<1x128xf32>
    %6 = arith.mulf %3, %3 : vector<64x128xf32>
    %cst_6 = arith.constant dense<0.000000e+00> : vector<128xf32>
    %7 = vector.multi_reduction <add>, %6, %cst_6 [0] : vector<64x128xf32> to vector<128xf32>
    %8 = vector.shape_cast %7 : vector<128xf32> to vector<1x128xf32>
    %c0_7 = arith.constant 0 : index
    %c0_8 = arith.constant 0 : index
    %9 = vector.load %arg2[%c0_7, %c0_8] : memref<1x128xf32, #tpu.memory_space<vmem>>, vector<1x128xf32>
    %c0_9 = arith.constant 0 : index
    %c0_10 = arith.constant 0 : index
    %10 = vector.load %arg3[%c0_9, %c0_10] : memref<1x128xf32, #tpu.memory_space<vmem>>, vector<1x128xf32>
    %cst_11 = arith.constant dense<0.000000e+00> : vector<1x8xf32>
    %11 = tpu.matmul %5, %0, %cst_11 {dimension_numbers = #tpu.dot_dimension_numbers<[1], [0], [0], [1], [0, 0, 1, 1], [], []>} : vector<1x128xf32>, vector<128x8xf32>, vector<1x8xf32> -> vector<1x8xf32>
    %cst_12 = arith.constant 1.024000e+03 : f32
    %12 = vector.broadcast %cst_12 : f32 to vector<1x8xf32>
    %13 = arith.divf %11, %12 : vector<1x8xf32>
    %cst_13 = arith.constant dense<0.000000e+00> : vector<1x8xf32>
    %14 = tpu.matmul %8, %0, %cst_13 {dimension_numbers = #tpu.dot_dimension_numbers<[1], [0], [0], [1], [0, 0, 1, 1], [], []>} : vector<1x128xf32>, vector<128x8xf32>, vector<1x8xf32> -> vector<1x8xf32>
    %cst_14 = arith.constant 1.024000e+03 : f32
    %15 = vector.broadcast %cst_14 : f32 to vector<1x8xf32>
    %16 = arith.divf %14, %15 : vector<1x8xf32>
    %17 = arith.mulf %13, %13 : vector<1x8xf32>
    %18 = arith.subf %16, %17 : vector<1x8xf32>
    %cst_15 = arith.constant 9.99999974E-6 : f32
    %19 = vector.broadcast %cst_15 : f32 to vector<1x8xf32>
    %20 = arith.addf %18, %19 : vector<1x8xf32>
    %21 = math.rsqrt %20 : vector<1x8xf32>
    %cst_16 = arith.constant dense<0.000000e+00> : vector<1x128xf32>
    %22 = tpu.matmul %13, %1, %cst_16 {dimension_numbers = #tpu.dot_dimension_numbers<[1], [0], [0], [1], [0, 0, 1, 1], [], []>} : vector<1x8xf32>, vector<8x128xf32>, vector<1x128xf32> -> vector<1x128xf32>
    %cst_17 = arith.constant dense<0.000000e+00> : vector<1x128xf32>
    %23 = tpu.matmul %21, %1, %cst_17 {dimension_numbers = #tpu.dot_dimension_numbers<[1], [0], [0], [1], [0, 0, 1, 1], [], []>} : vector<1x8xf32>, vector<8x128xf32>, vector<1x128xf32> -> vector<1x128xf32>
    %24 = arith.mulf %23, %9 : vector<1x128xf32>
    %25 = arith.mulf %22, %24 : vector<1x128xf32>
    %26 = arith.subf %10, %25 : vector<1x128xf32>
    %27 = vector.broadcast %24 : vector<1x128xf32> to vector<64x128xf32>
    %28 = arith.mulf %3, %27 : vector<64x128xf32>
    %29 = vector.broadcast %26 : vector<1x128xf32> to vector<64x128xf32>
    %30 = arith.addf %28, %29 : vector<64x128xf32>
    %cst_18 = arith.constant 0.000000e+00 : f32
    %31 = vector.broadcast %cst_18 : f32 to vector<64x128xf32>
    %32 = arith.cmpf oge, %30, %31 : vector<64x128xf32>
    %cst_19 = arith.constant 0.00999999977 : f32
    %33 = vector.broadcast %cst_19 : f32 to vector<64x128xf32>
    %34 = arith.mulf %33, %30 : vector<64x128xf32>
    %35 = arith.select %32, %30, %34 : vector<64x128xi1>, vector<64x128xf32>
    %36 = vector.extract_strided_slice %35 {offsets = [0, 0], sizes = [8, 128], strides = [1, 1]} : vector<64x128xf32> to vector<8x128xf32>
    %c11 = arith.constant 11 : index
    %c0_20 = arith.constant 0 : index
    %37 = vector.load %arg12[%c11, %c0_20] : memref<108x128xf32, #tpu.memory_space<vmem>>, vector<8x128xf32>
    tpu.vector_store %arg12[%c11, %c0_20], %36 {strides = array<i32>} : memref<108x128xf32, #tpu.memory_space<vmem>>, vector<8x128xf32>,
    %38 = vector.extract_strided_slice %35 {offsets = [8, 0], sizes = [8, 128], strides = [1, 1]} : vector<64x128xf32> to vector<8x128xf32>
    %c21 = arith.constant 21 : index
    %c0_21 = arith.constant 0 : index
    %39 = vector.load %arg12[%c21, %c0_21] : memref<108x128xf32, #tpu.memory_space<vmem>>, vector<8x128xf32>
    tpu.vector_store %arg12[%c21, %c0_21], %38 {strides = array<i32>} : memref<108x128xf32, #tpu.memory_space<vmem>>, vector<8x128xf32>,
    %40 = vector.extract_strided_slice %35 {offsets = [16, 0], sizes = [8, 128], strides = [1, 1]} : vector<64x128xf32> to vector<8x128xf32>
    %c31 = arith.constant 31 : index
    %c0_22 = arith.constant 0 : index
    %41 = vector.load %arg12[%c31, %c0_22] : memref<108x128xf32, #tpu.memory_space<vmem>>, vector<8x128xf32>
    tpu.vector_store %arg12[%c31, %c0_22], %40 {strides = array<i32>} : memref<108x128xf32, #tpu.memory_space<vmem>>, vector<8x128xf32>,
    %42 = vector.extract_strided_slice %35 {offsets = [24, 0], sizes = [8, 128], strides = [1, 1]} : vector<64x128xf32> to vector<8x128xf32>
    %c41 = arith.constant 41 : index
    %c0_23 = arith.constant 0 : index
    %43 = vector.load %arg12[%c41, %c0_23] : memref<108x128xf32, #tpu.memory_space<vmem>>, vector<8x128xf32>
    tpu.vector_store %arg12[%c41, %c0_23], %42 {strides = array<i32>} : memref<108x128xf32, #tpu.memory_space<vmem>>, vector<8x128xf32>,
    %44 = vector.extract_strided_slice %35 {offsets = [32, 0], sizes = [8, 128], strides = [1, 1]} : vector<64x128xf32> to vector<8x128xf32>
    %c51 = arith.constant 51 : index
    %c0_24 = arith.constant 0 : index
    %45 = vector.load %arg12[%c51, %c0_24] : memref<108x128xf32, #tpu.memory_space<vmem>>, vector<8x128xf32>
    tpu.vector_store %arg12[%c51, %c0_24], %44 {strides = array<i32>} : memref<108x128xf32, #tpu.memory_space<vmem>>, vector<8x128xf32>,
    %46 = vector.extract_strided_slice %35 {offsets = [40, 0], sizes = [8, 128], strides = [1, 1]} : vector<64x128xf32> to vector<8x128xf32>
    %c61 = arith.constant 61 : index
    %c0_25 = arith.constant 0 : index
    %47 = vector.load %arg12[%c61, %c0_25] : memref<108x128xf32, #tpu.memory_space<vmem>>, vector<8x128xf32>
    tpu.vector_store %arg12[%c61, %c0_25], %46 {strides = array<i32>} : memref<108x128xf32, #tpu.memory_space<vmem>>, vector<8x128xf32>,
    %48 = vector.extract_strided_slice %35 {offsets = [48, 0], sizes = [8, 128], strides = [1, 1]} : vector<64x128xf32> to vector<8x128xf32>
    %c71 = arith.constant 71 : index
    %c0_26 = arith.constant 0 : index
    %49 = vector.load %arg12[%c71, %c0_26] : memref<108x128xf32, #tpu.memory_space<vmem>>, vector<8x128xf32>
    tpu.vector_store %arg12[%c71, %c0_26], %48 {strides = array<i32>} : memref<108x128xf32, #tpu.memory_space<vmem>>, vector<8x128xf32>,
    %50 = vector.extract_strided_slice %35 {offsets = [56, 0], sizes = [8, 128], strides = [1, 1]} : vector<64x128xf32> to vector<8x128xf32>
    %c81 = arith.constant 81 : index
    %c0_27 = arith.constant 0 : index
    %51 = vector.load %arg12[%c81, %c0_27] : memref<108x128xf32, #tpu.memory_space<vmem>>, vector<8x128xf32>
    tpu.vector_store %arg12[%c81, %c0_27], %50 {strides = array<i32>} : memref<108x128xf32, #tpu.memory_space<vmem>>, vector<8x128xf32>,
    %cst_28 = arith.constant 0.000000e+00 : f32
    %52 = vector.broadcast %cst_28 : f32 to vector<11x128xf32>
    %c0_29 = arith.constant 0 : index
    %c0_30 = arith.constant 0 : index
    %53 = vector.load %arg12[%c0_29, %c0_30] : memref<108x128xf32, #tpu.memory_space<vmem>>, vector<11x128xf32>
    tpu.vector_store %arg12[%c0_29, %c0_30], %52 {strides = array<i32>} : memref<108x128xf32, #tpu.memory_space<vmem>>, vector<11x128xf32>,
    %cst_31 = arith.constant 0.000000e+00 : f32
    %54 = vector.broadcast %cst_31 : f32 to vector<2x128xf32>
    %c19 = arith.constant 19 : index
    %c0_32 = arith.constant 0 : index
    %55 = vector.load %arg12[%c19, %c0_32] : memref<108x128xf32, #tpu.memory_space<vmem>>, vector<2x128xf32>
    tpu.vector_store %arg12[%c19, %c0_32], %54 {strides = array<i32>} : memref<108x128xf32, #tpu.memory_space<vmem>>, vector<2x128xf32>,
    %cst_33 = arith.constant 0.000000e+00 : f32
    %56 = vector.broadcast %cst_33 : f32 to vector<2x128xf32>
    %c29 = arith.constant 29 : index
    %c0_34 = arith.constant 0 : index
    %57 = vector.load %arg12[%c29, %c0_34] : memref<108x128xf32, #tpu.memory_space<vmem>>, vector<2x128xf32>
    tpu.vector_store %arg12[%c29, %c0_34], %56 {strides = array<i32>} : memref<108x128xf32, #tpu.memory_space<vmem>>, vector<2x128xf32>,
    %cst_35 = arith.constant 0.000000e+00 : f32
    %58 = vector.broadcast %cst_35 : f32 to vector<2x128xf32>
    %c39 = arith.constant 39 : index
    %c0_36 = arith.constant 0 : index
    %59 = vector.load %arg12[%c39, %c0_36] : memref<108x128xf32, #tpu.memory_space<vmem>>, vector<2x128xf32>
    tpu.vector_store %arg12[%c39, %c0_36], %58 {strides = array<i32>} : memref<108x128xf32, #tpu.memory_space<vmem>>, vector<2x128xf32>,
    %cst_37 = arith.constant 0.000000e+00 : f32
    %60 = vector.broadcast %cst_37 : f32 to vector<2x128xf32>
    %c49 = arith.constant 49 : index
    %c0_38 = arith.constant 0 : index
    %61 = vector.load %arg12[%c49, %c0_38] : memref<108x128xf32, #tpu.memory_space<vmem>>, vector<2x128xf32>
    tpu.vector_store %arg12[%c49, %c0_38], %60 {strides = array<i32>} : memref<108x128xf32, #tpu.memory_space<vmem>>, vector<2x128xf32>,
    %cst_39 = arith.constant 0.000000e+00 : f32
    %62 = vector.broadcast %cst_39 : f32 to vector<2x128xf32>
    %c59 = arith.constant 59 : index
    %c0_40 = arith.constant 0 : index
    %63 = vector.load %arg12[%c59, %c0_40] : memref<108x128xf32, #tpu.memory_space<vmem>>, vector<2x128xf32>
    tpu.vector_store %arg12[%c59, %c0_40], %62 {strides = array<i32>} : memref<108x128xf32, #tpu.memory_space<vmem>>, vector<2x128xf32>,
    %cst_41 = arith.constant 0.000000e+00 : f32
    %64 = vector.broadcast %cst_41 : f32 to vector<2x128xf32>
    %c69 = arith.constant 69 : index
    %c0_42 = arith.constant 0 : index
    %65 = vector.load %arg12[%c69, %c0_42] : memref<108x128xf32, #tpu.memory_space<vmem>>, vector<2x128xf32>
    tpu.vector_store %arg12[%c69, %c0_42], %64 {strides = array<i32>} : memref<108x128xf32, #tpu.memory_space<vmem>>, vector<2x128xf32>,
    %cst_43 = arith.constant 0.000000e+00 : f32
    %66 = vector.broadcast %cst_43 : f32 to vector<2x128xf32>
    %c79 = arith.constant 79 : index
    %c0_44 = arith.constant 0 : index
    %67 = vector.load %arg12[%c79, %c0_44] : memref<108x128xf32, #tpu.memory_space<vmem>>, vector<2x128xf32>
    tpu.vector_store %arg12[%c79, %c0_44], %66 {strides = array<i32>} : memref<108x128xf32, #tpu.memory_space<vmem>>, vector<2x128xf32>,
    %cst_45 = arith.constant 0.000000e+00 : f32
    %68 = vector.broadcast %cst_45 : f32 to vector<19x128xf32>
    %c89 = arith.constant 89 : index
    %c0_46 = arith.constant 0 : index
    %69 = vector.load %arg12[%c89, %c0_46] : memref<108x128xf32, #tpu.memory_space<vmem>>, vector<19x128xf32>
    tpu.vector_store %arg12[%c89, %c0_46], %68 {strides = array<i32>} : memref<108x128xf32, #tpu.memory_space<vmem>>, vector<19x128xf32>,
    %cst_47 = arith.constant 0.000000e+00 : f32
    %70 = vector.broadcast %cst_47 : f32 to vector<80x128xf32>
    %c0_48 = arith.constant 0 : index
    %c0_49 = arith.constant 0 : index
    %71 = vector.load %arg12[%c0_48, %c0_49] : memref<108x128xf32, #tpu.memory_space<vmem>>, vector<80x128xf32>
    %c0_50 = arith.constant 0 : index
    %c0_51 = arith.constant 0 : index
    %c0_52 = arith.constant 0 : index
    %72 = vector.load %arg9[%c0_50, %c0_51, %c0_52] : memref<9x128x128xf32, #tpu.memory_space<vmem>>, vector<1x128x128xf32>
    %73 = vector.shape_cast %72 : vector<1x128x128xf32> to vector<128x128xf32>
    %cst_53 = arith.constant dense<0.000000e+00> : vector<80x128xf32>
    %74 = tpu.matmul %71, %73, %cst_53 {dimension_numbers = #tpu.dot_dimension_numbers<[1], [0], [0], [1], [0, 0, 1, 1], [], []>} : vector<80x128xf32>, vector<128x128xf32>, vector<80x128xf32> -> vector<80x128xf32>
    %75 = arith.addf %70, %74 : vector<80x128xf32>
    %c1 = arith.constant 1 : index
    %c0_54 = arith.constant 0 : index
    %76 = vector.load %arg12[%c1, %c0_54] : memref<108x128xf32, #tpu.memory_space<vmem>>, vector<80x128xf32>
    %c1_55 = arith.constant 1 : index
    %c0_56 = arith.constant 0 : index
    %c0_57 = arith.constant 0 : index
    %77 = vector.load %arg9[%c1_55, %c0_56, %c0_57] : memref<9x128x128xf32, #tpu.memory_space<vmem>>, vector<1x128x128xf32>
    %78 = vector.shape_cast %77 : vector<1x128x128xf32> to vector<128x128xf32>
    %cst_58 = arith.constant dense<0.000000e+00> : vector<80x128xf32>
    %79 = tpu.matmul %76, %78, %cst_58 {dimension_numbers = #tpu.dot_dimension_numbers<[1], [0], [0], [1], [0, 0, 1, 1], [], []>} : vector<80x128xf32>, vector<128x128xf32>, vector<80x128xf32> -> vector<80x128xf32>
    %80 = arith.addf %75, %79 : vector<80x128xf32>
    %c2 = arith.constant 2 : index
    %c0_59 = arith.constant 0 : index
    %81 = vector.load %arg12[%c2, %c0_59] : memref<108x128xf32, #tpu.memory_space<vmem>>, vector<80x128xf32>
    %c2_60 = arith.constant 2 : index
    %c0_61 = arith.constant 0 : index
    %c0_62 = arith.constant 0 : index
    %82 = vector.load %arg9[%c2_60, %c0_61, %c0_62] : memref<9x128x128xf32, #tpu.memory_space<vmem>>, vector<1x128x128xf32>
    %83 = vector.shape_cast %82 : vector<1x128x128xf32> to vector<128x128xf32>
    %cst_63 = arith.constant dense<0.000000e+00> : vector<80x128xf32>
    %84 = tpu.matmul %81, %83, %cst_63 {dimension_numbers = #tpu.dot_dimension_numbers<[1], [0], [0], [1], [0, 0, 1, 1], [], []>} : vector<80x128xf32>, vector<128x128xf32>, vector<80x128xf32> -> vector<80x128xf32>
    %85 = arith.addf %80, %84 : vector<80x128xf32>
    %c10 = arith.constant 10 : index
    %c0_64 = arith.constant 0 : index
    %86 = vector.load %arg12[%c10, %c0_64] : memref<108x128xf32, #tpu.memory_space<vmem>>, vector<80x128xf32>
    %c3 = arith.constant 3 : index
    %c0_65 = arith.constant 0 : index
    %c0_66 = arith.constant 0 : index
    %87 = vector.load %arg9[%c3, %c0_65, %c0_66] : memref<9x128x128xf32, #tpu.memory_space<vmem>>, vector<1x128x128xf32>
    %88 = vector.shape_cast %87 : vector<1x128x128xf32> to vector<128x128xf32>
    %cst_67 = arith.constant dense<0.000000e+00> : vector<80x128xf32>
    %89 = tpu.matmul %86, %88, %cst_67 {dimension_numbers = #tpu.dot_dimension_numbers<[1], [0], [0], [1], [0, 0, 1, 1], [], []>} : vector<80x128xf32>, vector<128x128xf32>, vector<80x128xf32> -> vector<80x128xf32>
    %90 = arith.addf %85, %89 : vector<80x128xf32>
    %c11_68 = arith.constant 11 : index
    %c0_69 = arith.constant 0 : index
    %91 = vector.load %arg12[%c11_68, %c0_69] : memref<108x128xf32, #tpu.memory_space<vmem>>, vector<80x128xf32>
    %c4 = arith.constant 4 : index
    %c0_70 = arith.constant 0 : index
    %c0_71 = arith.constant 0 : index
    %92 = vector.load %arg9[%c4, %c0_70, %c0_71] : memref<9x128x128xf32, #tpu.memory_space<vmem>>, vector<1x128x128xf32>
    %93 = vector.shape_cast %92 : vector<1x128x128xf32> to vector<128x128xf32>
    %cst_72 = arith.constant dense<0.000000e+00> : vector<80x128xf32>
    %94 = tpu.matmul %91, %93, %cst_72 {dimension_numbers = #tpu.dot_dimension_numbers<[1], [0], [0], [1], [0, 0, 1, 1], [], []>} : vector<80x128xf32>, vector<128x128xf32>, vector<80x128xf32> -> vector<80x128xf32>
    %95 = arith.addf %90, %94 : vector<80x128xf32>
    %c12 = arith.constant 12 : index
    %c0_73 = arith.constant 0 : index
    %96 = vector.load %arg12[%c12, %c0_73] : memref<108x128xf32, #tpu.memory_space<vmem>>, vector<80x128xf32>
    %c5 = arith.constant 5 : index
    %c0_74 = arith.constant 0 : index
    %c0_75 = arith.constant 0 : index
    %97 = vector.load %arg9[%c5, %c0_74, %c0_75] : memref<9x128x128xf32, #tpu.memory_space<vmem>>, vector<1x128x128xf32>
    %98 = vector.shape_cast %97 : vector<1x128x128xf32> to vector<128x128xf32>
    %cst_76 = arith.constant dense<0.000000e+00> : vector<80x128xf32>
    %99 = tpu.matmul %96, %98, %cst_76 {dimension_numbers = #tpu.dot_dimension_numbers<[1], [0], [0], [1], [0, 0, 1, 1], [], []>} : vector<80x128xf32>, vector<128x128xf32>, vector<80x128xf32> -> vector<80x128xf32>
    %100 = arith.addf %95, %99 : vector<80x128xf32>
    %c20 = arith.constant 20 : index
    %c0_77 = arith.constant 0 : index
    %101 = vector.load %arg12[%c20, %c0_77] : memref<108x128xf32, #tpu.memory_space<vmem>>, vector<80x128xf32>
    %c6 = arith.constant 6 : index
    %c0_78 = arith.constant 0 : index
    %c0_79 = arith.constant 0 : index
    %102 = vector.load %arg9[%c6, %c0_78, %c0_79] : memref<9x128x128xf32, #tpu.memory_space<vmem>>, vector<1x128x128xf32>
    %103 = vector.shape_cast %102 : vector<1x128x128xf32> to vector<128x128xf32>
    %cst_80 = arith.constant dense<0.000000e+00> : vector<80x128xf32>
    %104 = tpu.matmul %101, %103, %cst_80 {dimension_numbers = #tpu.dot_dimension_numbers<[1], [0], [0], [1], [0, 0, 1, 1], [], []>} : vector<80x128xf32>, vector<128x128xf32>, vector<80x128xf32> -> vector<80x128xf32>
    %105 = arith.addf %100, %104 : vector<80x128xf32>
    %c21_81 = arith.constant 21 : index
    %c0_82 = arith.constant 0 : index
    %106 = vector.load %arg12[%c21_81, %c0_82] : memref<108x128xf32, #tpu.memory_space<vmem>>, vector<80x128xf32>
    %c7 = arith.constant 7 : index
    %c0_83 = arith.constant 0 : index
    %c0_84 = arith.constant 0 : index
    %107 = vector.load %arg9[%c7, %c0_83, %c0_84] : memref<9x128x128xf32, #tpu.memory_space<vmem>>, vector<1x128x128xf32>
    %108 = vector.shape_cast %107 : vector<1x128x128xf32> to vector<128x128xf32>
    %cst_85 = arith.constant dense<0.000000e+00> : vector<80x128xf32>
    %109 = tpu.matmul %106, %108, %cst_85 {dimension_numbers = #tpu.dot_dimension_numbers<[1], [0], [0], [1], [0, 0, 1, 1], [], []>} : vector<80x128xf32>, vector<128x128xf32>, vector<80x128xf32> -> vector<80x128xf32>
    %110 = arith.addf %105, %109 : vector<80x128xf32>
    %c22 = arith.constant 22 : index
    %c0_86 = arith.constant 0 : index
    %111 = vector.load %arg12[%c22, %c0_86] : memref<108x128xf32, #tpu.memory_space<vmem>>, vector<80x128xf32>
    %c8 = arith.constant 8 : index
    %c0_87 = arith.constant 0 : index
    %c0_88 = arith.constant 0 : index
    %112 = vector.load %arg9[%c8, %c0_87, %c0_88] : memref<9x128x128xf32, #tpu.memory_space<vmem>>, vector<1x128x128xf32>
    %113 = vector.shape_cast %112 : vector<1x128x128xf32> to vector<128x128xf32>
    %cst_89 = arith.constant dense<0.000000e+00> : vector<80x128xf32>
    %114 = tpu.matmul %111, %113, %cst_89 {dimension_numbers = #tpu.dot_dimension_numbers<[1], [0], [0], [1], [0, 0, 1, 1], [], []>} : vector<80x128xf32>, vector<128x128xf32>, vector<80x128xf32> -> vector<80x128xf32>
    %115 = arith.addf %110, %114 : vector<80x128xf32>
    %c0_90 = arith.constant 0 : index
    %c0_91 = arith.constant 0 : index
    %116 = vector.load %arg8[%c0_90, %c0_91] : memref<80x128xf32, #tpu.memory_space<vmem>>, vector<80x128xf32>
    %117 = arith.mulf %115, %116 : vector<80x128xf32>
    %cst_92 = arith.constant dense<0.000000e+00> : vector<128xf32>
    %118 = vector.multi_reduction <add>, %117, %cst_92 [0] : vector<80x128xf32> to vector<128xf32>
    %119 = vector.shape_cast %118 : vector<128xf32> to vector<1x128xf32>
    %120 = arith.mulf %117, %115 : vector<80x128xf32>
    %cst_93 = arith.constant dense<0.000000e+00> : vector<128xf32>
    %121 = vector.multi_reduction <add>, %120, %cst_93 [0] : vector<80x128xf32> to vector<128xf32>
    %122 = vector.shape_cast %121 : vector<128xf32> to vector<1x128xf32>
    %c0_94 = arith.constant 0 : index
    %c0_95 = arith.constant 0 : index
    %123 = vector.load %arg4[%c0_94, %c0_95] : memref<1x128xf32, #tpu.memory_space<vmem>>, vector<1x128xf32>
    %c0_96 = arith.constant 0 : index
    %c0_97 = arith.constant 0 : index
    %124 = vector.load %arg5[%c0_96, %c0_97] : memref<1x128xf32, #tpu.memory_space<vmem>>, vector<1x128xf32>
    %cst_98 = arith.constant dense<0.000000e+00> : vector<1x8xf32>
    %125 = tpu.matmul %119, %0, %cst_98 {dimension_numbers = #tpu.dot_dimension_numbers<[1], [0], [0], [1], [0, 0, 1, 1], [], []>} : vector<1x128xf32>, vector<128x8xf32>, vector<1x8xf32> -> vector<1x8xf32>
    %cst_99 = arith.constant 1.024000e+03 : f32
    %126 = vector.broadcast %cst_99 : f32 to vector<1x8xf32>
    %127 = arith.divf %125, %126 : vector<1x8xf32>
    %cst_100 = arith.constant dense<0.000000e+00> : vector<1x8xf32>
    %128 = tpu.matmul %122, %0, %cst_100 {dimension_numbers = #tpu.dot_dimension_numbers<[1], [0], [0], [1], [0, 0, 1, 1], [], []>} : vector<1x128xf32>, vector<128x8xf32>, vector<1x8xf32> -> vector<1x8xf32>
    %cst_101 = arith.constant 1.024000e+03 : f32
    %129 = vector.broadcast %cst_101 : f32 to vector<1x8xf32>
    %130 = arith.divf %128, %129 : vector<1x8xf32>
    %131 = arith.mulf %127, %127 : vector<1x8xf32>
    %132 = arith.subf %130, %131 : vector<1x8xf32>
    %cst_102 = arith.constant 9.99999974E-6 : f32
    %133 = vector.broadcast %cst_102 : f32 to vector<1x8xf32>
    %134 = arith.addf %132, %133 : vector<1x8xf32>
    %135 = math.rsqrt %134 : vector<1x8xf32>
    %cst_103 = arith.constant dense<0.000000e+00> : vector<1x128xf32>
    %136 = tpu.matmul %127, %1, %cst_103 {dimension_numbers = #tpu.dot_dimension_numbers<[1], [0], [0], [1], [0, 0, 1, 1], [], []>} : vector<1x8xf32>, vector<8x128xf32>, vector<1x128xf32> -> vector<1x128xf32>
    %cst_104 = arith.constant dense<0.000000e+00> : vector<1x128xf32>
    %137 = tpu.matmul %135, %1, %cst_104 {dimension_numbers = #tpu.dot_dimension_numbers<[1], [0], [0], [1], [0, 0, 1, 1], [], []>} : vector<1x8xf32>, vector<8x128xf32>, vector<1x128xf32> -> vector<1x128xf32>
    %138 = arith.mulf %137, %123 : vector<1x128xf32>
    %139 = arith.mulf %136, %138 : vector<1x128xf32>
    %140 = arith.subf %124, %139 : vector<1x128xf32>
    %141 = vector.broadcast %138 : vector<1x128xf32> to vector<80x128xf32>
    %142 = arith.mulf %115, %141 : vector<80x128xf32>
    %143 = vector.broadcast %140 : vector<1x128xf32> to vector<80x128xf32>
    %144 = arith.addf %142, %143 : vector<80x128xf32>
    %cst_105 = arith.constant 0.000000e+00 : f32
    %145 = vector.broadcast %cst_105 : f32 to vector<80x128xf32>
    %146 = arith.cmpf oge, %144, %145 : vector<80x128xf32>
    %cst_106 = arith.constant 0.00999999977 : f32
    %147 = vector.broadcast %cst_106 : f32 to vector<80x128xf32>
    %148 = arith.mulf %147, %144 : vector<80x128xf32>
    %149 = arith.select %146, %144, %148 : vector<80x128xi1>, vector<80x128xf32>
    %c11_107 = arith.constant 11 : index
    %c0_108 = arith.constant 0 : index
    %150 = vector.load %arg12[%c11_107, %c0_108] : memref<108x128xf32, #tpu.memory_space<vmem>>, vector<80x128xf32>
    tpu.vector_store %arg12[%c11_107, %c0_108], %149 {strides = array<i32>} : memref<108x128xf32, #tpu.memory_space<vmem>>, vector<80x128xf32>,
    %cst_109 = arith.constant 0.000000e+00 : f32
    %151 = vector.broadcast %cst_109 : f32 to vector<11x128xf32>
    %c0_110 = arith.constant 0 : index
    %c0_111 = arith.constant 0 : index
    %152 = vector.load %arg12[%c0_110, %c0_111] : memref<108x128xf32, #tpu.memory_space<vmem>>, vector<11x128xf32>
    tpu.vector_store %arg12[%c0_110, %c0_111], %151 {strides = array<i32>} : memref<108x128xf32, #tpu.memory_space<vmem>>, vector<11x128xf32>,
    %cst_112 = arith.constant 0.000000e+00 : f32
    %153 = vector.broadcast %cst_112 : f32 to vector<2x128xf32>
    %c19_113 = arith.constant 19 : index
    %c0_114 = arith.constant 0 : index
    %154 = vector.load %arg12[%c19_113, %c0_114] : memref<108x128xf32, #tpu.memory_space<vmem>>, vector<2x128xf32>
    tpu.vector_store %arg12[%c19_113, %c0_114], %153 {strides = array<i32>} : memref<108x128xf32, #tpu.memory_space<vmem>>, vector<2x128xf32>,
    %cst_115 = arith.constant 0.000000e+00 : f32
    %155 = vector.broadcast %cst_115 : f32 to vector<2x128xf32>
    %c29_116 = arith.constant 29 : index
    %c0_117 = arith.constant 0 : index
    %156 = vector.load %arg12[%c29_116, %c0_117] : memref<108x128xf32, #tpu.memory_space<vmem>>, vector<2x128xf32>
    tpu.vector_store %arg12[%c29_116, %c0_117], %155 {strides = array<i32>} : memref<108x128xf32, #tpu.memory_space<vmem>>, vector<2x128xf32>,
    %cst_118 = arith.constant 0.000000e+00 : f32
    %157 = vector.broadcast %cst_118 : f32 to vector<2x128xf32>
    %c39_119 = arith.constant 39 : index
    %c0_120 = arith.constant 0 : index
    %158 = vector.load %arg12[%c39_119, %c0_120] : memref<108x128xf32, #tpu.memory_space<vmem>>, vector<2x128xf32>
    tpu.vector_store %arg12[%c39_119, %c0_120], %157 {strides = array<i32>} : memref<108x128xf32, #tpu.memory_space<vmem>>, vector<2x128xf32>,
    %cst_121 = arith.constant 0.000000e+00 : f32
    %159 = vector.broadcast %cst_121 : f32 to vector<2x128xf32>
    %c49_122 = arith.constant 49 : index
    %c0_123 = arith.constant 0 : index
    %160 = vector.load %arg12[%c49_122, %c0_123] : memref<108x128xf32, #tpu.memory_space<vmem>>, vector<2x128xf32>
    tpu.vector_store %arg12[%c49_122, %c0_123], %159 {strides = array<i32>} : memref<108x128xf32, #tpu.memory_space<vmem>>, vector<2x128xf32>,
    %cst_124 = arith.constant 0.000000e+00 : f32
    %161 = vector.broadcast %cst_124 : f32 to vector<2x128xf32>
    %c59_125 = arith.constant 59 : index
    %c0_126 = arith.constant 0 : index
    %162 = vector.load %arg12[%c59_125, %c0_126] : memref<108x128xf32, #tpu.memory_space<vmem>>, vector<2x128xf32>
    tpu.vector_store %arg12[%c59_125, %c0_126], %161 {strides = array<i32>} : memref<108x128xf32, #tpu.memory_space<vmem>>, vector<2x128xf32>,
    %cst_127 = arith.constant 0.000000e+00 : f32
    %163 = vector.broadcast %cst_127 : f32 to vector<2x128xf32>
    %c69_128 = arith.constant 69 : index
    %c0_129 = arith.constant 0 : index
    %164 = vector.load %arg12[%c69_128, %c0_129] : memref<108x128xf32, #tpu.memory_space<vmem>>, vector<2x128xf32>
    tpu.vector_store %arg12[%c69_128, %c0_129], %163 {strides = array<i32>} : memref<108x128xf32, #tpu.memory_space<vmem>>, vector<2x128xf32>,
    %cst_130 = arith.constant 0.000000e+00 : f32
    %165 = vector.broadcast %cst_130 : f32 to vector<2x128xf32>
    %c79_131 = arith.constant 79 : index
    %c0_132 = arith.constant 0 : index
    %166 = vector.load %arg12[%c79_131, %c0_132] : memref<108x128xf32, #tpu.memory_space<vmem>>, vector<2x128xf32>
    tpu.vector_store %arg12[%c79_131, %c0_132], %165 {strides = array<i32>} : memref<108x128xf32, #tpu.memory_space<vmem>>, vector<2x128xf32>,
    %cst_133 = arith.constant 0.000000e+00 : f32
    %167 = vector.broadcast %cst_133 : f32 to vector<19x128xf32>
    %c89_134 = arith.constant 89 : index
    %c0_135 = arith.constant 0 : index
    %168 = vector.load %arg12[%c89_134, %c0_135] : memref<108x128xf32, #tpu.memory_space<vmem>>, vector<19x128xf32>
    tpu.vector_store %arg12[%c89_134, %c0_135], %167 {strides = array<i32>} : memref<108x128xf32, #tpu.memory_space<vmem>>, vector<19x128xf32>,
    %cst_136 = arith.constant 0.000000e+00 : f32
    %169 = vector.broadcast %cst_136 : f32 to vector<80x128xf32>
    %c0_137 = arith.constant 0 : index
    %c0_138 = arith.constant 0 : index
    %170 = vector.load %arg12[%c0_137, %c0_138] : memref<108x128xf32, #tpu.memory_space<vmem>>, vector<80x128xf32>
    %c0_139 = arith.constant 0 : index
    %c0_140 = arith.constant 0 : index
    %c0_141 = arith.constant 0 : index
    %171 = vector.load %arg10[%c0_139, %c0_140, %c0_141] : memref<9x128x128xf32, #tpu.memory_space<vmem>>, vector<1x128x128xf32>
    %172 = vector.shape_cast %171 : vector<1x128x128xf32> to vector<128x128xf32>
    %cst_142 = arith.constant dense<0.000000e+00> : vector<80x128xf32>
    %173 = tpu.matmul %170, %172, %cst_142 {dimension_numbers = #tpu.dot_dimension_numbers<[1], [0], [0], [1], [0, 0, 1, 1], [], []>} : vector<80x128xf32>, vector<128x128xf32>, vector<80x128xf32> -> vector<80x128xf32>
    %174 = arith.addf %169, %173 : vector<80x128xf32>
    %c1_143 = arith.constant 1 : index
    %c0_144 = arith.constant 0 : index
    %175 = vector.load %arg12[%c1_143, %c0_144] : memref<108x128xf32, #tpu.memory_space<vmem>>, vector<80x128xf32>
    %c1_145 = arith.constant 1 : index
    %c0_146 = arith.constant 0 : index
    %c0_147 = arith.constant 0 : index
    %176 = vector.load %arg10[%c1_145, %c0_146, %c0_147] : memref<9x128x128xf32, #tpu.memory_space<vmem>>, vector<1x128x128xf32>
    %177 = vector.shape_cast %176 : vector<1x128x128xf32> to vector<128x128xf32>
    %cst_148 = arith.constant dense<0.000000e+00> : vector<80x128xf32>
    %178 = tpu.matmul %175, %177, %cst_148 {dimension_numbers = #tpu.dot_dimension_numbers<[1], [0], [0], [1], [0, 0, 1, 1], [], []>} : vector<80x128xf32>, vector<128x128xf32>, vector<80x128xf32> -> vector<80x128xf32>
    %179 = arith.addf %174, %178 : vector<80x128xf32>
    %c2_149 = arith.constant 2 : index
    %c0_150 = arith.constant 0 : index
    %180 = vector.load %arg12[%c2_149, %c0_150] : memref<108x128xf32, #tpu.memory_space<vmem>>, vector<80x128xf32>
    %c2_151 = arith.constant 2 : index
    %c0_152 = arith.constant 0 : index
    %c0_153 = arith.constant 0 : index
    %181 = vector.load %arg10[%c2_151, %c0_152, %c0_153] : memref<9x128x128xf32, #tpu.memory_space<vmem>>, vector<1x128x128xf32>
    %182 = vector.shape_cast %181 : vector<1x128x128xf32> to vector<128x128xf32>
    %cst_154 = arith.constant dense<0.000000e+00> : vector<80x128xf32>
    %183 = tpu.matmul %180, %182, %cst_154 {dimension_numbers = #tpu.dot_dimension_numbers<[1], [0], [0], [1], [0, 0, 1, 1], [], []>} : vector<80x128xf32>, vector<128x128xf32>, vector<80x128xf32> -> vector<80x128xf32>
    %184 = arith.addf %179, %183 : vector<80x128xf32>
    %c10_155 = arith.constant 10 : index
    %c0_156 = arith.constant 0 : index
    %185 = vector.load %arg12[%c10_155, %c0_156] : memref<108x128xf32, #tpu.memory_space<vmem>>, vector<80x128xf32>
    %c3_157 = arith.constant 3 : index
    %c0_158 = arith.constant 0 : index
    %c0_159 = arith.constant 0 : index
    %186 = vector.load %arg10[%c3_157, %c0_158, %c0_159] : memref<9x128x128xf32, #tpu.memory_space<vmem>>, vector<1x128x128xf32>
    %187 = vector.shape_cast %186 : vector<1x128x128xf32> to vector<128x128xf32>
    %cst_160 = arith.constant dense<0.000000e+00> : vector<80x128xf32>
    %188 = tpu.matmul %185, %187, %cst_160 {dimension_numbers = #tpu.dot_dimension_numbers<[1], [0], [0], [1], [0, 0, 1, 1], [], []>} : vector<80x128xf32>, vector<128x128xf32>, vector<80x128xf32> -> vector<80x128xf32>
    %189 = arith.addf %184, %188 : vector<80x128xf32>
    %c11_161 = arith.constant 11 : index
    %c0_162 = arith.constant 0 : index
    %190 = vector.load %arg12[%c11_161, %c0_162] : memref<108x128xf32, #tpu.memory_space<vmem>>, vector<80x128xf32>
    %c4_163 = arith.constant 4 : index
    %c0_164 = arith.constant 0 : index
    %c0_165 = arith.constant 0 : index
    %191 = vector.load %arg10[%c4_163, %c0_164, %c0_165] : memref<9x128x128xf32, #tpu.memory_space<vmem>>, vector<1x128x128xf32>
    %192 = vector.shape_cast %191 : vector<1x128x128xf32> to vector<128x128xf32>
    %cst_166 = arith.constant dense<0.000000e+00> : vector<80x128xf32>
    %193 = tpu.matmul %190, %192, %cst_166 {dimension_numbers = #tpu.dot_dimension_numbers<[1], [0], [0], [1], [0, 0, 1, 1], [], []>} : vector<80x128xf32>, vector<128x128xf32>, vector<80x128xf32> -> vector<80x128xf32>
    %194 = arith.addf %189, %193 : vector<80x128xf32>
    %c12_167 = arith.constant 12 : index
    %c0_168 = arith.constant 0 : index
    %195 = vector.load %arg12[%c12_167, %c0_168] : memref<108x128xf32, #tpu.memory_space<vmem>>, vector<80x128xf32>
    %c5_169 = arith.constant 5 : index
    %c0_170 = arith.constant 0 : index
    %c0_171 = arith.constant 0 : index
    %196 = vector.load %arg10[%c5_169, %c0_170, %c0_171] : memref<9x128x128xf32, #tpu.memory_space<vmem>>, vector<1x128x128xf32>
    %197 = vector.shape_cast %196 : vector<1x128x128xf32> to vector<128x128xf32>
    %cst_172 = arith.constant dense<0.000000e+00> : vector<80x128xf32>
    %198 = tpu.matmul %195, %197, %cst_172 {dimension_numbers = #tpu.dot_dimension_numbers<[1], [0], [0], [1], [0, 0, 1, 1], [], []>} : vector<80x128xf32>, vector<128x128xf32>, vector<80x128xf32> -> vector<80x128xf32>
    %199 = arith.addf %194, %198 : vector<80x128xf32>
    %c20_173 = arith.constant 20 : index
    %c0_174 = arith.constant 0 : index
    %200 = vector.load %arg12[%c20_173, %c0_174] : memref<108x128xf32, #tpu.memory_space<vmem>>, vector<80x128xf32>
    %c6_175 = arith.constant 6 : index
    %c0_176 = arith.constant 0 : index
    %c0_177 = arith.constant 0 : index
    %201 = vector.load %arg10[%c6_175, %c0_176, %c0_177] : memref<9x128x128xf32, #tpu.memory_space<vmem>>, vector<1x128x128xf32>
    %202 = vector.shape_cast %201 : vector<1x128x128xf32> to vector<128x128xf32>
    %cst_178 = arith.constant dense<0.000000e+00> : vector<80x128xf32>
    %203 = tpu.matmul %200, %202, %cst_178 {dimension_numbers = #tpu.dot_dimension_numbers<[1], [0], [0], [1], [0, 0, 1, 1], [], []>} : vector<80x128xf32>, vector<128x128xf32>, vector<80x128xf32> -> vector<80x128xf32>
    %204 = arith.addf %199, %203 : vector<80x128xf32>
    %c21_179 = arith.constant 21 : index
    %c0_180 = arith.constant 0 : index
    %205 = vector.load %arg12[%c21_179, %c0_180] : memref<108x128xf32, #tpu.memory_space<vmem>>, vector<80x128xf32>
    %c7_181 = arith.constant 7 : index
    %c0_182 = arith.constant 0 : index
    %c0_183 = arith.constant 0 : index
    %206 = vector.load %arg10[%c7_181, %c0_182, %c0_183] : memref<9x128x128xf32, #tpu.memory_space<vmem>>, vector<1x128x128xf32>
    %207 = vector.shape_cast %206 : vector<1x128x128xf32> to vector<128x128xf32>
    %cst_184 = arith.constant dense<0.000000e+00> : vector<80x128xf32>
    %208 = tpu.matmul %205, %207, %cst_184 {dimension_numbers = #tpu.dot_dimension_numbers<[1], [0], [0], [1], [0, 0, 1, 1], [], []>} : vector<80x128xf32>, vector<128x128xf32>, vector<80x128xf32> -> vector<80x128xf32>
    %209 = arith.addf %204, %208 : vector<80x128xf32>
    %c22_185 = arith.constant 22 : index
    %c0_186 = arith.constant 0 : index
    %210 = vector.load %arg12[%c22_185, %c0_186] : memref<108x128xf32, #tpu.memory_space<vmem>>, vector<80x128xf32>
    %c8_187 = arith.constant 8 : index
    %c0_188 = arith.constant 0 : index
    %c0_189 = arith.constant 0 : index
    %211 = vector.load %arg10[%c8_187, %c0_188, %c0_189] : memref<9x128x128xf32, #tpu.memory_space<vmem>>, vector<1x128x128xf32>
    %212 = vector.shape_cast %211 : vector<1x128x128xf32> to vector<128x128xf32>
    %cst_190 = arith.constant dense<0.000000e+00> : vector<80x128xf32>
    %213 = tpu.matmul %210, %212, %cst_190 {dimension_numbers = #tpu.dot_dimension_numbers<[1], [0], [0], [1], [0, 0, 1, 1], [], []>} : vector<80x128xf32>, vector<128x128xf32>, vector<80x128xf32> -> vector<80x128xf32>
    %214 = arith.addf %209, %213 : vector<80x128xf32>
    %215 = vector.shape_cast %214 : vector<80x128xf32> to vector<8x10x128xf32>
    %216 = vector.extract_strided_slice %215 {offsets = [0, 0, 0], sizes = [8, 8, 128], strides = [1, 1, 1]} : vector<8x10x128xf32> to vector<8x8x128xf32>
    %217 = vector.shape_cast %216 : vector<8x8x128xf32> to vector<64x128xf32>
    %218 = arith.addf %217, %3 : vector<64x128xf32>
    %c0_191 = arith.constant 0 : index
    %c0_192 = arith.constant 0 : index
    %c0_193 = arith.constant 0 : index
    %219 = vector.load %arg11[%c0_191, %c0_192, %c0_193] : memref<1x64x128xf32, #tpu.memory_space<vmem>>, vector<1x64x128xf32>
    %220 = vector.shape_cast %219 : vector<1x64x128xf32> to vector<64x128xf32>
    %221 = vector.shape_cast %218 : vector<64x128xf32> to vector<1x64x128xf32>
    tpu.vector_store %arg11[%c0_191, %c0_192, %c0_193], %221 {strides = array<i32>} : memref<1x64x128xf32, #tpu.memory_space<vmem>>, vector<1x64x128xf32>,
    return
  }
  func.func @transform_0(%arg0: i32) -> (i32, i32, i32) {
    %c0_i32 = arith.constant 0 : i32
    %c0_i32_0 = arith.constant 0 : i32
    %c0_i32_1 = arith.constant 0 : i32
    return %arg0, %c0_i32, %c0_i32_0 : i32, i32, i32
  }
  func.func @transform_1(%arg0: i32) -> (i32, i32) {
    %c0_i32 = arith.constant 0 : i32
    %c0_i32_0 = arith.constant 0 : i32
    %c0_i32_1 = arith.constant 0 : i32
    return %c0_i32, %c0_i32_0 : i32, i32
  }
  func.func @transform_2(%arg0: i32) -> (i32, i32) {
    %c0_i32 = arith.constant 0 : i32
    %c0_i32_0 = arith.constant 0 : i32
    %c0_i32_1 = arith.constant 0 : i32
    return %c0_i32, %c0_i32_0 : i32, i32
  }
  func.func @transform_3(%arg0: i32) -> (i32, i32) {
    %c0_i32 = arith.constant 0 : i32
    %c0_i32_0 = arith.constant 0 : i32
    %c0_i32_1 = arith.constant 0 : i32
    return %c0_i32, %c0_i32_0 : i32, i32
  }
  func.func @transform_4(%arg0: i32) -> (i32, i32) {
    %c0_i32 = arith.constant 0 : i32
    %c0_i32_0 = arith.constant 0 : i32
    %c0_i32_1 = arith.constant 0 : i32
    return %c0_i32, %c0_i32_0 : i32, i32
  }
  func.func @transform_5(%arg0: i32) -> (i32, i32) {
    %c0_i32 = arith.constant 0 : i32
    %c0_i32_0 = arith.constant 0 : i32
    %c0_i32_1 = arith.constant 0 : i32
    return %c0_i32, %c0_i32_0 : i32, i32
  }
  func.func @transform_6(%arg0: i32) -> (i32, i32) {
    %c0_i32 = arith.constant 0 : i32
    %c0_i32_0 = arith.constant 0 : i32
    %c0_i32_1 = arith.constant 0 : i32
    return %c0_i32, %c0_i32_0 : i32, i32
  }
  func.func @transform_7(%arg0: i32) -> (i32, i32) {
    %c0_i32 = arith.constant 0 : i32
    %c0_i32_0 = arith.constant 0 : i32
    %c0_i32_1 = arith.constant 0 : i32
    return %c0_i32, %c0_i32_0 : i32, i32
  }
  func.func @transform_8(%arg0: i32) -> (i32, i32, i32) {
    %c0_i32 = arith.constant 0 : i32
    %c0_i32_0 = arith.constant 0 : i32
    %c0_i32_1 = arith.constant 0 : i32
    %c0_i32_2 = arith.constant 0 : i32
    return %c0_i32, %c0_i32_0, %c0_i32_1 : i32, i32, i32
  }
  func.func @transform_9(%arg0: i32) -> (i32, i32, i32) {
    %c0_i32 = arith.constant 0 : i32
    %c0_i32_0 = arith.constant 0 : i32
    %c0_i32_1 = arith.constant 0 : i32
    %c0_i32_2 = arith.constant 0 : i32
    return %c0_i32, %c0_i32_0, %c0_i32_1 : i32, i32, i32
  }
  func.func @transform_10(%arg0: i32) -> (i32, i32, i32) {
    %c0_i32 = arith.constant 0 : i32
    %c0_i32_0 = arith.constant 0 : i32
    %c0_i32_1 = arith.constant 0 : i32
    return %arg0, %c0_i32, %c0_i32_0 : i32, i32, i32
  }
}

</mosaic_0001>

<bundles_post_ra>
// kernel: no_bottleneck_forward.1
= control target key start
LH: loop header
LB: loop body
LE: loop exit
PB: predicated region body
PF: predicated region fallthrough
CT: control target
= control target key end

     0   :  { %15 = vsyncpa [#allocation4], 0  ;;  %s6462_s13 = smov 0   ;;  %s8009_s0 = inlined_call_operand.vmem [shape: f32[2,64,128], index: 0, kind: input, shape index: {}, may-alias: {0,10}]   ;;  %s8010_s1 = inlined_call_operand.vmem [shape: f32[1,128], index: 1, kind: input, shape index: {}]   ;;  %s8011_s2 = inlined_call_operand.vmem [shape: f32[1,128], index: 2, kind: input, shape index: {}]   ;;  %s8012_s3 = inlined_call_operand.vmem [shape: f32[1,128], index: 3, kind: input, shape index: {}]   ;;  %s8013_s4 = inlined_call_operand.vmem [shape: f32[1,128], index: 4, kind: input, shape index: {}]   ;;  %s8014_s5 = inlined_call_operand.vmem [shape: f32[128,8], index: 5, kind: input, shape index: {}]   ;;  %s8015_s6 = inlined_call_operand.vmem [shape: f32[8,128], index: 6, kind: input, shape index: {}]   ;;  %s8016_s7 = inlined_call_operand.vmem [shape: f32[80,128], index: 7, kind: input, shape index: {}]   ;;  %s8017_s8 = inlined_call_operand.vmem [shape: f32[9,128,128], index: 8, kind: input, shape index: {}]   ;;  %s8018_s9 = inlined_call_operand.hbm [shape: f32[9,128,128], index: 9, kind: input, shape index: {}]   ;;  %s8019_s10 = inlined_call_operand.vmem [shape: f32[2,64,128], index: 10, kind: output, shape index: {}, may-alias: {0,10}]  }
   0x1 LB: > { %s6468_s14 = sadd.s32 4294967295, %s6399_s13   ;;  %p4605_p0 = scmp.ge.s32.totalorder %s6399_s13, 1  ;;  %s6399_s13 = sphi %s6462_s13, %s21_s13  }
   0x2   : > { %p267_p1 = scmp.lt.s32.totalorder %s6399_s13, 3  ;;  %s6401_s15 = smov [#allocation3]  }
   0x3   : > { %s303_s16 = sshll.u32 %s6401_s15, 4  ;;  %p6308_p3 = scmp.eq.s32.totalorder %s6468_s14, 0  ;;  %s304_s16 = int_to_ptr.vmem [resolvable:$true] %s303_s16 }
   0x4   : > { %p6472_p2 = pnand %p4605_p0, %p267_p1  ;;  %s6374_s18 = scalar_lea.vmem %s304_s16, 18432 }
   0x5   : > { %p6375_p7 = scmp.ne.s32.totalorder %s304_s16, %s6374_s18  ;;  %p6382_p10 = scmp.lt.s32.totalorder %s304_s16, %s304_s16 }
   0x6   : > { %p6304_p4 = pneg %p6472_p2  ;;  %p6383_p11 = scmp.lt.s32.totalorder %s6374_s18, %s6374_s18 }
   0x8   : > { %p6305_p5 = pnand %p6308_p3, %p6304_p4  ;;  %p6384_p12 = por %p6383_p11, %p6382_p10 }
   0xa   : > { %p6365_p6 = pneg %p6305_p5 }
   0xc   : > { %p6377_p8 = pnand %p6375_p7, %p6365_p6 }
   0xe   : > { %p6378_p9 = pneg %p6377_p8 }
  0x10   : > { %p6385_p13 = pnand %p6384_p12, %p6378_p9 }
  0x12   : > { %6388 = shalt.err (!%p6385_p13)
}
  0x13   : > { %s6402_s19 = smov 128   ;;  %s6403_s20 = smov 8  }
  0x14   : > { %6307 = dma.hbm_to_vmem [thread:$0]  (!%p6305_p5), %s8018_s9, 18432, %s304_s16, [#allocation4], %s6402_s19, %s6402_s19, %s6403_s20  }
  0x15   : > { %327 = sbr.rel (%p6472_p2) target bundleno = 1711 (0x6af), region = 60 }
  0x1a   : > { %6394 = dma.done.wait (%p6308_p3), [#allocation4], 18432  }
  0x1b   : > { %6396 = vsyncadd (%p6308_p3), [#allocation4], 4294948864  ;;  %p365_p0 = scmp.lt.s32.totalorder %s6468_s14, 1  ;;  %v6404_v0 = vmov 0.0   ;;  %vm6405_vm0 = vmmov 0   ;;  %v390_v1 = vld [vmem:[%s8014_s5 + $0x78] sm:$0xff] }
  0x1c   : > { %791 = vst [vmem:[#allocation2] sm:$0xff] %v6404_v0  ;;  %792 = vst [vmem:[#allocation2 + $0x8] sm:$0x7] %v6404_v0  ;;  %5294 = vmatprep.subr.mxu0 %v6404_v0  ;;  %5329 = vmatprep.subr.mxu1 %v6404_v0  ;;  %v389_v2 = vld [vmem:[%s8014_s5 + $0x70] sm:$0xff]  ;;  %v388_v3 = vld [vmem:[%s8014_s5 + $0x68] sm:$0xff]  ;;  %vm583_vm1 = vcmask 64512  }
  0x1d   : > { %793 = vst [vmem:[#allocation2 + $0x13] sm:$0x3] %v6404_v0  ;;  %794 = vst [vmem:[#allocation2 + $0x1d] sm:$0x3] %v6404_v0  ;;  %5326 = vmatprep.mubr.msk.f32.mxu0 %vm6405_vm0, %v6404_v0  ;;  %5361 = vmatprep.mubr.msk.f32.mxu1 %vm6405_vm0, %v6404_v0  ;;  %s8106_s14 = smov (!%p365_p0, %s6468_s14), 1  ;;  %v387_v4 = vld [vmem:[%s8014_s5 + $0x60] sm:$0xff] }
  0x1e   : > { %795 = vst [vmem:[#allocation2 + $0x27] sm:$0x3] %v6404_v0  ;;  %796 = vst [vmem:[#allocation2 + $0x31] sm:$0x3] %v6404_v0  ;;  %s4748_s23 = sshll.u32 %s8106_s14, 6  ;;  %5295 = vmatpush3.msra.mxu0 %v390_v1  ;;  %5330 = vmatpush3.msra.mxu1 %v390_v1  ;;  %v386_v7 = vld [vmem:[%s8014_s5 + $0x58] sm:$0xff] }
  0x1f   : > { %797 = vst [vmem:[#allocation2 + $0x3b] sm:$0x3] %v6404_v0  ;;  %798 = vst [vmem:[#allocation2 + $0x45] sm:$0x3] %v6404_v0  ;;  %5296 = vmatprep.subr.mxu0 %v6404_v0  ;;  %5331 = vmatprep.subr.mxu1 %v6404_v0  ;;  %s6530_s12 = scalar_lea.vmem %s8009_s0, %s4748_s23  ;;  %v385_v14 = vld [vmem:[%s8014_s5 + $0x50] sm:$0xff]  ;;  %v384_v19 = vld [vmem:[%s8014_s5 + $0x48] sm:$0xff]  ;;  %s7926_s27 = scalar_lea.vmem %s8019_s10, %s4748_s23 }
  0x20   : > { %799 = vst [vmem:[#allocation2 + $0x4f] sm:$0x3] %v6404_v0  ;;  %800 = vst [vmem:[#allocation2 + $0x59] sm:$0xff] %v6404_v0  ;;  %5297 = vmatpush3.msra.mxu0 %v389_v2  ;;  %5332 = vmatpush3.msra.mxu1 %v389_v2  ;;  %v6538_v5 = vld [vmem:[%s6530_s12] sm:$0xff]  ;;  %v6541_v6 = vld [vmem:[%s6530_s12 + $0x8] sm:$0xff] }
  0x21   : > { %801 = vst [vmem:[#allocation2 + $0x61] sm:$0xff] %v6404_v0  ;;  %5298 = vmatprep.subr.mxu0 %v6404_v0  ;;  %5333 = vmatprep.subr.mxu1 %v6404_v0  ;;  %v6549_v8 = vld [vmem:[%s6530_s12 + $0x10] sm:$0xff]  ;;  %v6552_v9 = vld [vmem:[%s6530_s12 + $0x18] sm:$0xff]  ;;  %v400_v10 = vadd.f32 %v6541_v6, %v6538_v5  ;;  %v413_v11 = vmul.f32 %v6538_v5, %v6538_v5  ;;  %v6568_v15 = vld [vmem:[%s6530_s12 + $0x20] sm:$0xff] }
  0x22   : > { %5299 = vmatpush3.msra.mxu0 %v388_v3  ;;  %5334 = vmatpush3.msra.mxu1 %v388_v3  ;;  %v414_v12 = vmul.f32 %v6541_v6, %v6541_v6  ;;  %v415_v13 = vmul.f32 %v6549_v8, %v6549_v8  ;;  %v416_v17 = vmul.f32 %v6552_v9, %v6552_v9  ;;  %v6579_v20 = vld [vmem:[%s6530_s12 + $0x28] sm:$0xff]  ;;  %v383_v24 = vld [vmem:[%s8014_s5 + $0x40] sm:$0xff]  ;;  %v6590_v25 = vld [vmem:[%s6530_s12 + $0x30] sm:$0xff] }
  0x23   : > { %5300 = vmatprep.subr.mxu0 %v6404_v0  ;;  %5335 = vmatprep.subr.mxu1 %v6404_v0  ;;  %v401_v16 = vadd.f32 %v400_v10, %v6549_v8  ;;  %v417_v22 = vmul.f32 %v6568_v15, %v6568_v15  ;;  %v418_v27 = vmul.f32 %v6579_v20, %v6579_v20  ;;  %v382_v29 = vld [vmem:[%s8014_s5 + $0x38] sm:$0xff]  ;;  %v381_v34 = vld [vmem:[%s8014_s5 + $0x30] sm:$0xff]  ;;  %v380_v38 = vld [vmem:[%s8014_s5 + $0x28] sm:$0xff] }
  0x24   : > { %5301 = vmatpush3.msra.mxu0 %v387_v4  ;;  %5336 = vmatpush3.msra.mxu1 %v387_v4  ;;  %v421_v18 = vadd.f32 %v414_v12, %v413_v11  ;;  %v6601_v30 = vld [vmem:[%s6530_s12 + $0x38] sm:$0xff]  ;;  %v419_v32 = vmul.f32 %v6590_v25, %v6590_v25  ;;  %v379_v41 = vld [vmem:[%s8014_s5 + $0x20] sm:$0xff]  ;;  %v377_v47 = vld [vmem:[%s8014_s5 + $0x10] sm:$0xff] }
  0x25   : > { %5302 = vmatprep.subr.mxu0 %v6404_v0  ;;  %5337 = vmatprep.subr.mxu1 %v6404_v0  ;;  %v402_v21 = vadd.f32 %v401_v16, %v6552_v9  ;;  %v420_v36 = vmul.f32 %v6601_v30, %v6601_v30  ;;  %v378_v44 = vld [vmem:[%s8014_s5 + $0x18] sm:$0xff]  ;;  %v376_v50 = vld [vmem:[%s8014_s5 + $0x8] sm:$0xff]  ;;  %v375_v53 = vld [vmem:[%s8014_s5] sm:$0xff] }
  0x26   : > { %5303 = vmatpush3.msra.mxu0 %v386_v7  ;;  %5338 = vmatpush3.msra.mxu1 %v386_v7  ;;  %v422_v23 = vadd.f32 %v421_v18, %v415_v13  ;;  %v391_v59 = vld [vmem:[%s8015_s6] sm:$0xff]  ;;  %v4631_v11 = vld [vmem:[%s8017_s8 + $0xf8] sm:$0xff]  ;;  %v4630_v13 = vld [vmem:[%s8017_s8 + $0xf0] sm:$0xff] }
  0x27   : > { %5304 = vmatprep.subr.mxu0 %v6404_v0  ;;  %5339 = vmatprep.subr.mxu1 %v6404_v0  ;;  %v403_v26 = vadd.f32 %v402_v21, %v6568_v15  ;;  %v828_v12 = vld [vmem:[%s8017_s8 + $0x78] sm:$0xff]  ;;  %v4629_v16 = vld [vmem:[%s8017_s8 + $0xe8] sm:$0xff]  ;;  %v4628_v18 = vld [vmem:[%s8017_s8 + $0xe0] sm:$0xff] }
  0x28   : > { %5305 = vmatpush3.msra.mxu0 %v385_v14  ;;  %5340 = vmatpush3.msra.mxu1 %v385_v14  ;;  %v423_v28 = vadd.f32 %v422_v23, %v416_v17  ;;  %v827_v14 = vld [vmem:[%s8017_s8 + $0x70] sm:$0xff]  ;;  %v826_v17 = vld [vmem:[%s8017_s8 + $0x68] sm:$0xff]  ;;  %v4627_v21 = vld [vmem:[%s8017_s8 + $0xd8] sm:$0xff] }
  0x29   : > { %5306 = vmatprep.subr.mxu0 %v6404_v0  ;;  %5341 = vmatprep.subr.mxu1 %v6404_v0  ;;  %v404_v31 = vadd.f32 %v403_v26, %v6579_v20  ;;  %v4626_v23 = vld [vmem:[%s8017_s8 + $0xd0] sm:$0xff]  ;;  %v4625_v26 = vld [vmem:[%s8017_s8 + $0xc8] sm:$0xff] }
  0x2a   : > { %5307 = vmatpush3.msra.mxu0 %v384_v19  ;;  %5342 = vmatpush3.msra.mxu1 %v384_v19  ;;  %v424_v33 = vadd.f32 %v423_v28, %v417_v22  ;;  %v825_v19 = vld [vmem:[%s8017_s8 + $0x60] sm:$0xff]  ;;  %v824_v22 = vld [vmem:[%s8017_s8 + $0x58] sm:$0xff] }
  0x2b   : > { %5308 = vmatprep.subr.mxu0 %v6404_v0  ;;  %5343 = vmatprep.subr.mxu1 %v6404_v0  ;;  %v405_v35 = vadd.f32 %v404_v31, %v6590_v25  ;;  %v4624_v28 = vld [vmem:[%s8017_s8 + $0xc0] sm:$0xff]  ;;  %v4623_v31 = vld [vmem:[%s8017_s8 + $0xb8] sm:$0xff] }
  0x2c   : > { %5309 = vmatpush3.msra.mxu0 %v383_v24  ;;  %5344 = vmatpush3.msra.mxu1 %v383_v24  ;;  %v425_v37 = vadd.f32 %v424_v33, %v418_v27  ;;  %v823_v24 = vld [vmem:[%s8017_s8 + $0x50] sm:$0xff]  ;;  %v822_v27 = vld [vmem:[%s8017_s8 + $0x48] sm:$0xff] }
  0x2d   : > { %5310 = vmatprep.subr.mxu0 %v6404_v0  ;;  %5345 = vmatprep.subr.mxu1 %v6404_v0  ;;  %v406_v39 = vadd.f32 %v405_v35, %v6601_v30  ;;  %v4622_v33 = vld [vmem:[%s8017_s8 + $0xb0] sm:$0xff]  ;;  %v4621_v35 = vld [vmem:[%s8017_s8 + $0xa8] sm:$0xff] }
  0x2e   : > { %5311 = vmatpush3.msra.mxu0 %v382_v29  ;;  %5346 = vmatpush3.msra.mxu1 %v382_v29  ;;  %v426_v40 = vadd.f32 %v425_v37, %v419_v32  ;;  %v821_v29 = vld [vmem:[%s8017_s8 + $0x40] sm:$0xff]  ;;  %v820_v32 = vld [vmem:[%s8017_s8 + $0x38] sm:$0xff] }
  0x2f   : > { %5312 = vmatprep.subr.mxu0 %v6404_v0  ;;  %5347 = vmatprep.subr.mxu1 %v6404_v0  ;;  %v407_v42 = vrot.slane %v406_v39, 4  ;;  %v4620_v37 = vld [vmem:[%s8017_s8 + $0xa0] sm:$0xff] }
  0x30   : > { %5313 = vmatpush3.msra.mxu0 %v381_v34  ;;  %5348 = vmatpush3.msra.mxu1 %v381_v34  ;;  %v427_v43 = vadd.f32 %v426_v40, %v420_v36  ;;  %v819_v34 = vld [vmem:[%s8017_s8 + $0x30] sm:$0xff]  ;;  %v818_v36 = vld [vmem:[%s8017_s8 + $0x28] sm:$0xff]  ;;  %v816_v40 = vld [vmem:[%s8017_s8 + $0x18] sm:$0xff] }
  0x31   : > { %5314 = vmatprep.subr.mxu0 %v6404_v0  ;;  %5349 = vmatprep.subr.mxu1 %v6404_v0  ;;  %v408_v45 = vadd.f32 %v407_v42, %v406_v39  ;;  %v4619_v39 = vld [vmem:[%s8017_s8 + $0x98] sm:$0xff]  ;;  %v815_v42 = vld [vmem:[%s8017_s8 + $0x10] sm:$0xff] }
  0x32   : > { %5315 = vmatpush3.msra.mxu0 %v380_v38  ;;  %5350 = vmatpush3.msra.mxu1 %v380_v38  ;;  %v428_v46 = vrot.slane %v427_v43, 4  ;;  %v817_v38 = vld [vmem:[%s8017_s8 + $0x20] sm:$0xff] }
  0x33   : > { %5316 = vmatprep.subr.mxu0 %v6404_v0  ;;  %5351 = vmatprep.subr.mxu1 %v6404_v0  ;;  %v409_v48 = vrot.slane %v408_v45, 2 }
  0x34   : > { %5317 = vmatpush3.msra.mxu0 %v379_v41  ;;  %5352 = vmatpush3.msra.mxu1 %v379_v41  ;;  %v429_v49 = vadd.f32 %v428_v46, %v427_v43  ;;  %v4618_v41 = vld [vmem:[%s8017_s8 + $0x90] sm:$0xff]  ;;  %v4617_v43 = vld [vmem:[%s8017_s8 + $0x88] sm:$0xff]  ;;  %v813_v46 = vld [vmem:[%s8017_s8] sm:$0xff] }
  0x35   : > { %5318 = vmatprep.subr.mxu0 %v6404_v0  ;;  %5353 = vmatprep.subr.mxu1 %v6404_v0  ;;  %v410_v51 = vadd.f32 %v409_v48, %v408_v45  ;;  %v4616_v45 = vld [vmem:[%s8017_s8 + $0x80] sm:$0xff]  ;;  %v6758_v48 = vld [vmem:[%s8017_s8 + $0x178] sm:$0xff] }
  0x36   : > { %5319 = vmatpush3.msra.mxu0 %v378_v44  ;;  %5354 = vmatpush3.msra.mxu1 %v378_v44  ;;  %v430_v52 = vrot.slane %v429_v49, 2  ;;  %v814_v44 = vld [vmem:[%s8017_s8 + $0x8] sm:$0xff] }
  0x37   : > { %5320 = vmatprep.subr.mxu0 %v6404_v0  ;;  %5355 = vmatprep.subr.mxu1 %v6404_v0  ;;  %v411_v54 = vrot.slane %v410_v51, 1 }
  0x38   : > { %5321 = vmatpush3.msra.mxu0 %v377_v47  ;;  %5356 = vmatpush3.msra.mxu1 %v377_v47  ;;  %v431_v55 = vadd.f32 %v430_v52, %v429_v49  ;;  %v829_v47 = vld [vmem:[#allocation2 + $0x1] sm:$0xff]  ;;  %v6763_v49 = vld [vmem:[%s8017_s8 + $0x1f8] sm:$0xff] }
  0x39   : > { %5322 = vmatprep.subr.mxu0 %v6404_v0  ;;  %5357 = vmatprep.subr.mxu1 %v6404_v0  ;;  %v412_v56 = vadd.f32 %v411_v54, %v410_v51 }
  0x3a   : > { %5323 = vmatpush3.msra.mxu0 %v376_v50  ;;  %5358 = vmatpush3.msra.mxu1 %v376_v50  ;;  %v432_v57 = vrot.slane %v431_v55, 1  ;;  %v6767_v50 = vld [vmem:[#allocation2 + $0x2] sm:$0xff] }
  0x3b   : > { %5324 = vmatprep.subr.mxu0 %v6404_v0  ;;  %5359 = vmatprep.subr.mxu1 %v6404_v0  ;;  %2577 = vst [vmem:[#allocation2] sm:$0xff] %v6404_v0 }
  0x3c   : > { %5325 = vmatpush3.msra.mxu0 %v375_v53  ;;  %5360 = vmatpush3.msra.mxu1 %v375_v53  ;;  %v433_v58 = vadd.f32 %v432_v57, %v431_v55  ;;  %v733_v53 = vlaneseq  ;;  %v434_v55 = vld [vmem:[%s8010_s1] sm:$0x1] }
  0x3d   : > { %5327 = vmatmul.mubr.f32.vlgmr.msra.gmra.mxu0 %v412_v56  ;;  %5364 = vmatprep.subr.mxu0 %v6404_v0 }
  0x3e   : > { %5366 = vmatprep.mubr.msk.f32.mxu0 %vm6405_vm0, %v6404_v0  ;;  %5362 = vmatmul.mubr.f32.vlgmr.msra.gmra.mxu1 %v433_v58  ;;  %v6770_v54 = vshrl.u32 %v733_v53, 7  ;;  %v4642_v53 = vld [vmem:[%s8017_s8 + $0x150] sm:$0xff] }
  0x3f   : > { %5453 = vmatprep.mubr.f32.mxu1 %v6404_v0  ;;  %5365 = vmatpush3.msra.mxu0 %v391_v59 }
  0x40   : > { %5369 = vmatprep.subr.mxu0 %v6404_v0  ;;  %5421 = vmatprep.subr.mxu1 %v828_v12  ;;  %8026 = vst [vmem:[#allocation6_spill] sm:$0xff] %v6770_v54  ;;  %v6776_v56 = vsub.s32 0, %v6770_v54 }
  0x41   : > { %5422 = vmatpush3.msra.mxu1 %v828_v12 }
  0x42   : > { %5423 = vmatprep.subr.mxu1 %v827_v14  ;;  %8027 = vst [vmem:[#allocation7_spill] sm:$0xff] %v6776_v56 }
  0x43   : > { %5424 = vmatpush3.msra.mxu1 %v827_v14 }
  0x44   : > { %5425 = vmatprep.subr.mxu1 %v826_v17 }
  0x45   : > { %5426 = vmatpush3.msra.mxu1 %v826_v17 }
  0x46   : > { %5427 = vmatprep.subr.mxu1 %v825_v19 }
  0x47   : > { %5428 = vmatpush3.msra.mxu1 %v825_v19 }
  0x48   : > { %5429 = vmatprep.subr.mxu1 %v824_v22 }
  0x49   : > { %5430 = vmatpush3.msra.mxu1 %v824_v22 }
  0x4a   : > { %5431 = vmatprep.subr.mxu1 %v823_v24 }
  0x4b   : > { %5432 = vmatpush3.msra.mxu1 %v823_v24 }
  0x4c   : > { %5433 = vmatprep.subr.mxu1 %v822_v27 }
  0x4d   : > { %5434 = vmatpush3.msra.mxu1 %v822_v27 }
  0x4e   : > { %5435 = vmatprep.subr.mxu1 %v821_v29 }
  0x4f   : > { %5436 = vmatpush3.msra.mxu1 %v821_v29 }
  0x50   : > { %5437 = vmatprep.subr.mxu1 %v820_v32 }
  0x51   : > { %5438 = vmatpush3.msra.mxu1 %v820_v32 }
  0x52   : > { %5439 = vmatprep.subr.mxu1 %v819_v34 }
  0x53   : > { %5440 = vmatpush3.msra.mxu1 %v819_v34 }
  0x54   : > { %5441 = vmatprep.subr.mxu1 %v818_v36 }
  0x55   : > { %5442 = vmatpush3.msra.mxu1 %v818_v36 }
  0x56   : > { %5443 = vmatprep.subr.mxu1 %v817_v38 }
  0x57   : > { %5444 = vmatpush3.msra.mxu1 %v817_v38  ;;  %v4646_v38 = vld [vmem:[%s8017_s8 + $0x170] sm:$0xff] }
  0x58   : > { %5445 = vmatprep.subr.mxu1 %v816_v40 }
  0x59   : > { %5446 = vmatpush3.msra.mxu1 %v816_v40  ;;  %v4645_v40 = vld [vmem:[%s8017_s8 + $0x168] sm:$0xff] }
  0x5a   : > { %5447 = vmatprep.subr.mxu1 %v815_v42 }
  0x5b   : > { %5448 = vmatpush3.msra.mxu1 %v815_v42 }
  0x5c   : > { %5449 = vmatprep.subr.mxu1 %v814_v44 }
  0x5d   : > { %5450 = vmatpush3.msra.mxu1 %v814_v44 }
  0x5e   : > { %5451 = vmatprep.subr.mxu1 %v813_v46 }
  0x5f   : > { %5452 = vmatpush3.msra.mxu1 %v813_v46  ;;  %v4660_v46 = vld [vmem:[%s8017_s8 + $0x1e0] sm:$0xff] }
  0x60   : > { %5515 = vmatprep.subr.mxu1 %v6763_v49 }
  0xfd   : > { %v502_v60 = vpop.f32.mrf.mxu0 }
  0xfe   : > { %v507_v61 = vmul.f32 0.0009765625, %v502_v60  ;;  %v574_v1 = vpop.f32.mrf.mxu1 }
  0xff   : > { %v5328_v62 = vpop.f32.mrf.mxu0  ;;  %v578_v2 = vmul.f32 0.0009765625, %v574_v1 }
 0x100   : > { %v579_v63 = vmul.f32 %v507_v61, %v507_v61  ;;  %5367 = vmatmul.mubr.msk.f32.vlgmr.msra.gmra.mxu0 %vm583_vm1, %v507_v61  ;;  %v5363_v3 = vpop.f32.mrf.mxu1 }
 0x101   : > { %5370 = vmatpush3.msra.mxu0 %v391_v59  ;;  %5371 = vmatprep.mubr.msk.f32.mxu0 %vm6405_vm0, %v6404_v0  ;;  %v435_v59 = vld [vmem:[%s8011_s2] sm:$0x1] }
 0x102   : > { %v580_v4 = vsub.f32 %v578_v2, %v579_v63  ;;  %5374 = vmatprep.subr.mxu0 %v4631_v11 }
 0x104   : > { %v581_v7 = vadd.f32 1e-05, %v580_v4 }
 0x106   : > { %6332 = vrsqrt.f32 %v581_v7 }
 0x113   : > { %v6333_v10 = vpop.eup %6332 }
 0x114   : > { %5372 = vmatmul.mubr.msk.f32.vlgmr.msra.gmra.mxu0 %vm583_vm1, %v6333_v10 }
 0x115   : > { %5375 = vmatpush3.msra.mxu0 %v4631_v11  ;;  %5406 = vmatprep.mubr.f32.mxu0 %v829_v47 }
 0x116   : > { %5376 = vmatprep.subr.mxu0 %v4630_v13 }
 0x117   : > { %5377 = vmatpush3.msra.mxu0 %v4630_v13 }
 0x118   : > { %5378 = vmatprep.subr.mxu0 %v4629_v16 }
 0x119   : > { %5379 = vmatpush3.msra.mxu0 %v4629_v16 }
 0x11a   : > { %5380 = vmatprep.subr.mxu0 %v4628_v18 }
 0x11b   : > { %5381 = vmatpush3.msra.mxu0 %v4628_v18 }
 0x11c   : > { %5382 = vmatprep.subr.mxu0 %v4627_v21 }
 0x11d   : > { %5383 = vmatpush3.msra.mxu0 %v4627_v21 }
 0x11e   : > { %5384 = vmatprep.subr.mxu0 %v4626_v23 }
 0x11f   : > { %5385 = vmatpush3.msra.mxu0 %v4626_v23 }
 0x120   : > { %5386 = vmatprep.subr.mxu0 %v4625_v26 }
 0x121   : > { %5387 = vmatpush3.msra.mxu0 %v4625_v26 }
 0x122   : > { %5388 = vmatprep.subr.mxu0 %v4624_v28 }
 0x123   : > { %5389 = vmatpush3.msra.mxu0 %v4624_v28 }
 0x124   : > { %5390 = vmatprep.subr.mxu0 %v4623_v31 }
 0x125   : > { %5391 = vmatpush3.msra.mxu0 %v4623_v31 }
 0x126   : > { %5392 = vmatprep.subr.mxu0 %v4622_v33 }
 0x127   : > { %5393 = vmatpush3.msra.mxu0 %v4622_v33 }
 0x128   : > { %5394 = vmatprep.subr.mxu0 %v4621_v35 }
 0x129   : > { %5395 = vmatpush3.msra.mxu0 %v4621_v35 }
 0x12a   : > { %5396 = vmatprep.subr.mxu0 %v4620_v37 }
 0x12b   : > { %5397 = vmatpush3.msra.mxu0 %v4620_v37 }
 0x12c   : > { %5398 = vmatprep.subr.mxu0 %v4619_v39 }
 0x12d   : > { %5399 = vmatpush3.msra.mxu0 %v4619_v39  ;;  %v4662_v39 = vld [vmem:[%s8017_s8 + $0x1f0] sm:$0xff] }
 0x12e   : > { %5400 = vmatprep.subr.mxu0 %v4618_v41 }
 0x12f   : > { %5401 = vmatpush3.msra.mxu0 %v4618_v41  ;;  %v4661_v41 = vld [vmem:[%s8017_s8 + $0x1e8] sm:$0xff] }
 0x130   : > { %5402 = vmatprep.subr.mxu0 %v4617_v43 }
 0x131   : > { %5403 = vmatpush3.msra.mxu0 %v4617_v43 }
 0x132   : > { %5404 = vmatprep.subr.mxu0 %v4616_v45 }
 0x133   : > { %5405 = vmatpush3.msra.mxu0 %v4616_v45  ;;  %v4644_v45 = vld [vmem:[%s8017_s8 + $0x160] sm:$0xff] }
 0x134   : > { %5468 = vmatprep.subr.mxu0 %v6758_v48 }
 0x1c0   : > { %v653_v51 = vpop.f32.mrf.mxu0 }
 0x1c2   : > { %v5368_v52 = vpop.f32.mrf.mxu0 }
 0x1d4   : > { %v726_v57 = vpop.f32.mrf.mxu0 }
 0x1d5   : > { %v730_v58 = vmul.f32 %v726_v57, %v434_v55  ;;  %v4658_v55 = vld [vmem:[%s8017_s8 + $0x1d0] sm:$0xff] }
 0x1d6   : > { %v5373_v60 = vpop.f32.mrf.mxu0 }
 0x1d7   : > { %v731_v61 = vmul.f32 %v730_v58, %v653_v51  ;;  %v736_v62 = vrot.slane %v730_v58, %v6776_v56  ;;  %v4659_v51 = vld [vmem:[%s8017_s8 + $0x1d8] sm:$0xff]  ;;  %v4657_v60 = vld [vmem:[%s8017_s8 + $0x1c8] sm:$0xff] }
 0x1d9   : > { %v732_v63 = vsub.f32 %v435_v59, %v731_v61  ;;  %v737_v1 = vmul.f32 %v736_v62, %v6538_v5  ;;  %v738_v2 = vmul.f32 %v736_v62, %v6541_v6  ;;  %v739_v3 = vmul.f32 %v736_v62, %v6549_v8  ;;  %v4641_v59 = vld [vmem:[%s8017_s8 + $0x148] sm:$0xff] }
 0x1da   : > { %v740_v4 = vmul.f32 %v736_v62, %v6552_v9  ;;  %v741_v10 = vmul.f32 %v736_v62, %v6568_v15  ;;  %v742_v11 = vmul.f32 %v736_v62, %v6579_v20  ;;  %v743_v12 = vmul.f32 %v736_v62, %v6590_v25 }
 0x1db   : > { %v749_v7 = vrot.slane %v732_v63, %v6776_v56  ;;  %v744_v13 = vmul.f32 %v736_v62, %v6601_v30  ;;  %v4640_v63 = vld [vmem:[%s8017_s8 + $0x140] sm:$0xff] }
 0x1dd   : > { %v751_v14 = vadd.f32 %v749_v7, %v737_v1  ;;  %v752_v16 = vadd.f32 %v749_v7, %v738_v2  ;;  %v753_v17 = vadd.f32 %v749_v7, %v739_v3  ;;  %v754_v5 = vadd.f32 %v749_v7, %v740_v4  ;;  %v4656_v1 = vld [vmem:[%s8017_s8 + $0x1c0] sm:$0xff]  ;;  %v4639_v4 = vld [vmem:[%s8017_s8 + $0x138] sm:$0xff] }
 0x1de   : > { %v755_v18 = vadd.f32 %v749_v7, %v741_v10  ;;  %v756_v6 = vadd.f32 %v749_v7, %v742_v11  ;;  %v757_v19 = vadd.f32 %v749_v7, %v743_v12  ;;  %v758_v8 = vadd.f32 %v749_v7, %v744_v13  ;;  %v4655_v7 = vld [vmem:[%s8017_s8 + $0x1b8] sm:$0xff]  ;;  %v4638_v10 = vld [vmem:[%s8017_s8 + $0x130] sm:$0xff] }
 0x1df   : > { %vm759_vm2 = vcmp.ge.f32.partialorder %v751_v14, 0.0  ;;  %v767_v9 = vmul.f32 0.01, %v751_v14  ;;  %vm760_vm3 = vcmp.ge.f32.partialorder %v752_v16, 0.0  ;;  %v768_v21 = vmul.f32 0.01, %v752_v16 }
 0x1e0   : > { %vm761_vm4 = vcmp.ge.f32.partialorder %v753_v17, 0.0  ;;  %v769_v15 = vmul.f32 0.01, %v753_v17  ;;  %vm762_vm5 = vcmp.ge.f32.partialorder %v754_v5, 0.0  ;;  %v770_v20 = vmul.f32 0.01, %v754_v5 }
 0x1e1   : > { %v6791_v22 = vsel %vm759_vm2, %v751_v14, %v767_v9  ;;  %v6793_v25 = vsel %vm760_vm3, %v752_v16, %v768_v21  ;;  %vm763_vm6 = vcmp.ge.f32.partialorder %v755_v18, 0.0  ;;  %v771_v30 = vmul.f32 0.01, %v755_v18  ;;  %v4654_v13 = vld [vmem:[%s8017_s8 + $0x1b0] sm:$0xff]  ;;  %v4637_v14 = vld [vmem:[%s8017_s8 + $0x128] sm:$0xff] }
 0x1e2   : > { %783 = vst [vmem:[#allocation2 + $0xb] sm:$0xff] %v6791_v22  ;;  %784 = vst [vmem:[#allocation2 + $0x15] sm:$0xff] %v6793_v25  ;;  %v777_v23 = vsel %vm761_vm4, %v753_v17, %v769_v15  ;;  %v778_v24 = vsel %vm762_vm5, %v754_v5, %v770_v20  ;;  %vm764_vm7 = vcmp.ge.f32.partialorder %v756_v6, 0.0  ;;  %v772_v26 = vmul.f32 0.01, %v756_v6  ;;  %v4653_v16 = vld [vmem:[%s8017_s8 + $0x1a8] sm:$0xff] }
 0x1e3   : > { %785 = vst [vmem:[#allocation2 + $0x1f] sm:$0xff] %v777_v23  ;;  %786 = vst [vmem:[#allocation2 + $0x29] sm:$0xff] %v778_v24  ;;  %v6797_v27 = vsel %vm763_vm6, %v755_v18, %v771_v30  ;;  %vm765_vm8 = vcmp.ge.f32.partialorder %v757_v19, 0.0  ;;  %v773_v28 = vmul.f32 0.01, %v757_v19  ;;  %vm766_vm9 = vcmp.ge.f32.partialorder %v758_v8, 0.0 }
 0x1e4   : > { %787 = vst [vmem:[#allocation2 + $0x33] sm:$0xff] %v6797_v27  ;;  %v6800_v29 = vsel %vm764_vm7, %v756_v6, %v772_v26  ;;  %v774_v31 = vmul.f32 0.01, %v758_v8  ;;  %v4636_v17 = vld [vmem:[%s8017_s8 + $0x120] sm:$0xff]  ;;  %v4635_v18 = vld [vmem:[%s8017_s8 + $0x118] sm:$0xff]  ;;  %v4633_v9 = vld [vmem:[%s8017_s8 + $0x108] sm:$0xff] }
 0x1e5   : > { %788 = vst [vmem:[#allocation2 + $0x3d] sm:$0xff] %v6800_v29  ;;  %v781_v32 = vsel %vm765_vm8, %v757_v19, %v773_v28  ;;  %v4652_v5 = vld [vmem:[%s8017_s8 + $0x1a0] sm:$0xff]  ;;  %v4651_v6 = vld [vmem:[%s8017_s8 + $0x198] sm:$0xff]  ;;  %v4634_v19 = vld [vmem:[%s8017_s8 + $0x110] sm:$0xff] }
 0x1e6   : > { %789 = vst [vmem:[#allocation2 + $0x47] sm:$0xff] %v781_v32  ;;  %v782_v33 = vsel %vm766_vm9, %v758_v8, %v774_v31  ;;  %v4650_v8 = vld [vmem:[%s8017_s8 + $0x190] sm:$0xff]  ;;  %v4649_v21 = vld [vmem:[%s8017_s8 + $0x188] sm:$0xff]  ;;  %v4632_v15 = vld [vmem:[%s8017_s8 + $0x100] sm:$0xff] }
 0x1e7   : > { %790 = vst [vmem:[#allocation2 + $0x51] sm:$0xff] %v782_v33  ;;  %v4648_v20 = vld [vmem:[%s8017_s8 + $0x180] sm:$0xff]  ;;  %v4679_v30 = vld [vmem:[%s8017_s8 + $0x278] sm:$0xff]  ;;  %v4678_v28 = vld [vmem:[%s8017_s8 + $0x270] sm:$0xff] }
 0x1e8   : > { %v4695_v23 = vld [vmem:[%s8017_s8 + $0x2f8] sm:$0xff]  ;;  %v4694_v31 = vld [vmem:[%s8017_s8 + $0x2f0] sm:$0xff] }
 0x1e9   : > { %v830_v34 = vld [vmem:[#allocation2 + $0x9] sm:$0xff]  ;;  %v831_v36 = vld [vmem:[#allocation2 + $0x11] sm:$0xff]  ;;  %v6915_v32 = vld [vmem:[#allocation2 + $0x5d] sm:$0xff] }
 0x1ea   : > { %v804_v35 = vld [vmem:[#allocation2 + $0x8] sm:$0xff]  ;;  %5407 = vmatmul.mubr.f32.vlgmr.msra.gmra.mxu0 %v830_v34  ;;  %v805_v37 = vld [vmem:[#allocation2 + $0x10] sm:$0xff]  ;;  %v832_v43 = vld [vmem:[#allocation2 + $0x19] sm:$0xff] }
 0x1eb   : > { %5454 = vmatmul.mubr.f32.vlgmr.msra.gmra.mxu1 %v804_v35  ;;  %5469 = vmatpush3.msra.mxu0 %v6758_v48  ;;  %v6817_v42 = vld [vmem:[#allocation2 + $0xa] sm:$0xff]  ;;  %v806_v44 = vld [vmem:[#allocation2 + $0x18] sm:$0xff]  ;;  %v833_v47 = vld [vmem:[#allocation2 + $0x21] sm:$0xff] }
 0x1ec   : > { %5516 = vmatpush3.msra.mxu1 %v6763_v49  ;;  %5409 = vmatprep.mubr.f32.mxu0 %v831_v36  ;;  %2578 = vst [vmem:[#allocation2 + $0x8] sm:$0x7] %v6404_v0  ;;  %v807_v48 = vld [vmem:[#allocation2 + $0x20] sm:$0xff]  ;;  %v4643_v49 = vld [vmem:[%s8017_s8 + $0x158] sm:$0xff]  ;;  %v808_v52 = vld [vmem:[#allocation2 + $0x28] sm:$0xff] }
 0x1ed   : > { %5456 = vmatprep.mubr.f32.mxu1 %v805_v37  ;;  %5470 = vmatprep.subr.mxu0 %v4646_v38  ;;  %v835_v57 = vld [vmem:[#allocation2 + $0x31] sm:$0xff]  ;;  %v836_v61 = vld [vmem:[#allocation2 + $0x39] sm:$0xff]  ;;  %v837_v2 = vld [vmem:[#allocation2 + $0x41] sm:$0xff] }
 0x1ee   : > { %5517 = vmatprep.subr.mxu1 %v4662_v39  ;;  %5471 = vmatpush3.msra.mxu0 %v4646_v38  ;;  %v809_v58 = vld [vmem:[#allocation2 + $0x30] sm:$0xff]  ;;  %v810_v62 = vld [vmem:[#allocation2 + $0x38] sm:$0xff]  ;;  %v811_v3 = vld [vmem:[#allocation2 + $0x40] sm:$0xff] }
 0x1ef   : > { %5518 = vmatpush3.msra.mxu1 %v4662_v39  ;;  %5472 = vmatprep.subr.mxu0 %v4645_v40  ;;  %v838_v11 = vld [vmem:[#allocation2 + $0x49] sm:$0xff]  ;;  %v1240_v26 = vld [vmem:[#allocation2 + $0x1a] sm:$0xff] }
 0x1f0   : > { %5519 = vmatprep.subr.mxu1 %v4661_v41  ;;  %5410 = vmatmul.mubr.f32.gmra.mxu0 %v832_v43  ;;  %v812_v12 = vld [vmem:[#allocation2 + $0x48] sm:$0xff]  ;;  %v6917_v33 = vld [vmem:[#allocation2 + $0x5e] sm:$0xff]  ;;  %v4674_v43 = vld [vmem:[%s8017_s8 + $0x250] sm:$0xff] }
 0x1f1   : > { %5457 = vmatmul.mubr.f32.gmra.mxu1 %v806_v44  ;;  %5473 = vmatpush3.msra.mxu0 %v4645_v40  ;;  %v4677_v34 = vld [vmem:[%s8017_s8 + $0x268] sm:$0xff]  ;;  %v4676_v38 = vld [vmem:[%s8017_s8 + $0x260] sm:$0xff]  ;;  %v4691_v40 = vld [vmem:[%s8017_s8 + $0x2d8] sm:$0xff] }
 0x1f2   : > { %5520 = vmatpush3.msra.mxu1 %v4661_v41  ;;  %5412 = vmatprep.mubr.f32.mxu0 %v833_v47  ;;  %v4693_v35 = vld [vmem:[%s8017_s8 + $0x2e8] sm:$0xff]  ;;  %v4692_v39 = vld [vmem:[%s8017_s8 + $0x2e0] sm:$0xff]  ;;  %v1243_v41 = vld [vmem:[#allocation2 + $0x32] sm:$0xff] }
 0x1f3   : > { %5459 = vmatprep.mubr.f32.mxu1 %v807_v48  ;;  %5474 = vmatprep.subr.mxu0 %v4644_v45  ;;  %v1241_v36 = vld [vmem:[#allocation2 + $0x22] sm:$0xff]  ;;  %v1242_v37 = vld [vmem:[#allocation2 + $0x2a] sm:$0xff] }
 0x1f4   : > { %5521 = vmatprep.subr.mxu1 %v4660_v46  ;;  %5475 = vmatpush3.msra.mxu0 %v4644_v45  ;;  %v4690_v44 = vld [vmem:[%s8017_s8 + $0x2d0] sm:$0xff]  ;;  %v4673_v45 = vld [vmem:[%s8017_s8 + $0x248] sm:$0xff] }
 0x1f5   : > { %5522 = vmatpush3.msra.mxu1 %v4660_v46  ;;  %5476 = vmatprep.subr.mxu0 %v4643_v49  ;;  %v4689_v46 = vld [vmem:[%s8017_s8 + $0x2c8] sm:$0xff] }
 0x1f6   : > { %5523 = vmatprep.subr.mxu1 %v4659_v51  ;;  %5413 = vmatmul.mubr.f32.gmra.mxu0 %v778_v24  ;;  %v1239_v24 = vld [vmem:[#allocation2 + $0x12] sm:$0xff]  ;;  %v1245_v47 = vld [vmem:[#allocation2 + $0x42] sm:$0xff]  ;;  %v1246_v48 = vld [vmem:[#allocation2 + $0x4a] sm:$0xff] }
 0x1f7   : > { %5460 = vmatmul.mubr.f32.gmra.mxu1 %v808_v52  ;;  %5477 = vmatpush3.msra.mxu0 %v4643_v49  ;;  %v4672_v49 = vld [vmem:[%s8017_s8 + $0x240] sm:$0xff]  ;;  %v4671_v52 = vld [vmem:[%s8017_s8 + $0x238] sm:$0xff] }
 0x1f8   : > { %5524 = vmatpush3.msra.mxu1 %v4659_v51  ;;  %5415 = vmatprep.mubr.f32.mxu0 %v835_v57  ;;  %v4688_v51 = vld [vmem:[%s8017_s8 + $0x2c0] sm:$0xff]  ;;  %v4670_v57 = vld [vmem:[%s8017_s8 + $0x230] sm:$0xff] }
 0x1f9   : > { %5462 = vmatprep.mubr.f32.mxu1 %v809_v58  ;;  %5478 = vmatprep.subr.mxu0 %v4642_v53  ;;  %v4686_v58 = vld [vmem:[%s8017_s8 + $0x2b0] sm:$0xff] }
 0x1fa   : > { %5525 = vmatprep.subr.mxu1 %v4658_v55  ;;  %5479 = vmatpush3.msra.mxu0 %v4642_v53  ;;  %v4687_v53 = vld [vmem:[%s8017_s8 + $0x2b8] sm:$0xff] }
 0x1fb   : > { %5526 = vmatpush3.msra.mxu1 %v4658_v55  ;;  %5480 = vmatprep.subr.mxu0 %v4641_v59  ;;  %v1247_v55 = vld [vmem:[#allocation2 + $0x52] sm:$0xff] }
 0x1fc   : > { %5527 = vmatprep.subr.mxu1 %v4657_v60  ;;  %5416 = vmatmul.mubr.f32.gmra.mxu0 %v836_v61  ;;  %v4685_v61 = vld [vmem:[%s8017_s8 + $0x2a8] sm:$0xff] }
 0x1fd   : > { %5463 = vmatmul.mubr.f32.gmra.mxu1 %v810_v62  ;;  %5481 = vmatpush3.msra.mxu0 %v4641_v59  ;;  %v1542_v59 = vld [vmem:[#allocation2 + $0xc] sm:$0xff]  ;;  %v4668_v62 = vld [vmem:[%s8017_s8 + $0x220] sm:$0xff] }
 0x1fe   : > { %5528 = vmatpush3.msra.mxu1 %v4657_v60  ;;  %5418 = vmatprep.mubr.f32.mxu0 %v837_v2  ;;  %v4669_v60 = vld [vmem:[%s8017_s8 + $0x228] sm:$0xff]  ;;  %v4666_v2 = vld [vmem:[%s8017_s8 + $0x210] sm:$0xff] }
 0x1ff   : > { %5465 = vmatprep.mubr.f32.mxu1 %v811_v3  ;;  %5482 = vmatprep.subr.mxu0 %v4640_v63  ;;  %v4682_v3 = vld [vmem:[%s8017_s8 + $0x290] sm:$0xff] }
 0x200   : > { %5529 = vmatprep.subr.mxu1 %v4656_v1  ;;  %5483 = vmatpush3.msra.mxu0 %v4640_v63  ;;  %v4667_v63 = vld [vmem:[%s8017_s8 + $0x218] sm:$0xff] }
 0x201   : > { %5530 = vmatpush3.msra.mxu1 %v4656_v1  ;;  %5484 = vmatprep.subr.mxu0 %v4639_v4  ;;  %v4683_v1 = vld [vmem:[%s8017_s8 + $0x298] sm:$0xff] }
 0x202   : > { %5531 = vmatprep.subr.mxu1 %v4655_v7  ;;  %5419 = vmatmul.mubr.f32.gmra.mxu0 %v838_v11  ;;  %v4680_v11 = vld [vmem:[%s8017_s8 + $0x280] sm:$0xff] }
 0x203   : > { %5466 = vmatmul.mubr.f32.gmra.mxu1 %v812_v12  ;;  %5485 = vmatpush3.msra.mxu0 %v4639_v4  ;;  %v4665_v4 = vld [vmem:[%s8017_s8 + $0x208] sm:$0xff]  ;;  %v4711_v12 = vld [vmem:[%s8017_s8 + $0x378] sm:$0xff] }
 0x204   : > { %5532 = vmatpush3.msra.mxu1 %v4655_v7  ;;  %5486 = vmatprep.subr.mxu0 %v4638_v10  ;;  %v4681_v7 = vld [vmem:[%s8017_s8 + $0x288] sm:$0xff] }
 0x205   : > { %5533 = vmatprep.subr.mxu1 %v4654_v13  ;;  %5547 = vmatprep.mubr.f32.mxu1 %v6817_v42 }
 0x206   : > { %5487 = vmatpush3.msra.mxu0 %v4638_v10  ;;  %5534 = vmatpush3.msra.mxu1 %v4654_v13  ;;  %v4664_v10 = vld [vmem:[%s8017_s8 + $0x200] sm:$0xff]  ;;  %v4727_v13 = vld [vmem:[%s8017_s8 + $0x3f8] sm:$0xff] }
 0x207   : > { %5488 = vmatprep.subr.mxu0 %v4637_v14  ;;  %5535 = vmatprep.subr.mxu1 %v4653_v16 }
 0x208   : > { %5489 = vmatpush3.msra.mxu0 %v4637_v14  ;;  %5536 = vmatpush3.msra.mxu1 %v4653_v16  ;;  %v1391_v14 = vld [vmem:[#allocation2 + $0x13] sm:$0xff] }
 0x209   : > { %5490 = vmatprep.subr.mxu0 %v4636_v17  ;;  %5537 = vmatprep.subr.mxu1 %v4652_v5  ;;  %v7011_v16 = vld [vmem:[#allocation2 + $0x14] sm:$0xff] }
 0x20a   : > { %5491 = vmatpush3.msra.mxu0 %v4636_v17  ;;  %5538 = vmatpush3.msra.mxu1 %v4652_v5  ;;  %v4710_v17 = vld [vmem:[%s8017_s8 + $0x370] sm:$0xff]  ;;  %v1392_v5 = vld [vmem:[#allocation2 + $0x1b] sm:$0xff] }
 0x20b   : > { %5492 = vmatprep.subr.mxu0 %v4635_v18  ;;  %5539 = vmatprep.subr.mxu1 %v4651_v6 }
 0x20c   : > { %5493 = vmatpush3.msra.mxu0 %v4635_v18  ;;  %5540 = vmatpush3.msra.mxu1 %v4651_v6  ;;  %v7017_v18 = vld [vmem:[#allocation2 + $0x1c] sm:$0xff]  ;;  %v4726_v6 = vld [vmem:[%s8017_s8 + $0x3f0] sm:$0xff] }
 0x20d   : > { %5494 = vmatprep.subr.mxu0 %v4634_v19  ;;  %5541 = vmatprep.subr.mxu1 %v4650_v8 }
 0x20e   : > { %5495 = vmatpush3.msra.mxu0 %v4634_v19  ;;  %5542 = vmatpush3.msra.mxu1 %v4650_v8  ;;  %v4709_v19 = vld [vmem:[%s8017_s8 + $0x368] sm:$0xff] }
 0x20f   : > { %5496 = vmatprep.subr.mxu0 %v4633_v9  ;;  %5543 = vmatprep.subr.mxu1 %v4649_v21  ;;  %v4725_v8 = vld [vmem:[%s8017_s8 + $0x3e8] sm:$0xff] }
 0x210   : > { %5497 = vmatpush3.msra.mxu0 %v4633_v9  ;;  %5544 = vmatpush3.msra.mxu1 %v4649_v21  ;;  %v1393_v9 = vld [vmem:[#allocation2 + $0x23] sm:$0xff] }
 0x211   : > { %5498 = vmatprep.subr.mxu0 %v4632_v15  ;;  %5545 = vmatprep.subr.mxu1 %v4648_v20  ;;  %v7029_v21 = vld [vmem:[#allocation2 + $0x24] sm:$0xff] }
 0x212   : > { %5499 = vmatpush3.msra.mxu0 %v4632_v15  ;;  %5500 = vmatprep.mubr.f32.mxu0 %v6767_v50  ;;  %v6913_v50 = vld [vmem:[#allocation2 + $0x5c] sm:$0xff] }
 0x213   : > { %5546 = vmatpush3.msra.mxu1 %v4648_v20  ;;  %5501 = vmatmul.mubr.f32.vlgmr.msra.gmra.mxu0 %v6817_v42  ;;  %2587 = vst [vmem:[#allocation2 + $0x61] sm:$0xff] %v6404_v0  ;;  %v4675_v0 = vld [vmem:[%s8017_s8 + $0x258] sm:$0xff]  ;;  %v4708_v15 = vld [vmem:[%s8017_s8 + $0x360] sm:$0xff]  ;;  %v1394_v20 = vld [vmem:[#allocation2 + $0x2b] sm:$0xff] }
 0x214   : > { %5548 = vmatmul.mubr.f32.vlgmr.msra.gmra.mxu1 %v1239_v24  ;;  %5562 = vmatprep.subr.mxu0 %v4679_v30  ;;  %v1244_v42 = vld [vmem:[#allocation2 + $0x3a] sm:$0xff] }
 0x215   : > { %5609 = vmatprep.subr.mxu1 %v4695_v23  ;;  %5503 = vmatprep.mubr.f32.mxu0 %v1239_v24  ;;  %v4707_v24 = vld [vmem:[%s8017_s8 + $0x358] sm:$0xff] }
 0x216   : > { %5550 = vmatprep.mubr.f32.mxu1 %v1240_v26  ;;  %5563 = vmatpush3.msra.mxu0 %v4679_v30  ;;  %v7035_v30 = vld [vmem:[#allocation2 + $0x2c] sm:$0xff] }
 0x217   : > { %5610 = vmatpush3.msra.mxu1 %v4695_v23  ;;  %5564 = vmatprep.subr.mxu0 %v4678_v28  ;;  %v4724_v23 = vld [vmem:[%s8017_s8 + $0x3e0] sm:$0xff] }
 0x218   : > { %5611 = vmatprep.subr.mxu1 %v4694_v31  ;;  %5565 = vmatpush3.msra.mxu0 %v4678_v28  ;;  %v7047_v28 = vld [vmem:[#allocation2 + $0x34] sm:$0xff] }
 0x219   : > { %5612 = vmatpush3.msra.mxu1 %v4694_v31  ;;  %5504 = vmatmul.mubr.f32.gmra.mxu0 %v1240_v26  ;;  %v4723_v26 = vld [vmem:[%s8017_s8 + $0x3d8] sm:$0xff]  ;;  %v4706_v31 = vld [vmem:[%s8017_s8 + $0x350] sm:$0xff] }
 0x21a   : > { %5551 = vmatmul.mubr.f32.gmra.mxu1 %v1241_v36  ;;  %5566 = vmatprep.subr.mxu0 %v4677_v34 }
 0x21b   : > { %5613 = vmatprep.subr.mxu1 %v4693_v35  ;;  %5506 = vmatprep.mubr.f32.mxu0 %v1241_v36  ;;  %v4722_v36 = vld [vmem:[%s8017_s8 + $0x3d0] sm:$0xff] }
 0x21c   : > { %5553 = vmatprep.mubr.f32.mxu1 %v1242_v37  ;;  %5567 = vmatpush3.msra.mxu0 %v4677_v34  ;;  %v1396_v34 = vld [vmem:[#allocation2 + $0x3b] sm:$0xff] }
 0x21d   : > { %5614 = vmatpush3.msra.mxu1 %v4693_v35  ;;  %5568 = vmatprep.subr.mxu0 %v4676_v38  ;;  %v7054_v35 = vld [vmem:[#allocation2 + $0x3c] sm:$0xff] }
 0x21e   : > { %5615 = vmatprep.subr.mxu1 %v4692_v39  ;;  %5569 = vmatpush3.msra.mxu0 %v4676_v38  ;;  %v1397_v38 = vld [vmem:[#allocation2 + $0x43] sm:$0xff] }
 0x21f   : > { %5616 = vmatpush3.msra.mxu1 %v4692_v39  ;;  %5507 = vmatmul.mubr.f32.gmra.mxu0 %v1242_v37  ;;  %v4721_v37 = vld [vmem:[%s8017_s8 + $0x3c8] sm:$0xff] }
 0x220   : > { %5554 = vmatmul.mubr.f32.gmra.mxu1 %v1243_v41  ;;  %5570 = vmatprep.subr.mxu0 %v4675_v0  ;;  %v7066_v39 = vld [vmem:[#allocation2 + $0x44] sm:$0xff] }
 0x221   : > { %5617 = vmatprep.subr.mxu1 %v4691_v40  ;;  %5509 = vmatprep.mubr.f32.mxu0 %v1243_v41  ;;  %v7072_v41 = vld [vmem:[#allocation2 + $0x4c] sm:$0xff] }
 0x222   : > { %5556 = vmatprep.mubr.f32.mxu1 %v1244_v42  ;;  %5571 = vmatpush3.msra.mxu0 %v4675_v0  ;;  %v4704_v0 = vld [vmem:[%s8017_s8 + $0x340] sm:$0xff] }
 0x223   : > { %5618 = vmatpush3.msra.mxu1 %v4691_v40  ;;  %5572 = vmatprep.subr.mxu0 %v4674_v43  ;;  %v1398_v40 = vld [vmem:[#allocation2 + $0x4b] sm:$0xff] }
 0x224   : > { %5619 = vmatprep.subr.mxu1 %v4690_v44  ;;  %5573 = vmatpush3.msra.mxu0 %v4674_v43  ;;  %v4703_v43 = vld [vmem:[%s8017_s8 + $0x338] sm:$0xff] }
 0x225   : > { %5620 = vmatpush3.msra.mxu1 %v4690_v44  ;;  %5510 = vmatmul.mubr.f32.gmra.mxu0 %v1244_v42  ;;  %v4720_v42 = vld [vmem:[%s8017_s8 + $0x3c0] sm:$0xff]  ;;  %v4719_v44 = vld [vmem:[%s8017_s8 + $0x3b8] sm:$0xff] }
 0x226   : > { %5557 = vmatmul.mubr.f32.gmra.mxu1 %v1245_v47  ;;  %5574 = vmatprep.subr.mxu0 %v4673_v45 }
 0x227   : > { %5621 = vmatprep.subr.mxu1 %v4689_v46  ;;  %5512 = vmatprep.mubr.f32.mxu0 %v1245_v47  ;;  %v4702_v47 = vld [vmem:[%s8017_s8 + $0x330] sm:$0xff] }
 0x228   : > { %5559 = vmatprep.mubr.f32.mxu1 %v1246_v48  ;;  %5575 = vmatpush3.msra.mxu0 %v4673_v45  ;;  %v1399_v45 = vld [vmem:[#allocation2 + $0x53] sm:$0xff] }
 0x229   : > { %5622 = vmatpush3.msra.mxu1 %v4689_v46  ;;  %5576 = vmatprep.subr.mxu0 %v4672_v49  ;;  %v7084_v46 = vld [vmem:[#allocation2 + $0x54] sm:$0xff] }
 0x22a   : > { %5623 = vmatprep.subr.mxu1 %v4688_v51  ;;  %5577 = vmatpush3.msra.mxu0 %v4672_v49  ;;  %v4701_v49 = vld [vmem:[%s8017_s8 + $0x328] sm:$0xff] }
 0x22b   : > { %5624 = vmatpush3.msra.mxu1 %v4688_v51  ;;  %5513 = vmatmul.mubr.f32.gmra.mxu0 %v1246_v48  ;;  %v4718_v48 = vld [vmem:[%s8017_s8 + $0x3b0] sm:$0xff]  ;;  %v4717_v51 = vld [vmem:[%s8017_s8 + $0x3a8] sm:$0xff] }
 0x22c   : > { %5560 = vmatmul.mubr.f32.gmra.mxu1 %v1247_v55  ;;  %5578 = vmatprep.subr.mxu0 %v4671_v52  ;;  %v4715_v55 = vld [vmem:[%s8017_s8 + $0x398] sm:$0xff] }
 0x22d   : > { %5625 = vmatprep.subr.mxu1 %v4687_v53  ;;  %5579 = vmatpush3.msra.mxu0 %v4671_v52  ;;  %v4700_v52 = vld [vmem:[%s8017_s8 + $0x320] sm:$0xff] }
 0x22e   : > { %5594 = vmatprep.mubr.f32.mxu0 %v6791_v22  ;;  %5626 = vmatpush3.msra.mxu1 %v4687_v53  ;;  %v4684_v22 = vld [vmem:[%s8017_s8 + $0x2a0] sm:$0xff]  ;;  %v4699_v53 = vld [vmem:[%s8017_s8 + $0x318] sm:$0xff] }
 0x22f   : > { %5641 = vmatprep.mubr.f32.mxu1 %v1542_v59  ;;  %5580 = vmatprep.subr.mxu0 %v4670_v57  ;;  %v4697_v59 = vld [vmem:[%s8017_s8 + $0x308] sm:$0xff] }
 0x230   : > { %5627 = vmatprep.subr.mxu1 %v4686_v58  ;;  %5581 = vmatpush3.msra.mxu0 %v4670_v57  ;;  %v4698_v57 = vld [vmem:[%s8017_s8 + $0x310] sm:$0xff] }
 0x231   : > { %5628 = vmatpush3.msra.mxu1 %v4686_v58  ;;  %5582 = vmatprep.subr.mxu0 %v4669_v60  ;;  %v4714_v58 = vld [vmem:[%s8017_s8 + $0x390] sm:$0xff] }
 0x232   : > { %5629 = vmatprep.subr.mxu1 %v4685_v61  ;;  %5583 = vmatpush3.msra.mxu0 %v4669_v60  ;;  %v4713_v60 = vld [vmem:[%s8017_s8 + $0x388] sm:$0xff] }
 0x233   : > { %5630 = vmatpush3.msra.mxu1 %v4685_v61  ;;  %5584 = vmatprep.subr.mxu0 %v4668_v62  ;;  %v4696_v61 = vld [vmem:[%s8017_s8 + $0x300] sm:$0xff] }
 0x234   : > { %5631 = vmatprep.subr.mxu1 %v4684_v22  ;;  %5585 = vmatpush3.msra.mxu0 %v4668_v62  ;;  %v4712_v62 = vld [vmem:[%s8017_s8 + $0x380] sm:$0xff] }
 0x235   : > { %5632 = vmatpush3.msra.mxu1 %v4684_v22  ;;  %5586 = vmatprep.subr.mxu0 %v4667_v63  ;;  %v4743_v22 = vld [vmem:[%s8017_s8 + $0x478] sm:$0xff] }
 0x236   : > { %5633 = vmatprep.subr.mxu1 %v4683_v1  ;;  %5587 = vmatpush3.msra.mxu0 %v4667_v63  ;;  %v1847_v63 = vld [vmem:[#allocation2 + $0x1d] sm:$0xff] }
 0x237   : > { %5634 = vmatpush3.msra.mxu1 %v4683_v1  ;;  %5588 = vmatprep.subr.mxu0 %v4666_v2  ;;  %v4742_v1 = vld [vmem:[%s8017_s8 + $0x470] sm:$0xff] }
 0x238   : > { %5635 = vmatprep.subr.mxu1 %v4682_v3  ;;  %5589 = vmatpush3.msra.mxu0 %v4666_v2  ;;  %v1848_v2 = vld [vmem:[#allocation2 + $0x25] sm:$0xff] }
 0x239   : > { %5636 = vmatpush3.msra.mxu1 %v4682_v3  ;;  %5590 = vmatprep.subr.mxu0 %v4665_v4  ;;  %v4741_v3 = vld [vmem:[%s8017_s8 + $0x468] sm:$0xff] }
 0x23a   : > { %5637 = vmatprep.subr.mxu1 %v4681_v7  ;;  %5591 = vmatpush3.msra.mxu0 %v4665_v4  ;;  %v1849_v4 = vld [vmem:[#allocation2 + $0x2d] sm:$0xff] }
 0x23b   : > { %5638 = vmatpush3.msra.mxu1 %v4681_v7  ;;  %5592 = vmatprep.subr.mxu0 %v4664_v10  ;;  %v7142_v7 = vld [vmem:[#allocation2 + $0x59] sm:$0xff] }
 0x23c   : > { %5639 = vmatprep.subr.mxu1 %v4680_v11  ;;  %5593 = vmatpush3.msra.mxu0 %v4664_v10  ;;  %8028 = vst [vmem:[#allocation8_spill] sm:$0xff] %v7142_v7  ;;  %v1850_v10 = vld [vmem:[#allocation2 + $0x35] sm:$0xff] }
 0x23d   : > { %5640 = vmatpush3.msra.mxu1 %v4680_v11  ;;  %5595 = vmatmul.mubr.f32.vlgmr.msra.gmra.mxu0 %v1391_v14  ;;  %v4740_v11 = vld [vmem:[%s8017_s8 + $0x460] sm:$0xff] }
 0x23e   : > { %5642 = vmatmul.mubr.f32.vlgmr.msra.gmra.mxu1 %v7011_v16  ;;  %5656 = vmatprep.subr.mxu0 %v4711_v12  ;;  %v1852_v14 = vld [vmem:[#allocation2 + $0x45] sm:$0xff] }
 0x23f   : > { %5703 = vmatprep.subr.mxu1 %v4727_v13  ;;  %5597 = vmatprep.mubr.f32.mxu0 %v1392_v5  ;;  %v4737_v5 = vld [vmem:[%s8017_s8 + $0x448] sm:$0xff] }
 0x240   : > { %5644 = vmatprep.mubr.f32.mxu1 %v7017_v18  ;;  %5657 = vmatpush3.msra.mxu0 %v4711_v12  ;;  %v4739_v12 = vld [vmem:[%s8017_s8 + $0x458] sm:$0xff] }
 0x241   : > { %5704 = vmatpush3.msra.mxu1 %v4727_v13  ;;  %5658 = vmatprep.subr.mxu0 %v4710_v17  ;;  %v7156_v13 = vld [vmem:[%s8014_s5 + $0x78] sm:$0xff] }
 0x242   : > { %5705 = vmatprep.subr.mxu1 %v4726_v6  ;;  %5659 = vmatpush3.msra.mxu0 %v4710_v17  ;;  %v1853_v17 = vld [vmem:[#allocation2 + $0x4d] sm:$0xff] }
 0x243   : > { %5706 = vmatpush3.msra.mxu1 %v4726_v6  ;;  %5598 = vmatmul.mubr.f32.gmra.mxu0 %v1393_v9  ;;  %v4735_v6 = vld [vmem:[%s8017_s8 + $0x438] sm:$0xff]  ;;  %v4733_v9 = vld [vmem:[%s8017_s8 + $0x428] sm:$0xff] }
 0x244   : > { %5645 = vmatmul.mubr.f32.gmra.mxu1 %v7029_v21  ;;  %5660 = vmatprep.subr.mxu0 %v4709_v19 }
 0x245   : > { %5707 = vmatprep.subr.mxu1 %v4725_v8  ;;  %5600 = vmatprep.mubr.f32.mxu0 %v1394_v20  ;;  %v6340_v20 = vld [vmem:[%s8014_s5 + $0x60] sm:$0xff] }
 0x246   : > { %5647 = vmatprep.mubr.f32.mxu1 %v7035_v30  ;;  %5661 = vmatpush3.msra.mxu0 %v4709_v19  ;;  %v4734_v19 = vld [vmem:[%s8017_s8 + $0x430] sm:$0xff] }
 0x247   : > { %5708 = vmatpush3.msra.mxu1 %v4725_v8  ;;  %5662 = vmatprep.subr.mxu0 %v4708_v15  ;;  %v1998_v8 = vld [vmem:[#allocation2 + $0x16] sm:$0xff] }
 0x248   : > { %5709 = vmatprep.subr.mxu1 %v4724_v23  ;;  %5663 = vmatpush3.msra.mxu0 %v4708_v15  ;;  %v4731_v15 = vld [vmem:[%s8017_s8 + $0x418] sm:$0xff] }
 0x249   : > { %5710 = vmatpush3.msra.mxu1 %v4724_v23  ;;  %5601 = vmatmul.mubr.f32.gmra.mxu0 %v6797_v27  ;;  %v4705_v27 = vld [vmem:[%s8017_s8 + $0x348] sm:$0xff]  ;;  %v6341_v23 = vld [vmem:[%s8014_s5 + $0x58] sm:$0xff] }
 0x24a   : > { %5648 = vmatmul.mubr.f32.gmra.mxu1 %v7047_v28  ;;  %5664 = vmatprep.subr.mxu0 %v4707_v24 }
 0x24b   : > { %5711 = vmatprep.subr.mxu1 %v4723_v26  ;;  %5603 = vmatprep.mubr.f32.mxu0 %v1396_v34  ;;  %v6344_v34 = vld [vmem:[%s8014_s5 + $0x40] sm:$0xff] }
 0x24c   : > { %5650 = vmatprep.mubr.f32.mxu1 %v7054_v35  ;;  %5665 = vmatpush3.msra.mxu0 %v4707_v24  ;;  %v4729_v24 = vld [vmem:[%s8017_s8 + $0x408] sm:$0xff] }
 0x24d   : > { %5712 = vmatpush3.msra.mxu1 %v4723_v26  ;;  %5666 = vmatprep.subr.mxu0 %v4706_v31  ;;  %v6342_v26 = vld [vmem:[%s8014_s5 + $0x50] sm:$0xff] }
 0x24e   : > { %5713 = vmatprep.subr.mxu1 %v4722_v36  ;;  %5667 = vmatpush3.msra.mxu0 %v4706_v31  ;;  %v6343_v31 = vld [vmem:[%s8014_s5 + $0x48] sm:$0xff] }
 0x24f   : > { %5714 = vmatpush3.msra.mxu1 %v4722_v36  ;;  %5604 = vmatmul.mubr.f32.gmra.mxu0 %v1397_v38  ;;  %v2000_v36 = vld [vmem:[#allocation2 + $0x26] sm:$0xff]  ;;  %v2002_v38 = vld [vmem:[#allocation2 + $0x36] sm:$0xff] }
 0x250   : > { %5651 = vmatmul.mubr.f32.gmra.mxu1 %v7066_v39  ;;  %5668 = vmatprep.subr.mxu0 %v4705_v27 }
 0x251   : > { %5715 = vmatprep.subr.mxu1 %v4721_v37  ;;  %5606 = vmatprep.mubr.f32.mxu0 %v1398_v40  ;;  %v2004_v40 = vld [vmem:[#allocation2 + $0x46] sm:$0xff] }
 0x252   : > { %5653 = vmatprep.mubr.f32.mxu1 %v7072_v41  ;;  %5669 = vmatpush3.msra.mxu0 %v4705_v27  ;;  %v6345_v27 = vld [vmem:[%s8014_s5 + $0x38] sm:$0xff] }
 0x253   : > { %5716 = vmatpush3.msra.mxu1 %v4721_v37  ;;  %5670 = vmatprep.subr.mxu0 %v4704_v0  ;;  %v2001_v37 = vld [vmem:[#allocation2 + $0x2e] sm:$0xff] }
 0x254   : > { %5717 = vmatprep.subr.mxu1 %v4720_v42  ;;  %5671 = vmatpush3.msra.mxu0 %v4704_v0  ;;  %v2003_v0 = vld [vmem:[#allocation2 + $0x3e] sm:$0xff] }
 0x255   : > { %5718 = vmatpush3.msra.mxu1 %v4720_v42  ;;  %5607 = vmatmul.mubr.f32.gmra.mxu0 %v1399_v45  ;;  %v2005_v42 = vld [vmem:[#allocation2 + $0x4e] sm:$0xff]  ;;  %v6349_v45 = vld [vmem:[%s8014_s5 + $0x18] sm:$0xff] }
 0x256   : > { %5654 = vmatmul.mubr.f32.gmra.mxu1 %v7084_v46  ;;  %5672 = vmatprep.subr.mxu0 %v4703_v43 }
 0x257   : > { %5719 = vmatprep.subr.mxu1 %v4719_v44  ;;  %5673 = vmatpush3.msra.mxu0 %v4703_v43  ;;  %v2006_v43 = vld [vmem:[#allocation2 + $0x56] sm:$0xff] }
 0x258   : > { %5688 = vmatprep.mubr.f32.mxu0 %v7011_v16  ;;  %5720 = vmatpush3.msra.mxu1 %v4719_v44  ;;  %v4738_v16 = vld [vmem:[%s8017_s8 + $0x450] sm:$0xff]  ;;  %v6348_v44 = vld [vmem:[%s8014_s5 + $0x20] sm:$0xff] }
 0x259   : > { %5735 = vmatprep.mubr.f32.mxu1 %v6793_v25  ;;  %5674 = vmatprep.subr.mxu0 %v4702_v47  ;;  %v4716_v25 = vld [vmem:[%s8017_s8 + $0x3a0] sm:$0xff] }
 0x25a   : > { %5721 = vmatprep.subr.mxu1 %v4718_v48  ;;  %5675 = vmatpush3.msra.mxu0 %v4702_v47  ;;  %v6352_v47 = vld [vmem:[%s8014_s5] sm:$0xff] }
 0x25b   : > { %5722 = vmatpush3.msra.mxu1 %v4718_v48  ;;  %5676 = vmatprep.subr.mxu0 %v4701_v49 }
 0x25c   : > { %5723 = vmatprep.subr.mxu1 %v4717_v51  ;;  %5677 = vmatpush3.msra.mxu0 %v4701_v49 }
 0x25d   : > { %5724 = vmatpush3.msra.mxu1 %v4717_v51  ;;  %5678 = vmatprep.subr.mxu0 %v4700_v52 }
 0x25e   : > { %5725 = vmatprep.subr.mxu1 %v4716_v25  ;;  %5679 = vmatpush3.msra.mxu0 %v4700_v52 }
 0x25f   : > { %5726 = vmatpush3.msra.mxu1 %v4716_v25  ;;  %5680 = vmatprep.subr.mxu0 %v4699_v53 }
 0x260   : > { %5727 = vmatprep.subr.mxu1 %v4715_v55  ;;  %5681 = vmatpush3.msra.mxu0 %v4699_v53 }
 0x261   : > { %5728 = vmatpush3.msra.mxu1 %v4715_v55  ;;  %5682 = vmatprep.subr.mxu0 %v4698_v57 }
 0x262   : > { %5729 = vmatprep.subr.mxu1 %v4714_v58  ;;  %5683 = vmatpush3.msra.mxu0 %v4698_v57 }
 0x263   : > { %5730 = vmatpush3.msra.mxu1 %v4714_v58  ;;  %5684 = vmatprep.subr.mxu0 %v4697_v59 }
 0x264   : > { %5731 = vmatprep.subr.mxu1 %v4713_v60  ;;  %5685 = vmatpush3.msra.mxu0 %v4697_v59 }
 0x265   : > { %5732 = vmatpush3.msra.mxu1 %v4713_v60  ;;  %5686 = vmatprep.subr.mxu0 %v4696_v61 }
 0x266   : > { %5733 = vmatprep.subr.mxu1 %v4712_v62  ;;  %5687 = vmatpush3.msra.mxu0 %v4696_v61 }
 0x267   : > { %5734 = vmatpush3.msra.mxu1 %v4712_v62  ;;  %5689 = vmatmul.mubr.f32.vlgmr.msra.gmra.mxu0 %v7017_v18  ;;  %v4736_v18 = vld [vmem:[%s8017_s8 + $0x440] sm:$0xff] }
 0x268   : > { %5736 = vmatmul.mubr.f32.vlgmr.msra.gmra.mxu1 %v1847_v63  ;;  %5750 = vmatprep.subr.mxu0 %v4743_v22 }
 0x269   : > { %5691 = vmatprep.mubr.f32.mxu0 %v7029_v21  ;;  %5738 = vmatprep.mubr.f32.mxu1 %v1848_v2  ;;  %v4732_v21 = vld [vmem:[%s8017_s8 + $0x420] sm:$0xff] }
 0x26a   : > { %5751 = vmatpush3.msra.mxu0 %v4743_v22  ;;  %5797 = vmatprep.subr.mxu1 %v7142_v7 }
 0x26b   : > { %5752 = vmatprep.subr.mxu0 %v4742_v1  ;;  %5692 = vmatmul.mubr.f32.gmra.mxu0 %v7035_v30  ;;  %v4730_v30 = vld [vmem:[%s8017_s8 + $0x410] sm:$0xff] }
 0x26c   : > { %5753 = vmatpush3.msra.mxu0 %v4742_v1  ;;  %5739 = vmatmul.mubr.f32.gmra.mxu1 %v1849_v4 }
 0x26d   : > { %5754 = vmatprep.subr.mxu0 %v4741_v3  ;;  %5694 = vmatprep.mubr.f32.mxu0 %v7047_v28  ;;  %v4728_v28 = vld [vmem:[%s8017_s8 + $0x400] sm:$0xff] }
 0x26e   : > { %5741 = vmatprep.mubr.f32.mxu1 %v1850_v10  ;;  %5755 = vmatpush3.msra.mxu0 %v4741_v3 }
 0x26f   : > { %5798 = vmatpush3.msra.mxu1 %v7156_v13  ;;  %5756 = vmatprep.subr.mxu0 %v4740_v11 }
 0x270   : > { %5742 = vmatmul.mubr.f32.gmra.mxu1 %v6800_v29  ;;  %5757 = vmatpush3.msra.mxu0 %v4740_v11  ;;  %v1854_v29 = vld [vmem:[#allocation2 + $0x55] sm:$0xff] }
 0x271   : > { %5744 = vmatprep.mubr.f32.mxu1 %v1852_v14  ;;  %5695 = vmatmul.mubr.f32.gmra.mxu0 %v7054_v35  ;;  %v1999_v35 = vld [vmem:[#allocation2 + $0x1e] sm:$0xff] }
 0x272   : > { %5758 = vmatprep.subr.mxu0 %v4739_v12  ;;  %5697 = vmatprep.mubr.f32.mxu0 %v7066_v39  ;;  %v6346_v39 = vld [vmem:[%s8014_s5 + $0x30] sm:$0xff] }
 0x273   : > { %5759 = vmatpush3.msra.mxu0 %v4739_v12  ;;  %5799 = vmatprep.subr.mxu1 %v7142_v7 }
 0x274   : > { %5760 = vmatprep.subr.mxu0 %v4738_v16  ;;  %5745 = vmatmul.mubr.f32.gmra.mxu1 %v1853_v17 }
 0x275   : > { %5761 = vmatpush3.msra.mxu0 %v4738_v16  ;;  %5747 = vmatprep.mubr.f32.mxu1 %v1854_v29 }
 0x276   : > { %5698 = vmatmul.mubr.f32.gmra.mxu0 %v7072_v41  ;;  %5762 = vmatprep.subr.mxu0 %v4737_v5  ;;  %v6347_v41 = vld [vmem:[%s8014_s5 + $0x28] sm:$0xff] }
 0x277   : > { %5700 = vmatprep.mubr.f32.mxu0 %v7084_v46  ;;  %5763 = vmatpush3.msra.mxu0 %v4737_v5  ;;  %v6350_v46 = vld [vmem:[%s8014_s5 + $0x10] sm:$0xff] }
 0x278   : > { %5764 = vmatprep.subr.mxu0 %v4736_v18  ;;  %5748 = vmatmul.mubr.f32.gmra.mxu1 %v6915_v32  ;;  %v6338_v32 = vld [vmem:[%s8014_s5 + $0x70] sm:$0xff] }
 0x279   : > { %5765 = vmatpush3.msra.mxu0 %v4736_v18  ;;  %5800 = vmatpush3.msra.mxu1 %v6338_v32 }
 0x27a   : > { %5701 = vmatmul.mubr.f32.gmra.mxu0 %v6913_v50  ;;  %5766 = vmatprep.subr.mxu0 %v4735_v6  ;;  %v6339_v50 = vld [vmem:[%s8014_s5 + $0x68] sm:$0xff] }
 0x27b   : > { %5767 = vmatpush3.msra.mxu0 %v4735_v6  ;;  %5782 = vmatprep.mubr.f32.mxu0 %v1998_v8 }
 0x27c   : > { %5768 = vmatprep.subr.mxu0 %v4734_v19  ;;  %5801 = vmatprep.subr.mxu1 %v7142_v7 }
 0x27d   : > { %5769 = vmatpush3.msra.mxu0 %v4734_v19  ;;  %5802 = vmatpush3.msra.mxu1 %v6339_v50 }
 0x27e   : > { %5770 = vmatprep.subr.mxu0 %v4733_v9  ;;  %5803 = vmatprep.subr.mxu1 %v7142_v7 }
 0x27f   : > { %5771 = vmatpush3.msra.mxu0 %v4733_v9  ;;  %5804 = vmatpush3.msra.mxu1 %v6340_v20 }
 0x280   : > { %5772 = vmatprep.subr.mxu0 %v4732_v21  ;;  %5805 = vmatprep.subr.mxu1 %v7142_v7 }
 0x281   : > { %5773 = vmatpush3.msra.mxu0 %v4732_v21  ;;  %5806 = vmatpush3.msra.mxu1 %v6341_v23 }
 0x282   : > { %5774 = vmatprep.subr.mxu0 %v4731_v15  ;;  %5807 = vmatprep.subr.mxu1 %v7142_v7 }
 0x283   : > { %5775 = vmatpush3.msra.mxu0 %v4731_v15  ;;  %5808 = vmatpush3.msra.mxu1 %v6342_v26 }
 0x284   : > { %5776 = vmatprep.subr.mxu0 %v4730_v30  ;;  %5809 = vmatprep.subr.mxu1 %v7142_v7 }
 0x285   : > { %5777 = vmatpush3.msra.mxu0 %v4730_v30  ;;  %5810 = vmatpush3.msra.mxu1 %v6343_v31 }
 0x286   : > { %5778 = vmatprep.subr.mxu0 %v4729_v24  ;;  %5811 = vmatprep.subr.mxu1 %v7142_v7 }
 0x287   : > { %5779 = vmatpush3.msra.mxu0 %v4729_v24  ;;  %5812 = vmatpush3.msra.mxu1 %v6344_v34 }
 0x288   : > { %5780 = vmatprep.subr.mxu0 %v4728_v28  ;;  %5813 = vmatprep.subr.mxu1 %v7142_v7 }
 0x289   : > { %5781 = vmatpush3.msra.mxu0 %v4728_v28  ;;  %5814 = vmatpush3.msra.mxu1 %v6345_v27 }
 0x28a   : > { %5783 = vmatmul.mubr.f32.vlgmr.msra.gmra.mxu0 %v1999_v35  ;;  %5832 = vmatprep.subr.mxu0 %v7142_v7 }
 0x28b   : > { %5785 = vmatprep.mubr.f32.mxu0 %v2000_v36  ;;  %5833 = vmatpush3.msra.mxu0 %v7156_v13 }
 0x28c   : > { %5834 = vmatprep.subr.mxu0 %v7142_v7  ;;  %5815 = vmatprep.subr.mxu1 %v7142_v7 }
 0x28d   : > { %5835 = vmatpush3.msra.mxu0 %v6338_v32  ;;  %5816 = vmatpush3.msra.mxu1 %v6346_v39 }
 0x28e   : > { %5786 = vmatmul.mubr.f32.gmra.mxu0 %v2001_v37  ;;  %5836 = vmatprep.subr.mxu0 %v7142_v7 }
 0x28f   : > { %5788 = vmatprep.mubr.f32.mxu0 %v2002_v38  ;;  %5837 = vmatpush3.msra.mxu0 %v6339_v50 }
 0x290   : > { %5838 = vmatprep.subr.mxu0 %v7142_v7  ;;  %5817 = vmatprep.subr.mxu1 %v7142_v7 }
 0x291   : > { %5839 = vmatpush3.msra.mxu0 %v6340_v20  ;;  %5818 = vmatpush3.msra.mxu1 %v6347_v41 }
 0x292   : > { %5789 = vmatmul.mubr.f32.gmra.mxu0 %v2003_v0  ;;  %5840 = vmatprep.subr.mxu0 %v7142_v7 }
 0x293   : > { %5791 = vmatprep.mubr.f32.mxu0 %v2004_v40  ;;  %5841 = vmatpush3.msra.mxu0 %v6341_v23 }
 0x294   : > { %5842 = vmatprep.subr.mxu0 %v7142_v7  ;;  %5819 = vmatprep.subr.mxu1 %v7142_v7 }
 0x295   : > { %5843 = vmatpush3.msra.mxu0 %v6342_v26  ;;  %5820 = vmatpush3.msra.mxu1 %v6348_v44 }
 0x296   : > { %5792 = vmatmul.mubr.f32.gmra.mxu0 %v2005_v42  ;;  %5844 = vmatprep.subr.mxu0 %v7142_v7 }
 0x297   : > { %5794 = vmatprep.mubr.f32.mxu0 %v2006_v43  ;;  %5845 = vmatpush3.msra.mxu0 %v6343_v31 }
 0x298   : > { %5846 = vmatprep.subr.mxu0 %v7142_v7  ;;  %5821 = vmatprep.subr.mxu1 %v7142_v7 }
 0x299   : > { %5847 = vmatpush3.msra.mxu0 %v6344_v34  ;;  %5822 = vmatpush3.msra.mxu1 %v6349_v45 }
 0x29a   : > { %5795 = vmatmul.mubr.f32.gmra.mxu0 %v6917_v33  ;;  %5848 = vmatprep.subr.mxu0 %v7142_v7  ;;  %v6351_v33 = vld [vmem:[%s8014_s5 + $0x8] sm:$0xff] }
 0x29b   : > { %5849 = vmatpush3.msra.mxu0 %v6345_v27  ;;  %5823 = vmatprep.subr.mxu1 %v7142_v7 }
 0x29c   : > { %5850 = vmatprep.subr.mxu0 %v7142_v7  ;;  %5824 = vmatpush3.msra.mxu1 %v6350_v46 }
 0x29d   : > { %5851 = vmatpush3.msra.mxu0 %v6346_v39  ;;  %5825 = vmatprep.subr.mxu1 %v7142_v7 }
 0x29e   : > { %5852 = vmatprep.subr.mxu0 %v7142_v7  ;;  %5826 = vmatpush3.msra.mxu1 %v6351_v33 }
 0x29f   : > { %5853 = vmatpush3.msra.mxu0 %v6347_v41  ;;  %5827 = vmatprep.subr.mxu1 %v7142_v7 }
 0x2a0   : > { %5854 = vmatprep.subr.mxu0 %v7142_v7  ;;  %5828 = vmatpush3.msra.mxu1 %v6352_v47 }
 0x2a1   : > { %5855 = vmatpush3.msra.mxu0 %v6348_v44  ;;  %5829 = vmatprep.mubr.msk.f32.mxu1 %vm6405_vm0, %v7142_v7 }
 0x2a2   : > { %5856 = vmatprep.subr.mxu0 %v7142_v7  ;;  %5864 = vmatprep.mubr.msk.f32.mxu0 %vm6405_vm0, %v7142_v7 }
 0x2a3   : > { %5857 = vmatpush3.msra.mxu0 %v6349_v45  ;;  %5867 = vmatprep.subr.mxu1 %v7142_v7 }
 0x2a4   : > { %5858 = vmatprep.subr.mxu0 %v7142_v7 }
 0x2a5   : > { %5859 = vmatpush3.msra.mxu0 %v6350_v46 }
 0x2a6   : > { %5860 = vmatprep.subr.mxu0 %v7142_v7 }
 0x2a7   : > { %5861 = vmatpush3.msra.mxu0 %v6351_v33 }
 0x2a8   : > { %5862 = vmatprep.subr.mxu0 %v7142_v7 }
 0x2a9   : > { %5863 = vmatpush3.msra.mxu0 %v6352_v47 }
 0x2aa   : > { %v7282_v48 = vpop.f32.mrf.mxu0 }
 0x2ab   : > { %v5455_v25 = vpop.f32.mrf.mxu1 }
 0x2ac   : > { %v7284_v49 = vpop.f32.mrf.mxu0 }
 0x2ad   : > { %v1037_v55 = vpop.f32.mrf.mxu1 }
 0x2b0   : > { %v7286_v51 = vpop.f32.mrf.mxu0 }
 0x2b1   : > { %v5458_v58 = vpop.f32.mrf.mxu1 }
 0x2b2   : > { %v7288_v52 = vpop.f32.mrf.mxu0 }
 0x2b3   : > { %v7296_v60 = vpop.f32.mrf.mxu1 }
 0x2b6   : > { %v7290_v53 = vpop.f32.mrf.mxu0 }
 0x2b7   : > { %v7300_v62 = vpop.f32.mrf.mxu1 }
 0x2b8   : > { %v7292_v57 = vpop.f32.mrf.mxu0 }
 0x2b9   : > { %v7304_v63 = vpop.f32.mrf.mxu1 }
 0x2bc   : > { %v7294_v59 = vpop.f32.mrf.mxu0 }
 0x2bd   : > { %v7308_v3 = vpop.f32.mrf.mxu1 }
 0x2be   : > { %v7298_v61 = vpop.f32.mrf.mxu0 }
 0x2bf   : > { %v7310_v10 = vpop.f32.mrf.mxu1 }
 0x2c2   : > { %v7302_v22 = vpop.f32.mrf.mxu0 }
 0x2c3   : > { %v7312_v12 = vpop.f32.mrf.mxu1 }
 0x2c4   : > { %v7306_v1 = vpop.f32.mrf.mxu0 }
 0x2c5   : > { %v7314_v14 = vpop.f32.mrf.mxu1 }
 0x2d3   : > { %v5502_v2 = vpop.f32.mrf.mxu0 }
 0x2d4   : > { %v5549_v16 = vpop.f32.mrf.mxu1 }
 0x2d5   : > { %v1179_v4 = vpop.f32.mrf.mxu0 }
 0x2d6   : > { %v1331_v5 = vpop.f32.mrf.mxu1 }
 0x2d9   : > { %v5505_v11 = vpop.f32.mrf.mxu0 }
 0x2da   : > { %v5552_v18 = vpop.f32.mrf.mxu1 }
 0x2db   : > { %v1189_v13 = vpop.f32.mrf.mxu0 }
 0x2dc   : > { %v1341_v19 = vpop.f32.mrf.mxu1 }
 0x2df   : > { %v5508_v17 = vpop.f32.mrf.mxu0 }
 0x2e0   : > { %v7320_v9 = vpop.f32.mrf.mxu1 }
 0x2e1   : > { %v1199_v29 = vpop.f32.mrf.mxu0 }
 0x2e2   : > { %v7324_v21 = vpop.f32.mrf.mxu1 }
 0x2e5   : > { %v7316_v6 = vpop.f32.mrf.mxu0 }
 0x2e6   : > { %v7328_v20 = vpop.f32.mrf.mxu1 }
 0x2e7   : > { %v7318_v8 = vpop.f32.mrf.mxu0 }
 0x2e8   : > { %v7330_v23 = vpop.f32.mrf.mxu1 }
 0x2eb   : > { %v7322_v32 = vpop.f32.mrf.mxu0 }
 0x2ec   : > { %8029 = vst [vmem:[#allocation9_spill] sm:$0xff] %v7322_v32  ;;  %v7332_v26 = vpop.f32.mrf.mxu1 }
 0x2ed   : > { %v7326_v50 = vpop.f32.mrf.mxu0  ;;  %8031 = vst [vmem:[#allocation11_spill] sm:$0xff] %v7332_v26 }
 0x2ee   : > { %8030 = vst [vmem:[#allocation10_spill] sm:$0xff] %v7326_v50  ;;  %v7334_v31 = vpop.f32.mrf.mxu1 }
 0x2ef   : > { %8032 = vst [vmem:[#allocation12_spill] sm:$0xff] %v7334_v31 }
 0x2fd   : > { %v5596_v15 = vpop.f32.mrf.mxu0 }
 0x2fe   : > { %v5643_v34 = vpop.f32.mrf.mxu1 }
 0x2ff   : > { %v1483_v30 = vpop.f32.mrf.mxu0 }
 0x300   : > { %v1635_v36 = vpop.f32.mrf.mxu1 }
 0x303   : > { %v5599_v24 = vpop.f32.mrf.mxu0 }
 0x304   : > { %v5646_v37 = vpop.f32.mrf.mxu1 }
 0x305   : > { %v1493_v28 = vpop.f32.mrf.mxu0 }
 0x306   : > { %v1645_v39 = vpop.f32.mrf.mxu1 }
 0x309   : > { %v5602_v35 = vpop.f32.mrf.mxu0 }
 0x30a   : > { %v7340_v40 = vpop.f32.mrf.mxu1 }
 0x30b   : > { %v1503_v27 = vpop.f32.mrf.mxu0  ;;  %8035 = vst [vmem:[#allocation15_spill] sm:$0xff] %v7340_v40 }
 0x30c   : > { %v7344_v42 = vpop.f32.mrf.mxu1 }
 0x30d   : > { %8037 = vst [vmem:[#allocation17_spill] sm:$0xff] %v7344_v42 }
 0x30f   : > { %v7336_v38 = vpop.f32.mrf.mxu0 }
 0x310   : > { %8033 = vst [vmem:[#allocation13_spill] sm:$0xff] %v7336_v38  ;;  %v7348_v45 = vpop.f32.mrf.mxu1 }
 0x311   : > { %v7338_v0 = vpop.f32.mrf.mxu0  ;;  %8039 = vst [vmem:[#allocation19_spill] sm:$0xff] %v7348_v45  ;;  %v1053_v45 = vadd.f32 %v5458_v58, %v7286_v51 }
 0x312   : > { %8034 = vst [vmem:[#allocation14_spill] sm:$0xff] %v7338_v0  ;;  %v7350_v33 = vpop.f32.mrf.mxu1 }
 0x313   : > { %8040 = vst [vmem:[#allocation20_spill] sm:$0xff] %v7350_v33  ;;  %v1231_v50 = vadd.f32 %v5505_v11, %v1053_v45 }
 0x315   : > { %v7342_v41 = vpop.f32.mrf.mxu0 }
 0x316   : > { %8036 = vst [vmem:[#allocation16_spill] sm:$0xff] %v7342_v41  ;;  %v7352_v56 = vpop.f32.mrf.mxu1  ;;  %v1043_v41 = vadd.f32 %v5455_v25, %v7282_v48  ;;  %v1063_v48 = vadd.f32 %v7300_v62, %v7290_v53  ;;  %v1073_v53 = vadd.f32 %v7308_v3, %v7294_v59  ;;  %v1078_v3 = vadd.f32 %v7314_v14, %v7306_v1 }
 0x317   : > { %v7346_v43 = vpop.f32.mrf.mxu0  ;;  %8041 = vst [vmem:[#allocation21_spill] sm:$0xff] %v7352_v56  ;;  %v1048_v56 = vadd.f32 %v7296_v60, %v7288_v52 }
 0x318   : > { %8038 = vst [vmem:[#allocation18_spill] sm:$0xff] %v7346_v43  ;;  %v7356_v31 = vpop.f32.mrf.mxu1  ;;  %v1038_v43 = vadd.f32 %v1037_v55, %v7284_v49  ;;  %v1229_v38 = vadd.f32 %v5502_v2, %v1043_v41  ;;  %v1058_v49 = vadd.f32 %v7304_v63, %v7292_v57  ;;  %v1383_v55 = vadd.f32 %v5552_v18, %v1231_v50 }
 0x319   : > { %8043 = vst [vmem:[#allocation23_spill] sm:$0xff] %v7356_v31  ;;  %v1230_v31 = vadd.f32 %v1189_v13, %v1048_v56  ;;  %v1233_v58 = vadd.f32 %v5508_v17, %v1063_v48  ;;  %v1068_v56 = vadd.f32 %v7310_v10, %v7298_v61  ;;  %v1235_v17 = vadd.f32 %v7316_v6, %v1073_v53 }
 0x31a   : > { %v1228_v42 = vadd.f32 %v1179_v4, %v1038_v43  ;;  %v1232_v4 = vadd.f32 %v1199_v29, %v1058_v49  ;;  %v1535_v60 = vadd.f32 %v5599_v24, %v1383_v55  ;;  %v1083_v61 = vadd.f32 %v7312_v12, %v7302_v22  ;;  %v8056_v53 = vld [vmem:[#allocation20_spill] sm:$0xff] }
 0x31b   : > { %v1382_v41 = vadd.f32 %v1341_v19, %v1230_v31  ;;  %v1385_v57 = vadd.f32 %v7320_v9, %v1233_v58  ;;  %v1387_v6 = vadd.f32 %v7328_v20, %v1235_v17 }
 0x31c   : > { %v1380_v25 = vadd.f32 %v1331_v5, %v1228_v42  ;;  %v1234_v5 = vadd.f32 %v7318_v8, %v1068_v56  ;;  %v1687_v29 = vadd.f32 %v5646_v37, %v1535_v60  ;;  %v8049_v37 = vld [vmem:[#allocation13_spill] sm:$0xff]  ;;  %v2150_v42 = vld [vmem:[%s8016_s7] sm:$0xff] }
 0x31d   : > { %v1534_v63 = vadd.f32 %v1493_v28, %v1382_v41  ;;  %v1537_v18 = vadd.f32 %v5602_v35, %v1385_v57  ;;  %v8046_v28 = vld [vmem:[#allocation10_spill] sm:$0xff]  ;;  %v8047_v35 = vld [vmem:[#allocation15_spill] sm:$0xff]  ;;  %v8057_v57 = vld [vmem:[#allocation16_spill] sm:$0xff] }
 0x31e   : > { %v1532_v2 = vadd.f32 %v1483_v30, %v1380_v25  ;;  %v1386_v8 = vadd.f32 %v7330_v23, %v1234_v5  ;;  %v8045_v30 = vld [vmem:[#allocation9_spill] sm:$0xff]  ;;  %v1236_v31 = vadd.f32 %v8046_v28, %v1078_v3  ;;  %v1539_v23 = vadd.f32 %v8049_v37, %v1387_v6 }
 0x31f   : > { %v1686_v50 = vadd.f32 %v1645_v39, %v1534_v63  ;;  %v1237_v24 = vadd.f32 %v8045_v30, %v1083_v61  ;;  %v1689_v22 = vadd.f32 %v8047_v35, %v1537_v18  ;;  %v8058_v63 = vld [vmem:[#allocation18_spill] sm:$0xff] }
 0x320   : > { %v1684_v62 = vadd.f32 %v1635_v36, %v1532_v2 }
 0x327   : > { %v5690_v44 = vpop.f32.mrf.mxu0 }
 0x328   : > { %v5737_v26 = vpop.f32.mrf.mxu1 }
 0x329   : > { %v1787_v46 = vpop.f32.mrf.mxu0 }
 0x32a   : > { %v1939_v33 = vpop.f32.mrf.mxu1  ;;  %v1836_v19 = vadd.f32 %v1787_v46, %v1684_v62  ;;  %v8052_v46 = vld [vmem:[#allocation11_spill] sm:$0xff] }
 0x32b   : > { %v5693_v47 = vpop.f32.mrf.mxu0 }
 0x32c   : > { %v5740_v32 = vpop.f32.mrf.mxu1  ;;  %v1988_v12 = vadd.f32 %v1939_v33, %v1836_v19  ;;  %v1389_v33 = vadd.f32 %v8052_v46, %v1237_v24  ;;  %v8059_v24 = vld [vmem:[#allocation21_spill] sm:$0xff] }
 0x32d   : > { %v1797_v54 = vpop.f32.mrf.mxu0 }
 0x32e   : > { %v1949_v11 = vpop.f32.mrf.mxu1  ;;  %v1838_v36 = vadd.f32 %v1797_v54, %v1686_v50  ;;  %v1541_v62 = vadd.f32 %v8057_v57, %v1389_v33 }
 0x330   : > { %v5743_v59 = vpop.f32.mrf.mxu1  ;;  %v1990_v2 = vadd.f32 %v1949_v11, %v1838_v36  ;;  %v2152_v11 = vld [vmem:[%s8016_s7 + $0x10] sm:$0xff]  ;;  %v1693_v28 = vadd.f32 %v8059_v24, %v1541_v62 }
 0x331   : > { %v7354_v7 = vpop.f32.mrf.mxu0 }
 0x332   : > { %8042 = vst [vmem:[#allocation22_spill] sm:$0xff] %v7354_v7  ;;  %v1381_v7 = vadd.f32 %v5549_v16, %v1229_v38  ;;  %v1384_v16 = vadd.f32 %v7324_v21, %v1232_v4  ;;  %v1839_v21 = vadd.f32 %v5693_v47, %v1687_v29  ;;  %v1959_v1 = vpop.f32.mrf.mxu1  ;;  %v8050_v38 = vld [vmem:[#allocation14_spill] sm:$0xff]  ;;  %v8053_v47 = vld [vmem:[#allocation12_spill] sm:$0xff] }
 0x333   : > { %v7359_v0 = vpop.f32.mrf.mxu0  ;;  %v1538_v39 = vadd.f32 %v8050_v38, %v1386_v8  ;;  %v1388_v48 = vadd.f32 %v8053_v47, %v1236_v31 }
 0x334   : > { %8044 = vst [vmem:[#allocation24_spill] sm:$0xff] %v7359_v0  ;;  %v1533_v0 = vadd.f32 %v5596_v15, %v1381_v7  ;;  %v1536_v10 = vadd.f32 %v1503_v27, %v1384_v16  ;;  %v8048_v27 = vld [vmem:[#allocation17_spill] sm:$0xff]  ;;  %v1991_v43 = vadd.f32 %v5740_v32, %v1839_v21  ;;  %v5746_v4 = vpop.f32.mrf.mxu1  ;;  %v8055_v32 = vld [vmem:[#allocation19_spill] sm:$0xff] }
 0x335   : > { %v1691_v60 = vadd.f32 %v8055_v32, %v1539_v23  ;;  %v1690_v56 = vadd.f32 %v8056_v53, %v1538_v39  ;;  %v2153_v16 = vld [vmem:[%s8016_s7 + $0x18] sm:$0xff] }
 0x336   : > { %v7363_v40 = vpop.f32.mrf.mxu0  ;;  %v1685_v52 = vadd.f32 %v5643_v34, %v1533_v0  ;;  %v1688_v20 = vadd.f32 %v8048_v27, %v1536_v10 }
 0x337   : > { %v1843_v61 = vadd.f32 %v7363_v40, %v1691_v60  ;;  %v8060_v40 = vld [vmem:[#allocation23_spill] sm:$0xff] }
 0x338   : > { %v7371_v51 = vpop.f32.mrf.mxu0  ;;  %v1837_v13 = vadd.f32 %v5690_v44, %v1685_v52 }
 0x339   : > { %v8051_v54 = vld [vmem:[#allocation22_spill] sm:$0xff]  ;;  %v1842_v3 = vadd.f32 %v7371_v51, %v1690_v56 }
 0x33a   : > { %v7377_v7 = vpop.f32.mrf.mxu0  ;;  %v1989_v15 = vadd.f32 %v5737_v26, %v1837_v13  ;;  %v2151_v26 = vld [vmem:[%s8016_s7 + $0x8] sm:$0xff]  ;;  %v1841_v44 = vadd.f32 %v8051_v54, %v1689_v22  ;;  %v1540_v13 = vadd.f32 %v8058_v63, %v1388_v48 }
 0x33b   : > { %v8054_v25 = vld [vmem:[#allocation24_spill] sm:$0xff] }
 0x33c   : > { %v7387_v9 = vpop.f32.mrf.mxu0  ;;  %v1840_v49 = vadd.f32 %v8054_v25, %v1688_v20  ;;  %v1993_v5 = vadd.f32 %v5743_v59, %v1841_v44  ;;  %v2155_v59 = vld [vmem:[%s8016_s7 + $0x28] sm:$0xff]  ;;  %v1692_v31 = vadd.f32 %v8060_v40, %v1540_v13  ;;  %v1845_v20 = vadd.f32 %v7377_v7, %v1693_v28  ;;  %v2157_v44 = vld [vmem:[%s8016_s7 + $0x38] sm:$0xff]  ;;  %v2156_v7 = vld [vmem:[%s8016_s7 + $0x30] sm:$0xff] }
 0x33d   : > { %v2159_v13 = vld [vmem:[%s8016_s7 + $0x48] sm:$0xff] }
 0x33e   : > { %v1992_v19 = vadd.f32 %v1959_v1, %v1840_v49 }
 0x34a   : > { %v5784_v34 = vpop.f32.mrf.mxu0 }
 0x34b   : > { %v7394_v14 = vadd.f32 %v5784_v34, %v1989_v15  ;;  %v1969_v15 = vpop.f32.mrf.mxu1  ;;  %v2154_v34 = vld [vmem:[%s8016_s7 + $0x20] sm:$0xff] }
 0x34c   : > { %v2091_v0 = vpop.f32.mrf.mxu0  ;;  %v1994_v27 = vadd.f32 %v1969_v15, %v1842_v3 }
 0x34d   : > { %v7406_v45 = vadd.f32 %v2091_v0, %v1988_v12  ;;  %v2161_v55 = vmul.f32 %v2151_v26, %v7394_v14  ;;  %v5749_v35 = vpop.f32.mrf.mxu1  ;;  %v1995_v26 = vadd.f32 %v5746_v4, %v1843_v61 }
 0x34e   : > { %v5787_v58 = vpop.f32.mrf.mxu0 }
 0x34f   : > { %v2160_v41 = vmul.f32 %v2150_v42, %v7406_v45  ;;  %v7413_v52 = vadd.f32 %v5787_v58, %v1991_v43  ;;  %v2186_v10 = vmul.f32 %v2161_v55, %v7394_v14  ;;  %v1844_v43 = vadd.f32 %v7387_v9, %v1692_v31  ;;  %v1979_v33 = vpop.f32.mrf.mxu1 }
 0x350   : > { %v2101_v17 = vpop.f32.mrf.mxu0 }
 0x351   : > { %v2185_v29 = vmul.f32 %v2160_v41, %v7406_v45  ;;  %v7426_v18 = vadd.f32 %v2101_v17, %v1990_v2  ;;  %v2170_v21 = vadd.f32 %v2161_v55, %v2160_v41  ;;  %v2163_v6 = vmul.f32 %v2153_v16, %v7413_v52  ;;  %v2158_v16 = vld [vmem:[%s8016_s7 + $0x40] sm:$0xff] }
 0x352   : > { %v5790_v50 = vpop.f32.mrf.mxu0  ;;  %v1997_v55 = vadd.f32 %v5749_v35, %v1845_v20  ;;  %v1996_v60 = vadd.f32 %v1979_v33, %v1844_v43  ;;  %v8061_v20 = vld [vmem:[#allocation8_spill] sm:$0xff]  ;;  %v2641_v33 = vld [vmem:[#allocation3 + $0xf8] sm:$0xff] }
 0x353   : > { %v2162_v8 = vmul.f32 %v2152_v11, %v7426_v18  ;;  %v7433_v30 = vadd.f32 %v5790_v50, %v1993_v5  ;;  %v2195_v22 = vadd.f32 %v2186_v10, %v2185_v29  ;;  %v2188_v38 = vmul.f32 %v2163_v6, %v7413_v52 }
 0x354   : > { %v2111_v51 = vpop.f32.mrf.mxu0 }
 0x355   : > { %v2171_v12 = vadd.f32 %v2170_v21, %v2162_v8  ;;  %v2187_v36 = vmul.f32 %v2162_v8, %v7426_v18  ;;  %v7444_v1 = vadd.f32 %v2111_v51, %v1992_v19  ;;  %v2165_v37 = vmul.f32 %v2155_v59, %v7433_v30 }
 0x356   : > { %v5793_v23 = vpop.f32.mrf.mxu0 }
 0x357   : > { %v2196_v39 = vadd.f32 %v2195_v22, %v2187_v36  ;;  %v2164_v0 = vmul.f32 %v2154_v34, %v7444_v1  ;;  %v2172_v42 = vadd.f32 %v2171_v12, %v2163_v6  ;;  %v7451_v54 = vadd.f32 %v5793_v23, %v1995_v26 }
 0x358   : > { %v2121_v46 = vpop.f32.mrf.mxu0  ;;  %v2190_v9 = vmul.f32 %v2165_v37, %v7433_v30 }
 0x359   : > { %v2173_v47 = vadd.f32 %v2172_v42, %v2164_v0  ;;  %v2189_v48 = vmul.f32 %v2164_v0, %v7444_v1  ;;  %v2197_v25 = vadd.f32 %v2196_v39, %v2188_v38  ;;  %v7460_v49 = vadd.f32 %v2121_v46, %v1994_v27  ;;  %v6353_v27 = vld [vmem:[%s8015_s6] sm:$0xff] }
 0x35a   : > { %v5796_v58 = vpop.f32.mrf.mxu0  ;;  %v2167_v4 = vmul.f32 %v2157_v44, %v7451_v54 }
 0x35b   : > { %v2198_v2 = vadd.f32 %v2197_v25, %v2189_v48  ;;  %v2166_v41 = vmul.f32 %v2156_v7, %v7460_v49  ;;  %v2174_v32 = vadd.f32 %v2173_v47, %v2165_v37  ;;  %v7465_v53 = vadd.f32 %v5796_v58, %v1997_v55  ;;  %v2614_v47 = vld [vmem:[#allocation3 + $0x78] sm:$0xff]  ;;  %v2640_v48 = vld [vmem:[#allocation3 + $0xf0] sm:$0xff]  ;;  %v2639_v55 = vld [vmem:[#allocation3 + $0xe8] sm:$0xff] }
 0x35c   : > { %v2131_v56 = vpop.f32.mrf.mxu0  ;;  %v2192_v11 = vmul.f32 %v2167_v4, %v7451_v54  ;;  %5924 = vmatprep.subr.mxu0 %v2614_v47  ;;  %v2613_v25 = vld [vmem:[#allocation3 + $0x70] sm:$0xff]  ;;  %v2638_v58 = vld [vmem:[#allocation3 + $0xe0] sm:$0xff] }
 0x35d   : > { %v2175_v57 = vadd.f32 %v2174_v32, %v2166_v41  ;;  %v2191_v62 = vmul.f32 %v2166_v41, %v7460_v49  ;;  %v2199_v63 = vadd.f32 %v2198_v2, %v2190_v9  ;;  %v7474_v17 = vadd.f32 %v2131_v56, %v1996_v60  ;;  %v2612_v9 = vld [vmem:[#allocation3 + $0x68] sm:$0xff]  ;;  %v2611_v2 = vld [vmem:[#allocation3 + $0x60] sm:$0xff]  ;;  %v2610_v41 = vld [vmem:[#allocation3 + $0x58] sm:$0xff] }
 0x35e   : > { %v2169_v19 = vmul.f32 %v2159_v13, %v7465_v53  ;;  %v2636_v32 = vld [vmem:[#allocation3 + $0xd0] sm:$0xff]  ;;  %v2635_v56 = vld [vmem:[#allocation3 + $0xc8] sm:$0xff]  ;;  %v2633_v13 = vld [vmem:[#allocation3 + $0xb8] sm:$0xff] }
 0x35f   : > { %v2200_v5 = vadd.f32 %v2199_v63, %v2191_v62  ;;  %v2176_v29 = vadd.f32 %v2175_v57, %v2167_v4  ;;  %v2168_v61 = vmul.f32 %v2158_v16, %v7474_v17  ;;  %v2637_v4 = vld [vmem:[#allocation3 + $0xd8] sm:$0xff]  ;;  %v2609_v60 = vld [vmem:[#allocation3 + $0x50] sm:$0xff]  ;;  %v2608_v57 = vld [vmem:[#allocation3 + $0x48] sm:$0xff] }
 0x360   : > { %v2194_v15 = vmul.f32 %v2169_v19, %v7465_v53  ;;  %v2634_v62 = vld [vmem:[#allocation3 + $0xc0] sm:$0xff]  ;;  %v2606_v16 = vld [vmem:[#allocation3 + $0x38] sm:$0xff] }
 0x361   : > { %v2201_v3 = vadd.f32 %v2200_v5, %v2192_v11  ;;  %v2177_v10 = vadd.f32 %v2176_v29, %v2168_v61  ;;  %v2193_v50 = vmul.f32 %v2168_v61, %v7474_v17  ;;  %v2607_v63 = vld [vmem:[#allocation3 + $0x40] sm:$0xff]  ;;  %v2632_v11 = vld [vmem:[#allocation3 + $0xb0] sm:$0xff]  ;;  %v2631_v29 = vld [vmem:[#allocation3 + $0xa8] sm:$0xff] }
 0x362   : > { %v2605_v5 = vld [vmem:[#allocation3 + $0x30] sm:$0xff]  ;;  %v2630_v61 = vld [vmem:[#allocation3 + $0xa0] sm:$0xff] }
 0x363   : > { %v2178_v21 = vadd.f32 %v2177_v10, %v2169_v19  ;;  %v2202_v6 = vadd.f32 %v2201_v3, %v2193_v50  ;;  %v2604_v19 = vld [vmem:[#allocation3 + $0x28] sm:$0xff]  ;;  %v2603_v3 = vld [vmem:[#allocation3 + $0x20] sm:$0xff]  ;;  %v2629_v10 = vld [vmem:[#allocation3 + $0x98] sm:$0xff] }
 0x364   : > { %v2602_v50 = vld [vmem:[#allocation3 + $0x18] sm:$0xff] }
 0x365   : > { %v2179_v8 = vrot.slane %v2178_v21, 4  ;;  %v2203_v59 = vadd.f32 %v2202_v6, %v2194_v15  ;;  %v2628_v15 = vld [vmem:[#allocation3 + $0x90] sm:$0xff]  ;;  %v2627_v6 = vld [vmem:[#allocation3 + $0x88] sm:$0xff] }
 0x367   : > { %v2180_v24 = vadd.f32 %v2179_v8, %v2178_v21  ;;  %v2204_v28 = vrot.slane %v2203_v59, 4  ;;  %v2601_v21 = vld [vmem:[#allocation3 + $0x10] sm:$0xff]  ;;  %v2600_v8 = vld [vmem:[#allocation3 + $0x8] sm:$0xff] }
 0x369   : > { %v2181_v40 = vrot.slane %v2180_v24, 2  ;;  %v2205_v31 = vadd.f32 %v2204_v28, %v2203_v59  ;;  %v2626_v59 = vld [vmem:[#allocation3 + $0x80] sm:$0xff]  ;;  %v2615_v28 = vld [vmem:[#allocation2 + $0x1] sm:$0xff] }
 0x36b   : > { %v2182_v51 = vadd.f32 %v2181_v40, %v2180_v24  ;;  %v2206_v34 = vrot.slane %v2205_v31, 2  ;;  %v2599_v24 = vld [vmem:[#allocation3] sm:$0xff]  ;;  %v7492_v40 = vld [vmem:[#allocation3 + $0x178] sm:$0xff] }
 0x36d   : > { %v2207_v35 = vadd.f32 %v2206_v34, %v2205_v31  ;;  %v2183_v22 = vrot.slane %v2182_v51, 1  ;;  %v7494_v31 = vld [vmem:[#allocation3 + $0x1f8] sm:$0xff] }
 0x36f   : > { %v2184_v12 = vadd.f32 %v2183_v22, %v2182_v51  ;;  %v2208_v36 = vrot.slane %v2207_v35, 1 }
 0x371   : > { %5830 = vmatmul.mubr.f32.vlgmr.msra.gmra.mxu1 %v2184_v12  ;;  %v2209_v26 = vadd.f32 %v2208_v36, %v2207_v35  ;;  %v2210_v35 = vld [vmem:[%s8012_s3] sm:$0x1] }
 0x372   : > { %5868 = vmatpush3.msra.mxu1 %v6353_v27  ;;  %5869 = vmatprep.mubr.msk.f32.mxu1 %vm6405_vm0, %v8061_v20  ;;  %v2211_v36 = vld [vmem:[%s8013_s4] sm:$0x1] }
 0x373   : > { %5865 = vmatmul.mubr.f32.vlgmr.msra.gmra.mxu0 %v2209_v26  ;;  %5872 = vmatprep.subr.mxu1 %v8061_v20 }
 0x374   : > { %5956 = vmatprep.mubr.f32.mxu0 %v8061_v20  ;;  %5925 = vmatpush3.msra.mxu0 %v2614_v47 }
 0x375   : > { %5926 = vmatprep.subr.mxu0 %v2613_v25 }
 0x376   : > { %5927 = vmatpush3.msra.mxu0 %v2613_v25 }
 0x377   : > { %5928 = vmatprep.subr.mxu0 %v2612_v9 }
 0x378   : > { %5929 = vmatpush3.msra.mxu0 %v2612_v9 }
 0x379   : > { %5930 = vmatprep.subr.mxu0 %v2611_v2 }
 0x37a   : > { %5931 = vmatpush3.msra.mxu0 %v2611_v2 }
 0x37b   : > { %5932 = vmatprep.subr.mxu0 %v2610_v41 }
 0x37c   : > { %5933 = vmatpush3.msra.mxu0 %v2610_v41 }
 0x37d   : > { %5934 = vmatprep.subr.mxu0 %v2609_v60 }
 0x37e   : > { %5935 = vmatpush3.msra.mxu0 %v2609_v60 }
 0x37f   : > { %5936 = vmatprep.subr.mxu0 %v2608_v57 }
 0x380   : > { %5937 = vmatpush3.msra.mxu0 %v2608_v57 }
 0x381   : > { %5938 = vmatprep.subr.mxu0 %v2607_v63 }
 0x382   : > { %5939 = vmatpush3.msra.mxu0 %v2607_v63 }
 0x383   : > { %5940 = vmatprep.subr.mxu0 %v2606_v16 }
 0x384   : > { %5941 = vmatpush3.msra.mxu0 %v2606_v16 }
 0x385   : > { %5942 = vmatprep.subr.mxu0 %v2605_v5 }
 0x386   : > { %5943 = vmatpush3.msra.mxu0 %v2605_v5 }
 0x387   : > { %5944 = vmatprep.subr.mxu0 %v2604_v19 }
 0x388   : > { %5945 = vmatpush3.msra.mxu0 %v2604_v19 }
 0x389   : > { %5946 = vmatprep.subr.mxu0 %v2603_v3 }
 0x38a   : > { %5947 = vmatpush3.msra.mxu0 %v2603_v3  ;;  %v6354_v3 = vld [vmem:[#allocation2 + $0x59] sm:$0xff] }
 0x38b   : > { %5948 = vmatprep.subr.mxu0 %v2602_v50 }
 0x38c   : > { %5949 = vmatpush3.msra.mxu0 %v2602_v50 }
 0x38d   : > { %5950 = vmatprep.subr.mxu0 %v2601_v21 }
 0x38e   : > { %5951 = vmatpush3.msra.mxu0 %v2601_v21  ;;  %v3049_v21 = vld [vmem:[#allocation3 + $0x1f0] sm:$0xff] }
 0x38f   : > { %5952 = vmatprep.subr.mxu0 %v2600_v8 }
 0x390   : > { %5953 = vmatpush3.msra.mxu0 %v2600_v8 }
 0x391   : > { %5954 = vmatprep.subr.mxu0 %v2599_v24 }
 0x392   : > { %5955 = vmatpush3.msra.mxu0 %v2599_v24  ;;  %v3048_v24 = vld [vmem:[#allocation3 + $0x1e8] sm:$0xff] }
 0x393   : > { %6018 = vmatprep.subr.mxu0 %v7494_v31 }
 0x431   : > { %v2278_v37 = vpop.f32.mrf.mxu1 }
 0x432   : > { %v2282_v23 = vmul.f32 0.0009765625, %v2278_v37 }
 0x433   : > { %v5831_v38 = vpop.f32.mrf.mxu1  ;;  %v2349_v39 = vpop.f32.mrf.mxu0 }
 0x434   : > { %v2354_v0 = vmul.f32 %v2282_v23, %v2282_v23  ;;  %v2353_v42 = vmul.f32 0.0009765625, %v2349_v39  ;;  %5870 = vmatmul.mubr.msk.f32.vlgmr.msra.gmra.mxu1 %vm583_vm1, %v2282_v23 }
 0x435   : > { %v5866_v43 = vpop.f32.mrf.mxu0  ;;  %5873 = vmatpush3.msra.mxu1 %v6353_v27  ;;  %5874 = vmatprep.mubr.msk.f32.mxu1 %vm6405_vm0, %v8061_v20  ;;  %v8062_v20 = vld [vmem:[#allocation7_spill] sm:$0xff] }
 0x436   : > { %v2355_v44 = vsub.f32 %v2353_v42, %v2354_v0  ;;  %5877 = vmatprep.subr.mxu1 %v2641_v33 }
 0x438   : > { %v2356_v46 = vadd.f32 1e-05, %v2355_v44 }
 0x43a   : > { %6334 = vrsqrt.f32 %v2356_v46 }
 0x447   : > { %v6335_v7 = vpop.eup %6334 }
 0x448   : > { %5875 = vmatmul.mubr.msk.f32.vlgmr.msra.gmra.mxu1 %vm583_vm1, %v6335_v7 }
 0x449   : > { %5878 = vmatpush3.msra.mxu1 %v2641_v33  ;;  %5909 = vmatprep.mubr.f32.mxu1 %v2615_v28 }
 0x44a   : > { %5879 = vmatprep.subr.mxu1 %v2640_v48 }
 0x44b   : > { %5880 = vmatpush3.msra.mxu1 %v2640_v48 }
 0x44c   : > { %5881 = vmatprep.subr.mxu1 %v2639_v55 }
 0x44d   : > { %5882 = vmatpush3.msra.mxu1 %v2639_v55 }
 0x44e   : > { %5883 = vmatprep.subr.mxu1 %v2638_v58 }
 0x44f   : > { %5884 = vmatpush3.msra.mxu1 %v2638_v58 }
 0x450   : > { %5885 = vmatprep.subr.mxu1 %v2637_v4 }
 0x451   : > { %5886 = vmatpush3.msra.mxu1 %v2637_v4 }
 0x452   : > { %5887 = vmatprep.subr.mxu1 %v2636_v32 }
 0x453   : > { %5888 = vmatpush3.msra.mxu1 %v2636_v32 }
 0x454   : > { %5889 = vmatprep.subr.mxu1 %v2635_v56 }
 0x455   : > { %5890 = vmatpush3.msra.mxu1 %v2635_v56 }
 0x456   : > { %5891 = vmatprep.subr.mxu1 %v2634_v62 }
 0x457   : > { %5892 = vmatpush3.msra.mxu1 %v2634_v62 }
 0x458   : > { %5893 = vmatprep.subr.mxu1 %v2633_v13 }
 0x459   : > { %5894 = vmatpush3.msra.mxu1 %v2633_v13 }
 0x45a   : > { %5895 = vmatprep.subr.mxu1 %v2632_v11 }
 0x45b   : > { %5896 = vmatpush3.msra.mxu1 %v2632_v11 }
 0x45c   : > { %5897 = vmatprep.subr.mxu1 %v2631_v29 }
 0x45d   : > { %5898 = vmatpush3.msra.mxu1 %v2631_v29 }
 0x45e   : > { %5899 = vmatprep.subr.mxu1 %v2630_v61 }
 0x45f   : > { %5900 = vmatpush3.msra.mxu1 %v2630_v61 }
 0x460   : > { %5901 = vmatprep.subr.mxu1 %v2629_v10 }
 0x461   : > { %5902 = vmatpush3.msra.mxu1 %v2629_v10 }
 0x462   : > { %5903 = vmatprep.subr.mxu1 %v2628_v15 }
 0x463   : > { %5904 = vmatpush3.msra.mxu1 %v2628_v15  ;;  %v2897_v15 = vld [vmem:[#allocation3 + $0x170] sm:$0xff] }
 0x464   : > { %5905 = vmatprep.subr.mxu1 %v2627_v6 }
 0x465   : > { %5906 = vmatpush3.msra.mxu1 %v2627_v6 }
 0x466   : > { %5907 = vmatprep.subr.mxu1 %v2626_v59 }
 0x467   : > { %5908 = vmatpush3.msra.mxu1 %v2626_v59  ;;  %v2896_v59 = vld [vmem:[#allocation3 + $0x168] sm:$0xff] }
 0x468   : > { %5971 = vmatprep.subr.mxu1 %v7492_v40 }
 0x4f4   : > { %v2427_v51 = vpop.f32.mrf.mxu1 }
 0x4f6   : > { %v5871_v34 = vpop.f32.mrf.mxu1 }
 0x4f7   : > { %v2895_v34 = vld [vmem:[#allocation3 + $0x160] sm:$0xff] }
 0x508   : > { %v2500_v22 = vpop.f32.mrf.mxu1 }
 0x509   : > { %v2504_v12 = vmul.f32 %v2500_v22, %v2210_v35  ;;  %v2894_v22 = vld [vmem:[#allocation3 + $0x158] sm:$0xff] }
 0x50a   : > { %v5876_v26 = vpop.f32.mrf.mxu1 }
 0x50b   : > { %v2505_v27 = vmul.f32 %v2504_v12, %v2427_v51  ;;  %v2510_v37 = vrot.slane %v2504_v12, %v8062_v20  ;;  %v3046_v12 = vld [vmem:[#allocation3 + $0x1d8] sm:$0xff] }
 0x50d   : > { %v2506_v23 = vsub.f32 %v2211_v36, %v2505_v27  ;;  %v2511_v38 = vmul.f32 %v2510_v37, %v7406_v45  ;;  %v2512_v39 = vmul.f32 %v2510_v37, %v7394_v14  ;;  %v2513_v0 = vmul.f32 %v2510_v37, %v7426_v18  ;;  %v2893_v27 = vld [vmem:[#allocation3 + $0x150] sm:$0xff] }
 0x50e   : > { %v2514_v42 = vmul.f32 %v2510_v37, %v7413_v52  ;;  %v2515_v43 = vmul.f32 %v2510_v37, %v7444_v1  ;;  %v2516_v44 = vmul.f32 %v2510_v37, %v7433_v30  ;;  %v2517_v7 = vmul.f32 %v2510_v37, %v7460_v49 }
 0x50f   : > { %v2525_v46 = vrot.slane %v2506_v23, %v8062_v20  ;;  %v2518_v33 = vmul.f32 %v2510_v37, %v7451_v54  ;;  %v2519_v47 = vmul.f32 %v2510_v37, %v7474_v17  ;;  %v2520_v45 = vmul.f32 %v2510_v37, %v7465_v53  ;;  %v3045_v20 = vld [vmem:[#allocation3 + $0x1d0] sm:$0xff] }
 0x511   : > { %v2527_v48 = vadd.f32 %v2525_v46, %v2511_v38  ;;  %v2528_v14 = vadd.f32 %v2525_v46, %v2512_v39  ;;  %v2529_v25 = vadd.f32 %v2525_v46, %v2513_v0  ;;  %v2530_v18 = vadd.f32 %v2525_v46, %v2514_v42  ;;  %v2892_v38 = vld [vmem:[#allocation3 + $0x148] sm:$0xff] }
 0x512   : > { %v2531_v55 = vadd.f32 %v2525_v46, %v2515_v43  ;;  %v2532_v52 = vadd.f32 %v2525_v46, %v2516_v44  ;;  %v2533_v9 = vadd.f32 %v2525_v46, %v2517_v7  ;;  %v2534_v1 = vadd.f32 %v2525_v46, %v2518_v33  ;;  %v3044_v39 = vld [vmem:[#allocation3 + $0x1c8] sm:$0xff]  ;;  %v2891_v43 = vld [vmem:[#allocation3 + $0x140] sm:$0xff]  ;;  %v2890_v33 = vld [vmem:[#allocation3 + $0x138] sm:$0xff] }
 0x513   : > { %v2535_v58 = vadd.f32 %v2525_v46, %v2519_v47  ;;  %v2536_v30 = vadd.f32 %v2525_v46, %v2520_v45  ;;  %vm2537_vm10 = vcmp.ge.f32.partialorder %v2527_v48, 0.0  ;;  %vm2538_vm11 = vcmp.ge.f32.partialorder %v2528_v14, 0.0  ;;  %v3043_v44 = vld [vmem:[#allocation3 + $0x1c0] sm:$0xff]  ;;  %v3042_v47 = vld [vmem:[#allocation3 + $0x1b8] sm:$0xff]  ;;  %v2889_v45 = vld [vmem:[#allocation3 + $0x130] sm:$0xff] }
 0x514   : > { %vm2539_vm12 = vcmp.ge.f32.partialorder %v2529_v25, 0.0  ;;  %vm2540_vm13 = vcmp.ge.f32.partialorder %v2530_v18, 0.0  ;;  %vm2541_vm14 = vcmp.ge.f32.partialorder %v2531_v55, 0.0  ;;  %vm2542_vm15 = vcmp.ge.f32.partialorder %v2532_v52, 0.0 }
 0x515   : > { %vm2543_vm0 = vcmp.ge.f32.partialorder %v2533_v9, 0.0  ;;  %vm2544_vm1 = vcmp.ge.f32.partialorder %v2534_v1, 0.0  ;;  %vm2545_vm2 = vcmp.ge.f32.partialorder %v2535_v58, 0.0  ;;  %vm2546_vm3 = vcmp.ge.f32.partialorder %v2536_v30, 0.0 }
 0x516   : > { %v2547_v54 = vmul.f32 0.01, %v2527_v48  ;;  %v2548_v49 = vmul.f32 0.01, %v2528_v14  ;;  %v2549_v53 = vmul.f32 0.01, %v2529_v25 }
 0x517   : > { %v2550_v17 = vmul.f32 0.01, %v2530_v18  ;;  %v2551_v2 = vmul.f32 0.01, %v2531_v55  ;;  %v2552_v4 = vmul.f32 0.01, %v2532_v52 }
 0x518   : > { %v2553_v41 = vmul.f32 0.01, %v2533_v9  ;;  %v2554_v32 = vmul.f32 0.01, %v2534_v1  ;;  %v2555_v60 = vmul.f32 0.01, %v2535_v58  ;;  %v7517_v56 = vsel %vm2537_vm10, %v2527_v48, %v2547_v54 }
 0x519   : > { %v2556_v57 = vmul.f32 0.01, %v2536_v30  ;;  %v2558_v62 = vsel %vm2538_vm11, %v2528_v14, %v2548_v49  ;;  %v2559_v63 = vsel %vm2539_vm12, %v2529_v25, %v2549_v53  ;;  %v2560_v13 = vsel %vm2540_vm13, %v2530_v18, %v2550_v17  ;;  %2567 = vst [vmem:[#allocation2 + $0xb] sm:$0xff] %v7517_v56  ;;  %v3041_v25 = vld [vmem:[#allocation3 + $0x1b0] sm:$0xff]  ;;  %v2888_v18 = vld [vmem:[#allocation3 + $0x128] sm:$0xff] }
 0x51a   : > { %v2561_v16 = vsel %vm2541_vm14, %v2531_v55, %v2551_v2  ;;  %v7525_v11 = vsel %vm2542_vm15, %v2532_v52, %v2552_v4  ;;  %v2563_v5 = vsel %vm2543_vm0, %v2533_v9, %v2553_v41  ;;  %v2564_v29 = vsel %vm2544_vm1, %v2534_v1, %v2554_v32  ;;  %2568 = vst [vmem:[#allocation2 + $0x13] sm:$0xff] %v2558_v62  ;;  %v3040_v52 = vld [vmem:[#allocation3 + $0x1a8] sm:$0xff]  ;;  %v2887_v9 = vld [vmem:[#allocation3 + $0x120] sm:$0xff]  ;;  %v2885_v54 = vld [vmem:[#allocation3 + $0x110] sm:$0xff] }
 0x51b   : > { %2569 = vst [vmem:[#allocation2 + $0x1b] sm:$0xff] %v2559_v63  ;;  %2570 = vst [vmem:[#allocation2 + $0x23] sm:$0xff] %v2560_v13  ;;  %v2565_v19 = vsel %vm2545_vm2, %v2535_v58, %v2555_v60  ;;  %v2566_v61 = vsel %vm2546_vm3, %v2536_v30, %v2556_v57  ;;  %v3039_v1 = vld [vmem:[#allocation3 + $0x1a0] sm:$0xff]  ;;  %v2886_v58 = vld [vmem:[#allocation3 + $0x118] sm:$0xff] }
 0x51c   : > { %2571 = vst [vmem:[#allocation2 + $0x2b] sm:$0xff] %v2561_v16  ;;  %2572 = vst [vmem:[#allocation2 + $0x33] sm:$0xff] %v7525_v11  ;;  %v3038_v30 = vld [vmem:[#allocation3 + $0x198] sm:$0xff]  ;;  %v3037_v49 = vld [vmem:[#allocation3 + $0x190] sm:$0xff] }
 0x51d   : > { %2573 = vst [vmem:[#allocation2 + $0x3b] sm:$0xff] %v2563_v5  ;;  %2574 = vst [vmem:[#allocation2 + $0x43] sm:$0xff] %v2564_v29  ;;  %v2884_v53 = vld [vmem:[#allocation3 + $0x108] sm:$0xff]  ;;  %v2883_v2 = vld [vmem:[#allocation3 + $0x100] sm:$0xff] }
 0x51e   : > { %2579 = vst [vmem:[#allocation2 + $0x13] sm:$0x3] %v6354_v3  ;;  %2580 = vst [vmem:[#allocation2 + $0x1d] sm:$0x3] %v6354_v3  ;;  %v3036_v17 = vld [vmem:[#allocation3 + $0x188] sm:$0xff]  ;;  %v3035_v4 = vld [vmem:[#allocation3 + $0x180] sm:$0xff] }
 0x51f   : > { %2581 = vst [vmem:[#allocation2 + $0x27] sm:$0x3] %v6354_v3  ;;  %2575 = vst [vmem:[#allocation2 + $0x4b] sm:$0xff] %v2565_v19  ;;  %v2872_v41 = vld [vmem:[#allocation2 + $0x2] sm:$0xff]  ;;  %v3200_v16 = vld [vmem:[#allocation3 + $0x268] sm:$0xff] }
 0x520   : > { %2576 = vst [vmem:[#allocation2 + $0x53] sm:$0xff] %v2566_v61  ;;  %2582 = vst [vmem:[#allocation2 + $0x31] sm:$0x3] %v6354_v3  ;;  %v2616_v10 = vld [vmem:[#allocation2 + $0x9] sm:$0xff]  ;;  %v3201_v63 = vld [vmem:[#allocation3 + $0x270] sm:$0xff] }
 0x521   : > { %2583 = vst [vmem:[#allocation2 + $0x3b] sm:$0x3] %v6354_v3  ;;  %2584 = vst [vmem:[#allocation2 + $0x45] sm:$0x3] %v6354_v3  ;;  %v2590_v50 = vld [vmem:[#allocation2 + $0x8] sm:$0xff]  ;;  %5910 = vmatmul.mubr.f32.vlgmr.msra.gmra.mxu1 %v2616_v10  ;;  %v3353_v13 = vld [vmem:[#allocation3 + $0x2f0] sm:$0xff] }
 0x522   : > { %2585 = vst [vmem:[#allocation2 + $0x4f] sm:$0x3] %v6354_v3  ;;  %2586 = vst [vmem:[#allocation2 + $0x59] sm:$0xff] %v6354_v3  ;;  %5957 = vmatmul.mubr.f32.vlgmr.msra.gmra.mxu0 %v2590_v50  ;;  %5972 = vmatpush3.msra.mxu1 %v7492_v40  ;;  %v3047_v40 = vld [vmem:[#allocation3 + $0x1e0] sm:$0xff]  ;;  %v3202_v32 = vld [vmem:[#allocation3 + $0x278] sm:$0xff] }
 0x523   : > { %6019 = vmatpush3.msra.mxu0 %v7494_v31  ;;  %5973 = vmatprep.subr.mxu1 %v2897_v15  ;;  %v2620_v36 = vld [vmem:[#allocation2 + $0x29] sm:$0xff]  ;;  %v3352_v5 = vld [vmem:[#allocation3 + $0x2e8] sm:$0xff] }
 0x524   : > { %6020 = vmatprep.subr.mxu0 %v3049_v21  ;;  %5974 = vmatpush3.msra.mxu1 %v2897_v15  ;;  %v3024_v55 = vld [vmem:[#allocation2 + $0xa] sm:$0xff] }
 0x525   : > { %v2617_v6 = vld [vmem:[#allocation2 + $0x11] sm:$0xff]  ;;  %6021 = vmatpush3.msra.mxu0 %v3049_v21  ;;  %5975 = vmatprep.subr.mxu1 %v2896_v59  ;;  %v2618_v28 = vld [vmem:[#allocation2 + $0x19] sm:$0xff]  ;;  %v3354_v60 = vld [vmem:[#allocation3 + $0x2f8] sm:$0xff] }
 0x526   : > { %v2591_v8 = vld [vmem:[#allocation2 + $0x10] sm:$0xff]  ;;  %5912 = vmatprep.mubr.f32.mxu1 %v2617_v6  ;;  %6022 = vmatprep.subr.mxu0 %v3048_v24  ;;  %v2592_v51 = vld [vmem:[#allocation2 + $0x18] sm:$0xff]  ;;  %v2619_v31 = vld [vmem:[#allocation2 + $0x21] sm:$0xff] }
 0x527   : > { %5959 = vmatprep.mubr.f32.mxu0 %v2591_v8  ;;  %5913 = vmatmul.mubr.f32.gmra.mxu1 %v2618_v28  ;;  %v2593_v35 = vld [vmem:[#allocation2 + $0x20] sm:$0xff]  ;;  %v2594_v26 = vld [vmem:[#allocation2 + $0x28] sm:$0xff]  ;;  %v2621_v37 = vld [vmem:[#allocation2 + $0x31] sm:$0xff] }
 0x528   : > { %5960 = vmatmul.mubr.f32.gmra.mxu0 %v2592_v51  ;;  %5976 = vmatpush3.msra.mxu1 %v2896_v59  ;;  %v2595_v23 = vld [vmem:[#allocation2 + $0x30] sm:$0xff]  ;;  %v2622_v0 = vld [vmem:[#allocation2 + $0x39] sm:$0xff]  ;;  %v2623_v46 = vld [vmem:[#allocation2 + $0x41] sm:$0xff] }
 0x529   : > { %6023 = vmatpush3.msra.mxu0 %v3048_v24  ;;  %5915 = vmatprep.mubr.f32.mxu1 %v2619_v31  ;;  %v2596_v42 = vld [vmem:[#allocation2 + $0x38] sm:$0xff]  ;;  %v2597_v7 = vld [vmem:[#allocation2 + $0x40] sm:$0xff]  ;;  %v2624_v48 = vld [vmem:[#allocation2 + $0x49] sm:$0xff] }
 0x52a   : > { %5962 = vmatprep.mubr.f32.mxu0 %v2593_v35  ;;  %5977 = vmatprep.subr.mxu1 %v2895_v34  ;;  %v2598_v14 = vld [vmem:[#allocation2 + $0x48] sm:$0xff]  ;;  %v3025_v57 = vld [vmem:[#allocation2 + $0x12] sm:$0xff]  ;;  %v3026_v62 = vld [vmem:[#allocation2 + $0x1a] sm:$0xff] }
 0x52b   : > { %6024 = vmatprep.subr.mxu0 %v3047_v40  ;;  %5978 = vmatpush3.msra.mxu1 %v2895_v34  ;;  %v3027_v29 = vld [vmem:[#allocation2 + $0x22] sm:$0xff]  ;;  %v3028_v19 = vld [vmem:[#allocation2 + $0x2a] sm:$0xff]  ;;  %v3029_v15 = vld [vmem:[#allocation2 + $0x32] sm:$0xff] }
 0x52c   : > { %6025 = vmatpush3.msra.mxu0 %v3047_v40  ;;  %5979 = vmatprep.subr.mxu1 %v2894_v22  ;;  %v3199_v61 = vld [vmem:[#allocation3 + $0x260] sm:$0xff]  ;;  %v3198_v10 = vld [vmem:[#allocation3 + $0x258] sm:$0xff]  ;;  %v3030_v21 = vld [vmem:[#allocation2 + $0x3a] sm:$0xff] }
 0x52d   : > { %6026 = vmatprep.subr.mxu0 %v3046_v12  ;;  %5916 = vmatmul.mubr.f32.gmra.mxu1 %v2620_v36  ;;  %v3351_v3 = vld [vmem:[#allocation3 + $0x2e0] sm:$0xff]  ;;  %v3350_v50 = vld [vmem:[#allocation3 + $0x2d8] sm:$0xff]  ;;  %v3197_v6 = vld [vmem:[#allocation3 + $0x250] sm:$0xff] }
 0x52e   : > { %5963 = vmatmul.mubr.f32.gmra.mxu0 %v2594_v26  ;;  %5980 = vmatpush3.msra.mxu1 %v2894_v22  ;;  %v3349_v8 = vld [vmem:[#allocation3 + $0x2d0] sm:$0xff]  ;;  %v3196_v59 = vld [vmem:[#allocation3 + $0x248] sm:$0xff]  ;;  %v3032_v51 = vld [vmem:[#allocation2 + $0x4a] sm:$0xff] }
 0x52f   : > { %6027 = vmatpush3.msra.mxu0 %v3046_v12  ;;  %5918 = vmatprep.mubr.f32.mxu1 %v2621_v37  ;;  %v3348_v24 = vld [vmem:[#allocation3 + $0x2c8] sm:$0xff]  ;;  %v3031_v28 = vld [vmem:[#allocation2 + $0x42] sm:$0xff]  ;;  %v3195_v34 = vld [vmem:[#allocation3 + $0x240] sm:$0xff] }
 0x530   : > { %5965 = vmatprep.mubr.f32.mxu0 %v2595_v23  ;;  %5981 = vmatprep.subr.mxu1 %v2893_v27  ;;  %v3347_v40 = vld [vmem:[#allocation3 + $0x2c0] sm:$0xff]  ;;  %v3194_v31 = vld [vmem:[#allocation3 + $0x238] sm:$0xff]  ;;  %v3193_v12 = vld [vmem:[#allocation3 + $0x230] sm:$0xff] }
 0x531   : > { %6028 = vmatprep.subr.mxu0 %v3045_v20  ;;  %5982 = vmatpush3.msra.mxu1 %v2893_v27  ;;  %v3346_v35 = vld [vmem:[#allocation3 + $0x2b8] sm:$0xff]  ;;  %v3033_v22 = vld [vmem:[#allocation2 + $0x52] sm:$0xff]  ;;  %v3345_v36 = vld [vmem:[#allocation3 + $0x2b0] sm:$0xff] }
 0x532   : > { %6029 = vmatpush3.msra.mxu0 %v3045_v20  ;;  %5983 = vmatprep.subr.mxu1 %v2892_v38  ;;  %v3328_v26 = vld [vmem:[#allocation2 + $0xc] sm:$0xff]  ;;  %v3192_v27 = vld [vmem:[#allocation3 + $0x228] sm:$0xff] }
 0x533   : > { %6030 = vmatprep.subr.mxu0 %v3044_v39  ;;  %5919 = vmatmul.mubr.f32.gmra.mxu1 %v2622_v0  ;;  %v3344_v20 = vld [vmem:[#allocation3 + $0x2a8] sm:$0xff]  ;;  %v3191_v37 = vld [vmem:[#allocation3 + $0x220] sm:$0xff]  ;;  %v3341_v0 = vld [vmem:[#allocation3 + $0x290] sm:$0xff] }
 0x534   : > { %5966 = vmatmul.mubr.f32.gmra.mxu0 %v2596_v42  ;;  %5984 = vmatpush3.msra.mxu1 %v2892_v38  ;;  %v3343_v23 = vld [vmem:[#allocation3 + $0x2a0] sm:$0xff]  ;;  %v3190_v38 = vld [vmem:[#allocation3 + $0x218] sm:$0xff]  ;;  %v3188_v42 = vld [vmem:[#allocation3 + $0x208] sm:$0xff] }
 0x535   : > { %6031 = vmatpush3.msra.mxu0 %v3044_v39  ;;  %5921 = vmatprep.mubr.f32.mxu1 %v2623_v46  ;;  %v3342_v39 = vld [vmem:[#allocation3 + $0x298] sm:$0xff]  ;;  %v3339_v46 = vld [vmem:[#allocation3 + $0x280] sm:$0xff] }
 0x536   : > { %5968 = vmatprep.mubr.f32.mxu0 %v2597_v7  ;;  %5985 = vmatprep.subr.mxu1 %v2891_v43  ;;  %v3506_v7 = vld [vmem:[#allocation3 + $0x378] sm:$0xff] }
 0x537   : > { %6032 = vmatprep.subr.mxu0 %v3043_v44  ;;  %5986 = vmatpush3.msra.mxu1 %v2891_v43  ;;  %v3340_v43 = vld [vmem:[#allocation3 + $0x288] sm:$0xff] }
 0x538   : > { %6033 = vmatpush3.msra.mxu0 %v3043_v44  ;;  %5987 = vmatprep.subr.mxu1 %v2890_v33  ;;  %v3187_v44 = vld [vmem:[#allocation3 + $0x200] sm:$0xff] }
 0x539   : > { %6034 = vmatprep.subr.mxu0 %v3042_v47  ;;  %5922 = vmatmul.mubr.f32.gmra.mxu1 %v2624_v48  ;;  %v3505_v48 = vld [vmem:[#allocation3 + $0x370] sm:$0xff] }
 0x53a   : > { %5969 = vmatmul.mubr.f32.gmra.mxu0 %v2598_v14  ;;  %5988 = vmatpush3.msra.mxu1 %v2890_v33  ;;  %v3658_v33 = vld [vmem:[#allocation3 + $0x3f8] sm:$0xff]  ;;  %v3178_v14 = vld [vmem:[#allocation2 + $0x1b] sm:$0xff] }
 0x53b   : > { %6035 = vmatpush3.msra.mxu0 %v3042_v47  ;;  %5989 = vmatprep.subr.mxu1 %v2889_v45  ;;  %v3177_v47 = vld [vmem:[#allocation2 + $0x13] sm:$0xff] }
 0x53c   : > { %6036 = vmatprep.subr.mxu0 %v3041_v25  ;;  %6050 = vmatprep.mubr.f32.mxu0 %v3024_v55 }
 0x53d   : > { %5990 = vmatpush3.msra.mxu1 %v2889_v45  ;;  %6037 = vmatpush3.msra.mxu0 %v3041_v25  ;;  %v7535_v45 = vld [vmem:[#allocation2 + $0x14] sm:$0xff]  ;;  %v7538_v25 = vld [vmem:[#allocation2 + $0x1c] sm:$0xff] }
 0x53e   : > { %5991 = vmatprep.subr.mxu1 %v2888_v18  ;;  %6038 = vmatprep.subr.mxu0 %v3040_v52 }
 0x53f   : > { %5992 = vmatpush3.msra.mxu1 %v2888_v18  ;;  %6039 = vmatpush3.msra.mxu0 %v3040_v52  ;;  %v3657_v18 = vld [vmem:[#allocation3 + $0x3f0] sm:$0xff]  ;;  %v3656_v52 = vld [vmem:[#allocation3 + $0x3e8] sm:$0xff] }
 0x540   : > { %5993 = vmatprep.subr.mxu1 %v2887_v9  ;;  %6040 = vmatprep.subr.mxu0 %v3039_v1 }
 0x541   : > { %5994 = vmatpush3.msra.mxu1 %v2887_v9  ;;  %6041 = vmatpush3.msra.mxu0 %v3039_v1  ;;  %v3179_v9 = vld [vmem:[#allocation2 + $0x23] sm:$0xff] }
 0x542   : > { %5995 = vmatprep.subr.mxu1 %v2886_v58  ;;  %6042 = vmatprep.subr.mxu0 %v3038_v30  ;;  %v7541_v1 = vld [vmem:[#allocation2 + $0x24] sm:$0xff] }
 0x543   : > { %5996 = vmatpush3.msra.mxu1 %v2886_v58  ;;  %6043 = vmatpush3.msra.mxu0 %v3038_v30  ;;  %v3503_v58 = vld [vmem:[#allocation3 + $0x360] sm:$0xff] }
 0x544   : > { %5997 = vmatprep.subr.mxu1 %v2885_v54  ;;  %6044 = vmatprep.subr.mxu0 %v3037_v49  ;;  %v3180_v30 = vld [vmem:[#allocation2 + $0x2b] sm:$0xff] }
 0x545   : > { %5998 = vmatpush3.msra.mxu1 %v2885_v54  ;;  %6045 = vmatpush3.msra.mxu0 %v3037_v49  ;;  %v7544_v54 = vld [vmem:[#allocation2 + $0x2c] sm:$0xff] }
 0x546   : > { %5999 = vmatprep.subr.mxu1 %v2884_v53  ;;  %6046 = vmatprep.subr.mxu0 %v3036_v17  ;;  %v3655_v49 = vld [vmem:[#allocation3 + $0x3e0] sm:$0xff] }
 0x547   : > { %6000 = vmatpush3.msra.mxu1 %v2884_v53  ;;  %6047 = vmatpush3.msra.mxu0 %v3036_v17  ;;  %v3502_v53 = vld [vmem:[#allocation3 + $0x358] sm:$0xff] }
 0x548   : > { %6001 = vmatprep.subr.mxu1 %v2883_v2  ;;  %6048 = vmatprep.subr.mxu0 %v3035_v4  ;;  %v3654_v17 = vld [vmem:[#allocation3 + $0x3d8] sm:$0xff] }
 0x549   : > { %6002 = vmatpush3.msra.mxu1 %v2883_v2  ;;  %6003 = vmatprep.mubr.f32.mxu1 %v2872_v41  ;;  %v7547_v2 = vld [vmem:[#allocation2 + $0x34] sm:$0xff] }
 0x54a   : > { %6049 = vmatpush3.msra.mxu0 %v3035_v4  ;;  %6004 = vmatmul.mubr.f32.vlgmr.msra.gmra.mxu1 %v3024_v55  ;;  %v3504_v55 = vld [vmem:[#allocation3 + $0x368] sm:$0xff]  ;;  %v3501_v4 = vld [vmem:[#allocation3 + $0x350] sm:$0xff] }
 0x54b   : > { %6051 = vmatmul.mubr.f32.vlgmr.msra.gmra.mxu0 %v3025_v57  ;;  %6065 = vmatprep.subr.mxu1 %v3202_v32  ;;  %v3182_v41 = vld [vmem:[#allocation2 + $0x3b] sm:$0xff] }
 0x54c   : > { %6112 = vmatprep.subr.mxu0 %v3354_v60  ;;  %6006 = vmatprep.mubr.f32.mxu1 %v3025_v57  ;;  %v3500_v57 = vld [vmem:[#allocation3 + $0x348] sm:$0xff] }
 0x54d   : > { %6053 = vmatprep.mubr.f32.mxu0 %v3026_v62  ;;  %6066 = vmatpush3.msra.mxu1 %v3202_v32  ;;  %v7551_v32 = vld [vmem:[#allocation2 + $0x3c] sm:$0xff] }
 0x54e   : > { %6113 = vmatpush3.msra.mxu0 %v3354_v60  ;;  %6067 = vmatprep.subr.mxu1 %v3201_v63  ;;  %v3653_v60 = vld [vmem:[#allocation3 + $0x3d0] sm:$0xff] }
 0x54f   : > { %6114 = vmatprep.subr.mxu0 %v3353_v13  ;;  %6068 = vmatpush3.msra.mxu1 %v3201_v63  ;;  %v7554_v63 = vld [vmem:[#allocation2 + $0x44] sm:$0xff] }
 0x550   : > { %6115 = vmatpush3.msra.mxu0 %v3353_v13  ;;  %6007 = vmatmul.mubr.f32.gmra.mxu1 %v3026_v62  ;;  %v3652_v62 = vld [vmem:[#allocation3 + $0x3c8] sm:$0xff]  ;;  %v3499_v13 = vld [vmem:[#allocation3 + $0x340] sm:$0xff] }
 0x551   : > { %6054 = vmatmul.mubr.f32.gmra.mxu0 %v3027_v29  ;;  %6069 = vmatprep.subr.mxu1 %v3200_v16 }
 0x552   : > { %6116 = vmatprep.subr.mxu0 %v3352_v5  ;;  %6009 = vmatprep.mubr.f32.mxu1 %v3027_v29  ;;  %v3651_v29 = vld [vmem:[#allocation3 + $0x3c0] sm:$0xff] }
 0x553   : > { %6056 = vmatprep.mubr.f32.mxu0 %v3028_v19  ;;  %6070 = vmatpush3.msra.mxu1 %v3200_v16  ;;  %v3184_v16 = vld [vmem:[#allocation2 + $0x4b] sm:$0xff] }
 0x554   : > { %6117 = vmatpush3.msra.mxu0 %v3352_v5  ;;  %6071 = vmatprep.subr.mxu1 %v3199_v61  ;;  %v7557_v5 = vld [vmem:[#allocation2 + $0x4c] sm:$0xff] }
 0x555   : > { %6118 = vmatprep.subr.mxu0 %v3351_v3  ;;  %6072 = vmatpush3.msra.mxu1 %v3199_v61  ;;  %v3650_v61 = vld [vmem:[#allocation3 + $0x3b8] sm:$0xff] }
 0x556   : > { %6119 = vmatpush3.msra.mxu0 %v3351_v3  ;;  %6010 = vmatmul.mubr.f32.gmra.mxu1 %v3028_v19  ;;  %v3498_v19 = vld [vmem:[#allocation3 + $0x338] sm:$0xff]  ;;  %v3185_v3 = vld [vmem:[#allocation2 + $0x53] sm:$0xff] }
 0x557   : > { %6057 = vmatmul.mubr.f32.gmra.mxu0 %v3029_v15  ;;  %6073 = vmatprep.subr.mxu1 %v3198_v10 }
 0x558   : > { %6120 = vmatprep.subr.mxu0 %v3350_v50  ;;  %6012 = vmatprep.mubr.f32.mxu1 %v3029_v15  ;;  %v3649_v15 = vld [vmem:[#allocation3 + $0x3b0] sm:$0xff] }
 0x559   : > { %6059 = vmatprep.mubr.f32.mxu0 %v3030_v21  ;;  %6074 = vmatpush3.msra.mxu1 %v3198_v10  ;;  %v7560_v10 = vld [vmem:[#allocation2 + $0x54] sm:$0xff] }
 0x55a   : > { %6121 = vmatpush3.msra.mxu0 %v3350_v50  ;;  %6075 = vmatprep.subr.mxu1 %v3197_v6  ;;  %v3497_v50 = vld [vmem:[#allocation3 + $0x330] sm:$0xff] }
 0x55b   : > { %6122 = vmatprep.subr.mxu0 %v3349_v8  ;;  %6076 = vmatpush3.msra.mxu1 %v3197_v6  ;;  %v3496_v6 = vld [vmem:[#allocation3 + $0x328] sm:$0xff] }
 0x55c   : > { %6123 = vmatpush3.msra.mxu0 %v3349_v8  ;;  %6013 = vmatmul.mubr.f32.gmra.mxu1 %v3030_v21  ;;  %v3632_v21 = vld [vmem:[#allocation2 + $0x15] sm:$0xff] }
 0x55d   : > { %6060 = vmatmul.mubr.f32.gmra.mxu0 %v3031_v28  ;;  %6077 = vmatprep.subr.mxu1 %v3196_v59  ;;  %v3648_v8 = vld [vmem:[#allocation3 + $0x3a8] sm:$0xff] }
 0x55e   : > { %6124 = vmatprep.subr.mxu0 %v3348_v24  ;;  %6015 = vmatprep.mubr.f32.mxu1 %v3031_v28  ;;  %v3494_v28 = vld [vmem:[#allocation3 + $0x318] sm:$0xff] }
 0x55f   : > { %6062 = vmatprep.mubr.f32.mxu0 %v3032_v51  ;;  %6078 = vmatpush3.msra.mxu1 %v3196_v59  ;;  %v3495_v59 = vld [vmem:[#allocation3 + $0x320] sm:$0xff] }
 0x560   : > { %6125 = vmatpush3.msra.mxu0 %v3348_v24  ;;  %6079 = vmatprep.subr.mxu1 %v3195_v34  ;;  %v3647_v24 = vld [vmem:[#allocation3 + $0x3a0] sm:$0xff] }
 0x561   : > { %6126 = vmatprep.subr.mxu0 %v3347_v40  ;;  %6080 = vmatpush3.msra.mxu1 %v3195_v34  ;;  %v3493_v34 = vld [vmem:[#allocation3 + $0x310] sm:$0xff] }
 0x562   : > { %6127 = vmatpush3.msra.mxu0 %v3347_v40  ;;  %6016 = vmatmul.mubr.f32.gmra.mxu1 %v3032_v51  ;;  %v3646_v51 = vld [vmem:[#allocation3 + $0x398] sm:$0xff]  ;;  %v3645_v40 = vld [vmem:[#allocation3 + $0x390] sm:$0xff] }
 0x563   : > { %6063 = vmatmul.mubr.f32.gmra.mxu0 %v3033_v22  ;;  %6081 = vmatprep.subr.mxu1 %v3194_v31  ;;  %v3491_v22 = vld [vmem:[#allocation3 + $0x300] sm:$0xff] }
 0x564   : > { %6128 = vmatprep.subr.mxu0 %v3346_v35  ;;  %6082 = vmatpush3.msra.mxu1 %v3194_v31  ;;  %v3492_v31 = vld [vmem:[#allocation3 + $0x308] sm:$0xff] }
 0x565   : > { %6097 = vmatprep.mubr.f32.mxu1 %v7517_v56  ;;  %6129 = vmatpush3.msra.mxu0 %v3346_v35  ;;  %v3189_v56 = vld [vmem:[#allocation3 + $0x210] sm:$0xff]  ;;  %v3644_v35 = vld [vmem:[#allocation3 + $0x388] sm:$0xff] }
 0x566   : > { %6144 = vmatprep.mubr.f32.mxu0 %v3328_v26  ;;  %6083 = vmatprep.subr.mxu1 %v3193_v12  ;;  %v3633_v26 = vld [vmem:[#allocation2 + $0x1d] sm:$0xff] }
 0x567   : > { %6130 = vmatprep.subr.mxu0 %v3345_v36  ;;  %6084 = vmatpush3.msra.mxu1 %v3193_v12  ;;  %v3643_v12 = vld [vmem:[#allocation3 + $0x380] sm:$0xff] }
 0x568   : > { %6131 = vmatpush3.msra.mxu0 %v3345_v36  ;;  %6085 = vmatprep.subr.mxu1 %v3192_v27  ;;  %v3810_v36 = vld [vmem:[#allocation3 + $0x478] sm:$0xff] }
 0x569   : > { %6132 = vmatprep.subr.mxu0 %v3344_v20  ;;  %6086 = vmatpush3.msra.mxu1 %v3192_v27  ;;  %v3809_v27 = vld [vmem:[#allocation3 + $0x470] sm:$0xff] }
 0x56a   : > { %6133 = vmatpush3.msra.mxu0 %v3344_v20  ;;  %6087 = vmatprep.subr.mxu1 %v3191_v37  ;;  %v3634_v20 = vld [vmem:[#allocation2 + $0x25] sm:$0xff] }
 0x56b   : > { %6134 = vmatprep.subr.mxu0 %v3343_v23  ;;  %6088 = vmatpush3.msra.mxu1 %v3191_v37  ;;  %v3808_v37 = vld [vmem:[#allocation3 + $0x468] sm:$0xff] }
 0x56c   : > { %6135 = vmatpush3.msra.mxu0 %v3343_v23  ;;  %6089 = vmatprep.subr.mxu1 %v3190_v38  ;;  %v3635_v23 = vld [vmem:[#allocation2 + $0x2d] sm:$0xff] }
 0x56d   : > { %6136 = vmatprep.subr.mxu0 %v3342_v39  ;;  %6090 = vmatpush3.msra.mxu1 %v3190_v38  ;;  %v3636_v38 = vld [vmem:[#allocation2 + $0x35] sm:$0xff] }
 0x56e   : > { %6137 = vmatpush3.msra.mxu0 %v3342_v39  ;;  %6091 = vmatprep.subr.mxu1 %v3189_v56  ;;  %v3807_v39 = vld [vmem:[#allocation3 + $0x460] sm:$0xff] }
 0x56f   : > { %6138 = vmatprep.subr.mxu0 %v3341_v0  ;;  %6092 = vmatpush3.msra.mxu1 %v3189_v56  ;;  %v3637_v56 = vld [vmem:[#allocation2 + $0x3d] sm:$0xff] }
 0x570   : > { %6139 = vmatpush3.msra.mxu0 %v3341_v0  ;;  %6093 = vmatprep.subr.mxu1 %v3188_v42  ;;  %v3806_v0 = vld [vmem:[#allocation3 + $0x458] sm:$0xff] }
 0x571   : > { %6140 = vmatprep.subr.mxu0 %v3340_v43  ;;  %6094 = vmatpush3.msra.mxu1 %v3188_v42  ;;  %v3638_v42 = vld [vmem:[#allocation2 + $0x45] sm:$0xff] }
 0x572   : > { %6141 = vmatpush3.msra.mxu0 %v3340_v43  ;;  %6095 = vmatprep.subr.mxu1 %v3187_v44  ;;  %v3805_v43 = vld [vmem:[#allocation3 + $0x450] sm:$0xff] }
 0x573   : > { %6142 = vmatprep.subr.mxu0 %v3339_v46  ;;  %6096 = vmatpush3.msra.mxu1 %v3187_v44  ;;  %v3639_v44 = vld [vmem:[#allocation2 + $0x4d] sm:$0xff] }
 0x574   : > { %6143 = vmatpush3.msra.mxu0 %v3339_v46  ;;  %6098 = vmatmul.mubr.f32.vlgmr.msra.gmra.mxu1 %v3177_v47  ;;  %v3804_v46 = vld [vmem:[#allocation3 + $0x448] sm:$0xff] }
 0x575   : > { %6145 = vmatmul.mubr.f32.vlgmr.msra.gmra.mxu0 %v7535_v45  ;;  %6159 = vmatprep.subr.mxu1 %v3506_v7  ;;  %v3641_v47 = vld [vmem:[#allocation2 + $0x5d] sm:$0xff] }
 0x576   : > { %6206 = vmatprep.subr.mxu0 %v3658_v33  ;;  %6100 = vmatprep.mubr.f32.mxu1 %v3178_v14  ;;  %v3801_v14 = vld [vmem:[#allocation3 + $0x430] sm:$0xff] }
 0x577   : > { %6147 = vmatprep.mubr.f32.mxu0 %v7538_v25  ;;  %6160 = vmatpush3.msra.mxu1 %v3506_v7  ;;  %v3640_v7 = vld [vmem:[#allocation2 + $0x55] sm:$0xff] }
 0x578   : > { %6207 = vmatpush3.msra.mxu0 %v3658_v33  ;;  %6161 = vmatprep.subr.mxu1 %v3505_v48  ;;  %v3803_v33 = vld [vmem:[#allocation3 + $0x440] sm:$0xff] }
 0x579   : > { %6208 = vmatprep.subr.mxu0 %v3657_v18  ;;  %6162 = vmatpush3.msra.mxu1 %v3505_v48  ;;  %v3802_v48 = vld [vmem:[#allocation3 + $0x438] sm:$0xff] }
 0x57a   : > { %6209 = vmatpush3.msra.mxu0 %v3657_v18  ;;  %6101 = vmatmul.mubr.f32.gmra.mxu1 %v3179_v9  ;;  %v3800_v18 = vld [vmem:[#allocation3 + $0x428] sm:$0xff]  ;;  %v3797_v9 = vld [vmem:[#allocation3 + $0x410] sm:$0xff] }
 0x57b   : > { %6148 = vmatmul.mubr.f32.gmra.mxu0 %v7541_v1  ;;  %6163 = vmatprep.subr.mxu1 %v3504_v55 }
 0x57c   : > { %6210 = vmatprep.subr.mxu0 %v3656_v52  ;;  %6103 = vmatprep.mubr.f32.mxu1 %v3180_v30  ;;  %v3785_v30 = vld [vmem:[#allocation2 + $0x1e] sm:$0xff] }
 0x57d   : > { %6150 = vmatprep.mubr.f32.mxu0 %v7544_v54  ;;  %6164 = vmatpush3.msra.mxu1 %v3504_v55  ;;  %v3799_v55 = vld [vmem:[#allocation3 + $0x420] sm:$0xff] }
 0x57e   : > { %6211 = vmatpush3.msra.mxu0 %v3656_v52  ;;  %6165 = vmatprep.subr.mxu1 %v3503_v58  ;;  %v3798_v52 = vld [vmem:[#allocation3 + $0x418] sm:$0xff] }
 0x57f   : > { %6212 = vmatprep.subr.mxu0 %v3655_v49  ;;  %6166 = vmatpush3.msra.mxu1 %v3503_v58  ;;  %v3795_v58 = vld [vmem:[#allocation3 + $0x400] sm:$0xff] }
 0x580   : > { %6213 = vmatpush3.msra.mxu0 %v3655_v49  ;;  %6104 = vmatmul.mubr.f32.gmra.mxu1 %v7525_v11  ;;  %v3183_v11 = vld [vmem:[#allocation2 + $0x43] sm:$0xff]  ;;  %v3787_v49 = vld [vmem:[#allocation2 + $0x2e] sm:$0xff] }
 0x581   : > { %6151 = vmatmul.mubr.f32.gmra.mxu0 %v7547_v2  ;;  %6167 = vmatprep.subr.mxu1 %v3502_v53 }
 0x582   : > { %6214 = vmatprep.subr.mxu0 %v3654_v17  ;;  %6106 = vmatprep.mubr.f32.mxu1 %v3182_v41  ;;  %v3792_v41 = vld [vmem:[#allocation2 + $0x56] sm:$0xff] }
 0x583   : > { %6153 = vmatprep.mubr.f32.mxu0 %v7551_v32  ;;  %6168 = vmatpush3.msra.mxu1 %v3502_v53  ;;  %v3788_v53 = vld [vmem:[#allocation2 + $0x36] sm:$0xff] }
 0x584   : > { %6215 = vmatpush3.msra.mxu0 %v3654_v17  ;;  %6169 = vmatprep.subr.mxu1 %v3501_v4  ;;  %v3789_v17 = vld [vmem:[#allocation2 + $0x3e] sm:$0xff] }
 0x585   : > { %6216 = vmatprep.subr.mxu0 %v3653_v60  ;;  %6170 = vmatpush3.msra.mxu1 %v3501_v4  ;;  %v3791_v4 = vld [vmem:[#allocation2 + $0x4e] sm:$0xff] }
 0x586   : > { %6217 = vmatpush3.msra.mxu0 %v3653_v60  ;;  %6107 = vmatmul.mubr.f32.gmra.mxu1 %v3183_v11 }
 0x587   : > { %6154 = vmatmul.mubr.f32.gmra.mxu0 %v7554_v63  ;;  %6171 = vmatprep.subr.mxu1 %v3500_v57 }
 0x588   : > { %6218 = vmatprep.subr.mxu0 %v3652_v62  ;;  %6109 = vmatprep.mubr.f32.mxu1 %v3184_v16 }
 0x589   : > { %6156 = vmatprep.mubr.f32.mxu0 %v7557_v5  ;;  %6172 = vmatpush3.msra.mxu1 %v3500_v57 }
 0x58a   : > { %6219 = vmatpush3.msra.mxu0 %v3652_v62  ;;  %6173 = vmatprep.subr.mxu1 %v3499_v13 }
 0x58b   : > { %6220 = vmatprep.subr.mxu0 %v3651_v29  ;;  %6174 = vmatpush3.msra.mxu1 %v3499_v13 }
 0x58c   : > { %6221 = vmatpush3.msra.mxu0 %v3651_v29  ;;  %6110 = vmatmul.mubr.f32.gmra.mxu1 %v3185_v3 }
 0x58d   : > { %6157 = vmatmul.mubr.f32.gmra.mxu0 %v7560_v10  ;;  %6175 = vmatprep.subr.mxu1 %v3498_v19 }
 0x58e   : > { %6222 = vmatprep.subr.mxu0 %v3650_v61  ;;  %6176 = vmatpush3.msra.mxu1 %v3498_v19 }
 0x58f   : > { %6191 = vmatprep.mubr.f32.mxu1 %v7535_v45  ;;  %6223 = vmatpush3.msra.mxu0 %v3650_v61  ;;  %v3489_v45 = vld [vmem:[#allocation2 + $0x5c] sm:$0xff] }
 0x590   : > { %6238 = vmatprep.mubr.f32.mxu0 %v3632_v21  ;;  %6177 = vmatprep.subr.mxu1 %v3497_v50 }
 0x591   : > { %6224 = vmatprep.subr.mxu0 %v3649_v15  ;;  %6178 = vmatpush3.msra.mxu1 %v3497_v50 }
 0x592   : > { %6225 = vmatpush3.msra.mxu0 %v3649_v15  ;;  %6179 = vmatprep.subr.mxu1 %v3496_v6 }
 0x593   : > { %6226 = vmatprep.subr.mxu0 %v3648_v8  ;;  %6180 = vmatpush3.msra.mxu1 %v3496_v6 }
 0x594   : > { %6227 = vmatpush3.msra.mxu0 %v3648_v8  ;;  %6181 = vmatprep.subr.mxu1 %v3495_v59 }
 0x595   : > { %6228 = vmatprep.subr.mxu0 %v3647_v24  ;;  %6182 = vmatpush3.msra.mxu1 %v3495_v59 }
 0x596   : > { %6229 = vmatpush3.msra.mxu0 %v3647_v24  ;;  %6183 = vmatprep.subr.mxu1 %v3494_v28 }
 0x597   : > { %6230 = vmatprep.subr.mxu0 %v3646_v51  ;;  %6184 = vmatpush3.msra.mxu1 %v3494_v28 }
 0x598   : > { %6231 = vmatpush3.msra.mxu0 %v3646_v51  ;;  %6185 = vmatprep.subr.mxu1 %v3493_v34 }
 0x599   : > { %6232 = vmatprep.subr.mxu0 %v3645_v40  ;;  %6186 = vmatpush3.msra.mxu1 %v3493_v34 }
 0x59a   : > { %6233 = vmatpush3.msra.mxu0 %v3645_v40  ;;  %6187 = vmatprep.subr.mxu1 %v3492_v31 }
 0x59b   : > { %6234 = vmatprep.subr.mxu0 %v3644_v35  ;;  %6188 = vmatpush3.msra.mxu1 %v3492_v31 }
 0x59c   : > { %6235 = vmatpush3.msra.mxu0 %v3644_v35  ;;  %6189 = vmatprep.subr.mxu1 %v3491_v22 }
 0x59d   : > { %6236 = vmatprep.subr.mxu0 %v3643_v12  ;;  %6190 = vmatpush3.msra.mxu1 %v3491_v22 }
 0x59e   : > { %6237 = vmatpush3.msra.mxu0 %v3643_v12  ;;  %6192 = vmatmul.mubr.f32.vlgmr.msra.gmra.mxu1 %v7538_v25  ;;  %v3784_v25 = vld [vmem:[#allocation2 + $0x16] sm:$0xff] }
 0x59f   : > { %6239 = vmatmul.mubr.f32.vlgmr.msra.gmra.mxu0 %v3633_v26  ;;  %6253 = vmatprep.subr.mxu1 %v3810_v36 }
 0x5a0   : > { %6194 = vmatprep.mubr.f32.mxu1 %v7541_v1  ;;  %6241 = vmatprep.mubr.f32.mxu0 %v3634_v20  ;;  %v3796_v1 = vld [vmem:[#allocation3 + $0x408] sm:$0xff] }
 0x5a1   : > { %6254 = vmatpush3.msra.mxu1 %v3810_v36 }
 0x5a2   : > { %6255 = vmatprep.subr.mxu1 %v3809_v27  ;;  %6195 = vmatmul.mubr.f32.gmra.mxu1 %v7544_v54  ;;  %v3786_v54 = vld [vmem:[#allocation2 + $0x26] sm:$0xff] }
 0x5a3   : > { %6256 = vmatpush3.msra.mxu1 %v3809_v27  ;;  %6242 = vmatmul.mubr.f32.gmra.mxu0 %v3635_v23 }
 0x5a4   : > { %6257 = vmatprep.subr.mxu1 %v3808_v37  ;;  %6197 = vmatprep.mubr.f32.mxu1 %v7547_v2  ;;  %v3790_v2 = vld [vmem:[#allocation2 + $0x46] sm:$0xff] }
 0x5a5   : > { %6244 = vmatprep.mubr.f32.mxu0 %v3636_v38  ;;  %6258 = vmatpush3.msra.mxu1 %v3808_v37 }
 0x5a6   : > { %6259 = vmatprep.subr.mxu1 %v3807_v39  ;;  %6198 = vmatmul.mubr.f32.gmra.mxu1 %v7551_v32  ;;  %v3793_v32 = vld [vmem:[#allocation2 + $0x5e] sm:$0xff] }
 0x5a7   : > { %6245 = vmatmul.mubr.f32.gmra.mxu0 %v3637_v56  ;;  %6260 = vmatpush3.msra.mxu1 %v3807_v39 }
 0x5a8   : > { %6247 = vmatprep.mubr.f32.mxu0 %v3638_v42  ;;  %6261 = vmatprep.subr.mxu1 %v3806_v0 }
 0x5a9   : > { %6200 = vmatprep.mubr.f32.mxu1 %v7554_v63  ;;  %6262 = vmatpush3.msra.mxu1 %v3806_v0 }
 0x5aa   : > { %6263 = vmatprep.subr.mxu1 %v3805_v43  ;;  %6201 = vmatmul.mubr.f32.gmra.mxu1 %v7557_v5 }
 0x5ab   : > { %6248 = vmatmul.mubr.f32.gmra.mxu0 %v3639_v44  ;;  %6264 = vmatpush3.msra.mxu1 %v3805_v43 }
 0x5ac   : > { %6250 = vmatprep.mubr.f32.mxu0 %v3640_v7  ;;  %6265 = vmatprep.subr.mxu1 %v3804_v46 }
 0x5ad   : > { %6203 = vmatprep.mubr.f32.mxu1 %v7560_v10  ;;  %6266 = vmatpush3.msra.mxu1 %v3804_v46 }
 0x5ae   : > { %6267 = vmatprep.subr.mxu1 %v3803_v33  ;;  %6204 = vmatmul.mubr.f32.gmra.mxu1 %v3489_v45 }
 0x5af   : > { %6251 = vmatmul.mubr.f32.gmra.mxu0 %v3641_v47  ;;  %6268 = vmatpush3.msra.mxu1 %v3803_v33 }
 0x5b0   : > { %6269 = vmatprep.subr.mxu1 %v3802_v48  ;;  %6285 = vmatprep.mubr.f32.mxu1 %v3784_v25 }
 0x5b1   : > { %6270 = vmatpush3.msra.mxu1 %v3802_v48 }
 0x5b2   : > { %6271 = vmatprep.subr.mxu1 %v3801_v14 }
 0x5b3   : > { %6272 = vmatpush3.msra.mxu1 %v3801_v14 }
 0x5b4   : > { %6273 = vmatprep.subr.mxu1 %v3800_v18 }
 0x5b5   : > { %6274 = vmatpush3.msra.mxu1 %v3800_v18 }
 0x5b6   : > { %6275 = vmatprep.subr.mxu1 %v3799_v55 }
 0x5b7   : > { %6276 = vmatpush3.msra.mxu1 %v3799_v55 }
 0x5b8   : > { %6277 = vmatprep.subr.mxu1 %v3798_v52 }
 0x5b9   : > { %6278 = vmatpush3.msra.mxu1 %v3798_v52 }
 0x5ba   : > { %6279 = vmatprep.subr.mxu1 %v3797_v9 }
 0x5bb   : > { %6280 = vmatpush3.msra.mxu1 %v3797_v9 }
 0x5bc   : > { %6281 = vmatprep.subr.mxu1 %v3796_v1 }
 0x5bd   : > { %6282 = vmatpush3.msra.mxu1 %v3796_v1 }
 0x5be   : > { %6283 = vmatprep.subr.mxu1 %v3795_v58 }
 0x5bf   : > { %6284 = vmatpush3.msra.mxu1 %v3795_v58 }
 0x5c0   : > { %6286 = vmatmul.mubr.f32.vlgmr.msra.gmra.mxu1 %v3785_v30 }
 0x5c1   : > { %6288 = vmatprep.mubr.f32.mxu1 %v3786_v54 }
 0x5c4   : > { %6289 = vmatmul.mubr.f32.gmra.mxu1 %v3787_v49 }
 0x5c5   : > { %6291 = vmatprep.mubr.f32.mxu1 %v3788_v53 }
 0x5c8   : > { %6292 = vmatmul.mubr.f32.gmra.mxu1 %v3789_v17 }
 0x5c9   : > { %6294 = vmatprep.mubr.f32.mxu1 %v3790_v2 }
 0x5cc   : > { %6295 = vmatmul.mubr.f32.gmra.mxu1 %v3791_v4  ;;  %v6406_v4 = vmov 1983009808  }
 0x5cd   : > { %6297 = vmatprep.mubr.f32.mxu1 %v3792_v41  ;;  %v3948_v41 = vunpack.c.l.s4 %v6406_v4  ;;  %v6357_v4 = vld [vmem:[%s6530_s12 + $0x8] sm:$0xff] }
 0x5d0   : > { %6298 = vmatmul.mubr.f32.gmra.mxu1 %v3793_v32 }
 0x5e1   : > { %v7572_v60 = vpop.f32.mrf.mxu1 }
 0x5e2   : > { %v7574_v57 = vpop.f32.mrf.mxu0 }
 0x5e3   : > { %v7576_v62 = vpop.f32.mrf.mxu1 }
 0x5e4   : > { %v7578_v11 = vpop.f32.mrf.mxu0 }
 0x5e7   : > { %v7580_v63 = vpop.f32.mrf.mxu1 }
 0x5e8   : > { %v7582_v13 = vpop.f32.mrf.mxu0 }
 0x5e9   : > { %v7584_v16 = vpop.f32.mrf.mxu1 }
 0x5ea   : > { %v7586_v5 = vpop.f32.mrf.mxu0 }
 0x5ed   : > { %v7588_v29 = vpop.f32.mrf.mxu1 }
 0x5ee   : > { %v7590_v19 = vpop.f32.mrf.mxu0 }
 0x5ef   : > { %v7592_v61 = vpop.f32.mrf.mxu1 }
 0x5f0   : > { %v7594_v3 = vpop.f32.mrf.mxu0 }
 0x5f3   : > { %v7596_v10 = vpop.f32.mrf.mxu1 }
 0x5f4   : > { %v7598_v50 = vpop.f32.mrf.mxu0 }
 0x5f5   : > { %v7600_v15 = vpop.f32.mrf.mxu1 }
 0x5f6   : > { %v7602_v21 = vpop.f32.mrf.mxu0 }
 0x5f9   : > { %v7604_v6 = vpop.f32.mrf.mxu1 }
 0x5fa   : > { %v7606_v8 = vpop.f32.mrf.mxu0 }
 0x5fb   : > { %v7608_v59 = vpop.f32.mrf.mxu1 }
 0x5fc   : > { %v7612_v28 = vpop.f32.mrf.mxu0 }
 0x60a   : > { %v7610_v24 = vpop.f32.mrf.mxu1 }
 0x60b   : > { %v7614_v51 = vpop.f32.mrf.mxu0 }
 0x60c   : > { %v7616_v34 = vpop.f32.mrf.mxu1 }
 0x60d   : > { %v7618_v40 = vpop.f32.mrf.mxu0 }
 0x610   : > { %v7620_v31 = vpop.f32.mrf.mxu1 }
 0x611   : > { %v7622_v35 = vpop.f32.mrf.mxu0 }
 0x612   : > { %v7624_v22 = vpop.f32.mrf.mxu1 }
 0x613   : > { %v7626_v12 = vpop.f32.mrf.mxu0 }
 0x616   : > { %v7628_v36 = vpop.f32.mrf.mxu1 }
 0x617   : > { %v7630_v26 = vpop.f32.mrf.mxu0 }
 0x618   : > { %v7632_v27 = vpop.f32.mrf.mxu1 }
 0x619   : > { %v7634_v20 = vpop.f32.mrf.mxu0 }
 0x61c   : > { %v7636_v37 = vpop.f32.mrf.mxu1 }
 0x61d   : > { %v7638_v23 = vpop.f32.mrf.mxu0 }
 0x61e   : > { %v7640_v38 = vpop.f32.mrf.mxu1 }
 0x61f   : > { %v7642_v39 = vpop.f32.mrf.mxu0 }
 0x622   : > { %v7644_v56 = vpop.f32.mrf.mxu1 }
 0x623   : > { %v7646_v0 = vpop.f32.mrf.mxu0 }
 0x624   : > { %v7648_v42 = vpop.f32.mrf.mxu1 }
 0x625   : > { %v7652_v44 = vpop.f32.mrf.mxu0 }
 0x634   : > { %v7650_v43 = vpop.f32.mrf.mxu1 }
 0x635   : > { %v7654_v46 = vpop.f32.mrf.mxu0 }
 0x636   : > { %v7656_v7 = vpop.f32.mrf.mxu1 }
 0x637   : > { %v7658_v33 = vpop.f32.mrf.mxu0 }
 0x638   : > { %8063 = vst [vmem:[#allocation9_spill] sm:$0xff] %v7658_v33 }
 0x63a   : > { %v7660_v47 = vpop.f32.mrf.mxu1 }
 0x63b   : > { %v7662_v45 = vpop.f32.mrf.mxu0 }
 0x63c   : > { %8064 = vst [vmem:[#allocation10_spill] sm:$0xff] %v7662_v45  ;;  %v7664_v48 = vpop.f32.mrf.mxu1 }
 0x63d   : > { %v7666_v14 = vpop.f32.mrf.mxu0 }
 0x63e   : > { %8065 = vst [vmem:[#allocation15_spill] sm:$0xff] %v7666_v14 }
 0x640   : > { %v7668_v25 = vpop.f32.mrf.mxu1 }
 0x641   : > { %v7670_v18 = vpop.f32.mrf.mxu0 }
 0x642   : > { %8066 = vst [vmem:[#allocation17_spill] sm:$0xff] %v7670_v18  ;;  %v7672_v55 = vpop.f32.mrf.mxu1 }
 0x643   : > { %v7674_v52 = vpop.f32.mrf.mxu0 }
 0x644   : > { %8067 = vst [vmem:[#allocation13_spill] sm:$0xff] %v7674_v52 }
 0x646   : > { %v7676_v9 = vpop.f32.mrf.mxu1 }
 0x647   : > { %v7678_v1 = vpop.f32.mrf.mxu0 }
 0x648   : > { %8068 = vst [vmem:[#allocation14_spill] sm:$0xff] %v7678_v1  ;;  %v7680_v58 = vpop.f32.mrf.mxu1 }
 0x649   : > { %v7682_v30 = vpop.f32.mrf.mxu0 }
 0x64a   : > { %8069 = vst [vmem:[#allocation22_spill] sm:$0xff] %v7682_v30  ;;  %v3949_v30 = vunpack.c.0.s8 %v3948_v41  ;;  %v2824_v41 = vadd.f32 %v7578_v11, %v7576_v62 }
 0x64c   : > { %v7684_v54 = vpop.f32.mrf.mxu1 }
 0x64d   : > { %8070 = vst [vmem:[#allocation11_spill] sm:$0xff] %v7684_v54  ;;  %v7686_v49 = vpop.f32.mrf.mxu0  ;;  %v6356_v54 = vld [vmem:[%s6530_s12 + $0x10] sm:$0xff] }
 0x64e   : > { %8071 = vst [vmem:[#allocation12_spill] sm:$0xff] %v7686_v49  ;;  %v7688_v53 = vpop.f32.mrf.mxu1  ;;  %v8079_v49 = vld [vmem:[#allocation6_spill] sm:$0xff] }
 0x64f   : > { %8072 = vst [vmem:[#allocation24_spill] sm:$0xff] %v7688_v53  ;;  %v7692_v2 = vpop.f32.mrf.mxu0  ;;  %v7705_v45 = vsub.s32 %v3949_v30, %v8079_v49  ;;  %v2834_v49 = vadd.f32 %v7586_v5, %v7584_v16 }
 0x650   : > { %8074 = vst [vmem:[#allocation20_spill] sm:$0xff] %v7692_v2  ;;  %v4186_v2 = vcombine.high %v6356_v54, %v6356_v54 }
 0x65e   : > { %v7690_v17 = vpop.f32.mrf.mxu1 }
 0x65f   : > { %8073 = vst [vmem:[#allocation19_spill] sm:$0xff] %v7690_v17  ;;  %v7696_v1 = vpop.f32.mrf.mxu0  ;;  %v6355_v17 = vld [vmem:[%s6530_s12] sm:$0xff] }
 0x660   : > { %v7694_v32 = vpop.f32.mrf.mxu1  ;;  %8076 = vst [vmem:[#allocation18_spill] sm:$0xff] %v7696_v1  ;;  %v4152_v53 = vcombine.high %v6355_v17, %v6355_v17  ;;  %v2829_v1 = vadd.f32 %v7574_v57, %v7572_v60  ;;  %v2859_v60 = vadd.f32 %v7598_v50, %v7596_v10  ;;  %v7729_v57 = vrot.slane %v6357_v4, %v7705_v45 }
 0x661   : > { %8075 = vst [vmem:[#allocation16_spill] sm:$0xff] %v7694_v32  ;;  %v7700_v18 = vpop.f32.mrf.mxu0  ;;  %v4169_v32 = vcombine.high %v6357_v4, %v6357_v4  ;;  %v7732_v62 = vrot.slane %v6355_v17, %v7705_v45  ;;  %v2864_v10 = vadd.f32 %v7612_v28, %v7608_v59 }
 0x662   : > { %v7698_v52 = vpop.f32.mrf.mxu1  ;;  %8077 = vst [vmem:[#allocation21_spill] sm:$0xff] %v7700_v18  ;;  %v2839_v18 = vadd.f32 %v7582_v13, %v7580_v63  ;;  %v7735_v11 = vrot.slane %v4152_v53, %v7705_v45  ;;  %v7738_v63 = vrot.slane %v4186_v2, %v7705_v45  ;;  %v2854_v13 = vadd.f32 %v7602_v21, %v7600_v15  ;;  %v6359_v53 = vld [vmem:[%s6530_s12 + $0x18] sm:$0xff]  ;;  %v6360_v15 = vld [vmem:[%s6530_s12 + $0x28] sm:$0xff] }
 0x663   : > { %v7709_v33 = vpop.f32.mrf.mxu0  ;;  %v3015_v16 = vadd.f32 %v7610_v24, %v2829_v1  ;;  %v4203_v17 = vcombine.high %v6359_v53, %v6359_v53  ;;  %v4237_v21 = vcombine.high %v6360_v15, %v6360_v15  ;;  %v3014_v24 = vadd.f32 %v7616_v34, %v2824_v41 }
 0x664   : > { %v7702_v14 = vpop.f32.mrf.mxu1  ;;  %8080 = vst [vmem:[#allocation8_spill] sm:$0xff] %v7709_v33  ;;  %v2849_v33 = vadd.f32 %v7590_v19, %v7588_v29  ;;  %v7746_v29 = vrot.slane %v4169_v32, %v7705_v45  ;;  %v6358_v19 = vld [vmem:[%s6530_s12 + $0x20] sm:$0xff]  ;;  %v7759_v1 = vrot.slane %v6359_v53, %v7705_v45  ;;  %v7762_v2 = vrot.slane %v6356_v54, %v7705_v45 }
 0x665   : > { %8078 = vst [vmem:[#allocation23_spill] sm:$0xff] %v7702_v14  ;;  %v2844_v14 = vadd.f32 %v7594_v3, %v7592_v61  ;;  %v7743_v5 = vpop.f32.mrf.mxu0  ;;  %v4220_v61 = vcombine.high %v6358_v19, %v6358_v19  ;;  %v2869_v3 = vadd.f32 %v7606_v8, %v7604_v6  ;;  %v7765_v32 = vrot.slane %v6358_v19, %v7705_v45 }
 0x666   : > { %v7718_v30 = vpop.f32.mrf.mxu1  ;;  %v4184_v6 = vcombine.high %v7729_v57, %v7729_v57  ;;  %v3167_v34 = vadd.f32 %v7614_v51, %v3015_v16  ;;  %v3017_v54 = vadd.f32 %v7620_v31, %v2839_v18  ;;  %v4185_v41 = vcombine.high %v7746_v29, %v7746_v29 }
 0x667   : > { %v7777_v4 = vpop.f32.mrf.mxu0  ;;  %v7782_v19 = vrot.slane %v4220_v61, %v7705_v45  ;;  %v3016_v53 = vadd.f32 %v7624_v22, %v2834_v49  ;;  %v3019_v8 = vadd.f32 %v7628_v36, %v2849_v33  ;;  %v7789_v28 = vrot.slane %v4203_v17, %v7705_v45 }
 0x668   : > { %v7753_v50 = vpop.f32.mrf.mxu1  ;;  %v7792_v51 = vrot.slane %v4237_v21, %v7705_v45  ;;  %v3166_v31 = vadd.f32 %v7618_v40, %v3014_v24  ;;  %v4201_v18 = vcombine.high %v7762_v2, %v7762_v2  ;;  %v4218_v22 = vcombine.high %v7759_v1, %v7759_v1 }
 0x669   : > { %v3018_v36 = vadd.f32 %v7632_v27, %v2844_v14  ;;  %v3021_v33 = vadd.f32 %v7636_v37, %v2859_v60  ;;  %v3020_v49 = vadd.f32 %v7640_v38, %v2854_v13  ;;  %v3023_v61 = vadd.f32 %v7644_v56, %v2869_v3  ;;  %v7808_v24 = vpop.f32.mrf.mxu0  ;;  %v6362_v13 = vld [vmem:[%s6530_s12 + $0x38] sm:$0xff] }
 0x66a   : > { %v7786_v59 = vpop.f32.mrf.mxu1  ;;  %v3169_v40 = vadd.f32 %v7622_v35, %v3017_v54  ;;  %v3022_v17 = vadd.f32 %v7648_v42, %v2864_v10  ;;  %v3319_v21 = vadd.f32 %v7650_v43, %v3167_v34  ;;  %v4236_v16 = vcombine.high %v7782_v19, %v7782_v19  ;;  %v6361_v42 = vld [vmem:[%s6530_s12 + $0x30] sm:$0xff] }
 0x66b   : > { %v3168_v27 = vadd.f32 %v7626_v12, %v3016_v53  ;;  %v3171_v37 = vadd.f32 %v7630_v26, %v3019_v8  ;;  %v4219_v38 = vcombine.high %v7789_v28, %v7789_v28  ;;  %v3318_v56 = vadd.f32 %v7656_v7, %v3166_v31 }
 0x66c   : > { %v3603_v14 = vpop.f32.mrf.mxu1  ;;  %v7821_v43 = vrot.slane %v6361_v42, %v7705_v45  ;;  %v7824_v60 = vrot.slane %v6360_v15, %v7705_v45  ;;  %v4271_v12 = vcombine.high %v6362_v13, %v6362_v13  ;;  %v3170_v26 = vadd.f32 %v7634_v20, %v3018_v36  ;;  %v6249_v15 = vpop.f32.mrf.mxu0  ;;  %v8081_v36 = vld [vmem:[#allocation9_spill] sm:$0xff] }
 0x66d   : > { %v3173_v3 = vadd.f32 %v7638_v23, %v3021_v33  ;;  %v3172_v10 = vadd.f32 %v7642_v39, %v3020_v49  ;;  %v3175_v8 = vadd.f32 %v7646_v0, %v3023_v61  ;;  %v3174_v34 = vadd.f32 %v7652_v44, %v3022_v17  ;;  %v8082_v33 = vld [vmem:[#allocation11_spill] sm:$0xff]  ;;  %v8083_v49 = vld [vmem:[#allocation24_spill] sm:$0xff] }
 0x66e   : > { %v3471_v7 = vadd.f32 %v7654_v46, %v3319_v21  ;;  %v3321_v54 = vadd.f32 %v7660_v47, %v3169_v40  ;;  %v3320_v53 = vadd.f32 %v7664_v48, %v3168_v27  ;;  %v3323_v31 = vadd.f32 %v7668_v25, %v3171_v37  ;;  %v6205_v39 = vpop.f32.mrf.mxu1  ;;  %v8084_v61 = vld [vmem:[#allocation19_spill] sm:$0xff]  ;;  %v8087_v27 = vld [vmem:[#allocation16_spill] sm:$0xff] }
 0x66f   : > { %v3322_v35 = vadd.f32 %v7672_v55, %v3170_v26  ;;  %v3325_v20 = vadd.f32 %v7676_v9, %v3173_v3  ;;  %v3324_v23 = vadd.f32 %v7680_v58, %v3172_v10  ;;  %v3470_v0 = vadd.f32 %v8081_v36, %v3318_v56  ;;  %v8085_v58 = vld [vmem:[#allocation10_spill] sm:$0xff]  ;;  %v8086_v17 = vld [vmem:[#allocation15_spill] sm:$0xff]  ;;  %v3755_v56 = vpop.f32.mrf.mxu0  ;;  %v8088_v3 = vld [vmem:[#allocation17_spill] sm:$0xff] }
 0x670   : > { %v3327_v44 = vadd.f32 %v8082_v33, %v3175_v8  ;;  %v3326_v46 = vadd.f32 %v8083_v49, %v3174_v34  ;;  %v3623_v47 = vadd.f32 %v8084_v61, %v3471_v7  ;;  %v7848_v55 = vrot.slane %v6362_v13, %v7705_v45  ;;  %v8089_v8 = vld [vmem:[#allocation13_spill] sm:$0xff]  ;;  %v8090_v7 = vld [vmem:[#allocation14_spill] sm:$0xff]  ;;  %v3613_v49 = vpop.f32.mrf.mxu1  ;;  %v8092_v61 = vld [vmem:[#allocation12_spill] sm:$0xff] }
 0x671   : > { %v7851_v9 = vrot.slane %v4271_v12, %v7705_v45  ;;  %v3473_v40 = vadd.f32 %v8085_v58, %v3321_v54  ;;  %v3472_v21 = vadd.f32 %v8086_v17, %v3320_v53  ;;  %v3622_v37 = vadd.f32 %v8087_v27, %v3470_v0  ;;  %v8091_v33 = vld [vmem:[#allocation22_spill] sm:$0xff]  ;;  %v8093_v48 = vld [vmem:[#allocation20_spill] sm:$0xff]  ;;  %v6252_v0 = vpop.f32.mrf.mxu0  ;;  %v8095_v17 = vld [vmem:[#allocation23_spill] sm:$0xff] }
 0x672   : > { %v4254_v26 = vcombine.high %v6361_v42, %v6361_v42  ;;  %v3475_v10 = vadd.f32 %v8088_v3, %v3323_v31  ;;  %v3474_v34 = vadd.f32 %v8089_v8, %v3322_v35  ;;  %v3477_v36 = vadd.f32 %v8090_v7, %v3325_v20  ;;  %v8094_v54 = vld [vmem:[#allocation18_spill] sm:$0xff] }
 0x673   : > { %v3476_v13 = vadd.f32 %v8091_v33, %v3324_v23  ;;  %v3479_v12 = vadd.f32 %v8092_v61, %v3327_v44  ;;  %v3478_v25 = vadd.f32 %v8093_v48, %v3326_v46  ;;  %v3775_v58 = vadd.f32 %v8094_v54, %v3623_v47  ;;  %v8096_v23 = vld [vmem:[#allocation21_spill] sm:$0xff] }
 0x674   : > { %v3625_v53 = vadd.f32 %v7698_v52, %v3473_v40  ;;  %v3624_v42 = vadd.f32 %v8095_v17, %v3472_v21  ;;  %v3627_v31 = vadd.f32 %v7718_v30, %v3475_v10  ;;  %v3626_v35 = vadd.f32 %v7753_v50, %v3474_v34  ;;  %v8097_v50 = vld [vmem:[#allocation8_spill] sm:$0xff] }
 0x675   : > { %v3629_v20 = vadd.f32 %v7786_v59, %v3477_v36  ;;  %v3774_v3 = vadd.f32 %v8096_v23, %v3622_v37  ;;  %v4286_v44 = vcombine.high %v7848_v55, %v7848_v55  ;;  %v4287_v46 = vcombine.high %v7851_v9, %v7851_v9  ;;  %v3765_v59 = vpop.f32.mrf.mxu0 }
 0x676   : > { %v3628_v52 = vadd.f32 %v3603_v14, %v3476_v13  ;;  %v3631_v47 = vadd.f32 %v6205_v39, %v3479_v12  ;;  %v3630_v48 = vadd.f32 %v3613_v49, %v3478_v25  ;;  %v7874_v30 = vrot.slane %v4254_v26, %v7705_v45 }
 0x677   : > { %v3777_v21 = vadd.f32 %v8097_v50, %v3625_v53  ;;  %v3776_v7 = vadd.f32 %v7743_v5, %v3624_v42  ;;  %v3779_v36 = vadd.f32 %v7777_v4, %v3627_v31  ;;  %v3778_v33 = vadd.f32 %v7808_v24, %v3626_v35 }
 0x678   : > { %v7881_v14 = vadd.f32 %v6249_v15, %v3629_v20  ;;  %v7885_v61 = vadd.f32 %v3755_v56, %v3628_v52  ;;  %v7887_v12 = vadd.f32 %v6252_v0, %v3631_v47  ;;  %v7889_v54 = vadd.f32 %v3765_v59, %v3630_v48 }
 0x680   : > { %v6287_v27 = vpop.f32.mrf.mxu1 }
 0x681   : > { %v3927_v8 = vadd.f32 %v6287_v27, %v3775_v58 }
 0x682   : > { %v3877_v40 = vpop.f32.mrf.mxu1 }
 0x683   : > { %v3963_v10 = vcombine.high %v3927_v8, %v3927_v8  ;;  %v3970_v37 = vrot.slane %v3927_v8, %v7705_v45  ;;  %v3926_v34 = vadd.f32 %v3877_v40, %v3774_v3  ;;  %v8098_v3 = vcombine.high %v7732_v62, %v7732_v62 }
 0x684   : > { %v6290_v39 = vpop.f32.mrf.mxu1  ;;  %v8099_v40 = vcombine.high %v7735_v11, %v7735_v11 }
 0x685   : > { %v3977_v25 = vrot.slane %v3963_v10, %v7705_v45  ;;  %v3978_v26 = vcombine.high %v3970_v37, %v3970_v37  ;;  %v3946_v13 = vcombine.high %v3926_v34, %v3926_v34  ;;  %v3953_v49 = vrot.slane %v3926_v34, %v7705_v45 }
 0x686   : > { %v3929_v5 = vadd.f32 %v6290_v39, %v3777_v21  ;;  %v3887_v58 = vpop.f32.mrf.mxu1 }
 0x687   : > { %v3979_v4 = vcombine.high %v3977_v25, %v3977_v25  ;;  %v4324_v24 = vadd.f32 %v7729_v57, %v3978_v26  ;;  %v4325_v15 = vadd.f32 %v4184_v6, %v3977_v25  ;;  %v3960_v53 = vrot.slane %v3946_v13, %v7705_v45 }
 0x688   : > { %v3961_v17 = vcombine.high %v3953_v49, %v3953_v49  ;;  %v4320_v42 = vadd.f32 %v7732_v62, %v3953_v49  ;;  %v3996_v56 = vcombine.high %v3929_v5, %v3929_v5  ;;  %v4003_v0 = vrot.slane %v3929_v5, %v7705_v45  ;;  %v6293_v31 = vpop.f32.mrf.mxu1 }
 0x689   : > { %v4401_v35 = vcombine.low %v4324_v24, %v4325_v15  ;;  %v3962_v20 = vcombine.high %v3960_v53, %v3960_v53  ;;  %v4322_v27 = vadd.f32 %v7735_v11, %v3960_v53  ;;  %v3928_v23 = vadd.f32 %v3887_v58, %v3776_v7 }
 0x68a   : > { %v4321_v8 = vadd.f32 %v8098_v3, %v3961_v17  ;;  %v4010_v57 = vrot.slane %v3996_v56, %v7705_v45  ;;  %v4011_v6 = vcombine.high %v4003_v0, %v4003_v0  ;;  %v4330_v52 = vadd.f32 %v7738_v63, %v4003_v0  ;;  %v3897_v47 = vpop.f32.mrf.mxu1 }
 0x68b   : > { %v4409_v48 = vrot.slane %v4401_v35, %v7705_v45  ;;  %v4323_v50 = vadd.f32 %v8099_v40, %v3962_v20  ;;  %v3980_v21 = vcombine.high %v3928_v23, %v3928_v23  ;;  %v3987_v59 = vrot.slane %v3928_v23, %v7705_v45 }
 0x68c   : > { %v4384_v10 = vcombine.low %v4320_v42, %v4321_v8  ;;  %v4012_v37 = vcombine.high %v4010_v57, %v4010_v57  ;;  %v8100_v62 = vcombine.high %v7738_v63, %v7738_v63  ;;  %v4326_v7 = vadd.f32 %v7746_v29, %v3979_v4  ;;  %v6296_v39 = vpop.f32.mrf.mxu1 }
 0x68d   : > { %v4385_v25 = vcombine.low %v4322_v27, %v4323_v50  ;;  %v3994_v26 = vrot.slane %v3980_v21, %v7705_v45  ;;  %v4327_v11 = vadd.f32 %v4185_v41, %v3987_v59  ;;  %v3931_v13 = vadd.f32 %v6293_v31, %v3779_v36 }
 0x68e   : > { %v4331_v34 = vadd.f32 %v8100_v62, %v4011_v6  ;;  %v4392_v49 = vrot.slane %v4384_v10, %v7705_v45  ;;  %v4332_v5 = vadd.f32 %v7759_v1, %v4012_v37  ;;  %v3930_v24 = vadd.f32 %v3897_v47, %v3778_v33  ;;  %v3907_v17 = vpop.f32.mrf.mxu1 }
 0x68f   : > { %v4399_v63 = vrot.slane %v4385_v25, %v7705_v45  ;;  %v3995_v15 = vcombine.high %v3994_v26, %v3994_v26  ;;  %v4328_v4 = vadd.f32 %v7762_v2, %v3994_v26  ;;  %v4402_v53 = vcombine.low %v4326_v7, %v4327_v11 }
 0x690   : > { %v4419_v58 = vcombine.low %v4330_v52, %v4331_v34  ;;  %v4029_v41 = vcombine.high %v3931_v13, %v3931_v13  ;;  %v4036_v36 = vrot.slane %v3931_v13, %v7705_v45  ;;  %v4013_v33 = vcombine.high %v3930_v24, %v3930_v24 }
 0x691   : > { %v4400_v42 = vcombine.low %v4392_v49, %v4399_v63  ;;  %v4329_v56 = vadd.f32 %v4201_v18, %v3995_v15  ;;  %v4416_v0 = vrot.slane %v4402_v53, %v7705_v45  ;;  %v4020_v31 = vrot.slane %v3930_v24, %v7705_v45  ;;  %v6299_v18 = vpop.f32.mrf.mxu1 }
 0x692   : > { %v4433_v29 = vrot.slane %v4419_v58, %v7705_v45  ;;  %v4043_v35 = vrot.slane %v4029_v41, %v7705_v45  ;;  %v4044_v20 = vcombine.high %v4036_v36, %v4036_v36  ;;  %v4336_v27 = vadd.f32 %v7765_v32, %v4036_v36 }
 0x693   : > { %v4027_v23 = vrot.slane %v4013_v33, %v7705_v45  ;;  %4528 = vst [vmem:[%s7926_s27] sm:$0xff] %v4400_v42  ;;  %v4417_v3 = vcombine.low %v4409_v48, %v4416_v0  ;;  %v4418_v8 = vcombine.low %v4328_v4, %v4329_v56  ;;  %v4028_v57 = vcombine.high %v4020_v31, %v4020_v31  ;;  %v3917_v4 = vpop.f32.mrf.mxu1 }
 0x694   : > { %v4333_v2 = vadd.f32 %v4218_v22, %v4020_v31  ;;  %v4045_v6 = vcombine.high %v4043_v35, %v4043_v35  ;;  %v8101_v52 = vcombine.high %v7765_v32, %v7765_v32  ;;  %v4338_v40 = vadd.f32 %v7782_v19, %v4043_v35 }
 0x695   : > { %v4335_v50 = vadd.f32 %v4219_v38, %v4027_v23  ;;  %v4426_v48 = vrot.slane %v4418_v8, %v7705_v45  ;;  %4529 = vst [vmem:[%s7926_s27 + $0x8] sm:$0xff] %v4417_v3  ;;  %v4334_v21 = vadd.f32 %v7789_v28, %v4028_v57  ;;  %v3933_v22 = vadd.f32 %v6296_v39, %v7881_v14 }
 0x696   : > { %v4337_v47 = vadd.f32 %v8101_v52, %v4044_v20  ;;  %v4435_v1 = vcombine.low %v4332_v5, %v4333_v2  ;;  %v4339_v32 = vadd.f32 %v4236_v16, %v4045_v6  ;;  %v3932_v10 = vadd.f32 %v3907_v17, %v7885_v61 }
 0x697   : > { %v3935_v37 = vadd.f32 %v6299_v18, %v7887_v12  ;;  %v4434_v62 = vcombine.low %v4426_v48, %v4433_v29  ;;  %v4436_v38 = vcombine.low %v4334_v21, %v4335_v50  ;;  %v4063_v7 = vcombine.high %v3933_v22, %v3933_v22 }
 0x698   : > { %v4452_v59 = vcombine.low %v4336_v27, %v4337_v47  ;;  %v4443_v34 = vrot.slane %v4435_v1, %v7705_v45  ;;  %v4453_v25 = vcombine.low %v4338_v40, %v4339_v32  ;;  %v4070_v26 = vrot.slane %v3933_v22, %v7705_v45 }
 0x699   : > { %v4046_v14 = vcombine.high %v3932_v10, %v3932_v10  ;;  %4530 = vst [vmem:[%s7926_s27 + $0x10] sm:$0xff] %v4434_v62  ;;  %v4450_v19 = vrot.slane %v4436_v38, %v7705_v45  ;;  %v4077_v16 = vrot.slane %v4063_v7, %v7705_v45  ;;  %v4053_v61 = vrot.slane %v3932_v10, %v7705_v45 }
 0x69a   : > { %v4460_v28 = vrot.slane %v4452_v59, %v7705_v45  ;;  %v4096_v12 = vcombine.high %v3935_v37, %v3935_v37  ;;  %v4467_v39 = vrot.slane %v4453_v25, %v7705_v45  ;;  %v8102_v11 = vcombine.high %v7792_v51, %v7792_v51 }
 0x69b   : > { %v4060_v49 = vrot.slane %v4046_v14, %v7705_v45  ;;  %v4103_v5 = vrot.slane %v3935_v37, %v7705_v45  ;;  %v4451_v58 = vcombine.low %v4443_v34, %v4450_v19  ;;  %v4078_v24 = vcombine.high %v4077_v16, %v4077_v16 }
 0x69c   : > { %v4343_v13 = vadd.f32 %v8102_v11, %v4070_v26  ;;  %v4344_v63 = vadd.f32 %v7821_v43, %v4077_v16  ;;  %v4061_v15 = vcombine.high %v4053_v61, %v4053_v61  ;;  %v4468_v53 = vcombine.low %v4460_v28, %v4467_v39 }
 0x69d   : > { %v4062_v17 = vcombine.high %v4060_v49, %v4060_v49  ;;  %v8103_v29 = vcombine.high %v7824_v60, %v7824_v60  ;;  %v4110_v36 = vrot.slane %v4096_v12, %v7705_v45  ;;  %4531 = vst [vmem:[%s7926_s27 + $0x18] sm:$0xff] %v4451_v58  ;;  %v8104_v33 = vcombine.high %v7821_v43, %v7821_v43 }
 0x69e   : > { %v4340_v56 = vadd.f32 %v7824_v60, %v4061_v15  ;;  %v4111_v0 = vcombine.high %v4103_v5, %v4103_v5  ;;  %v4349_v31 = vadd.f32 %v4286_v44, %v4103_v5  ;;  %4532 = vst [vmem:[%s7926_s27 + $0x20] sm:$0xff] %v4468_v53  ;;  %v3934_v27 = vadd.f32 %v3917_v4, %v7889_v54 }
 0x69f   : > { %v4341_v41 = vadd.f32 %v8103_v29, %v4060_v49  ;;  %v4345_v42 = vadd.f32 %v8104_v33, %v4078_v24  ;;  %v4342_v35 = vadd.f32 %v7792_v51, %v4062_v17  ;;  %v4351_v20 = vadd.f32 %v4287_v46, %v4110_v36 }
 0x6a0   : > { %v4350_v43 = vadd.f32 %v7851_v9, %v4111_v0  ;;  %v4079_v8 = vcombine.high %v3934_v27, %v3934_v27  ;;  %v4086_v57 = vrot.slane %v3934_v27, %v7705_v45  ;;  %v4270_v44 = vcombine.high %v7874_v30, %v7874_v30 }
 0x6a1   : > { %v4486_v23 = vcombine.low %v4344_v63, %v4345_v42  ;;  %v4469_v3 = vcombine.low %v4340_v56, %v4341_v41  ;;  %v4470_v60 = vcombine.low %v4342_v35, %v4343_v13 }
 0x6a2   : > { %v4504_v18 = vcombine.low %v4350_v43, %v4351_v20  ;;  %v4093_v54 = vrot.slane %v4079_v8, %v7705_v45  ;;  %v4094_v9 = vcombine.high %v4086_v57, %v4086_v57  ;;  %v4346_v6 = vadd.f32 %v7874_v30, %v4086_v57 }
 0x6a3   : > { %v4494_v51 = vrot.slane %v4486_v23, %v7705_v45  ;;  %v4477_v2 = vrot.slane %v4469_v3, %v7705_v45  ;;  %v4484_v46 = vrot.slane %v4470_v60, %v7705_v45 }
 0x6a4   : > { %v4518_v52 = vrot.slane %v4504_v18, %v7705_v45  ;;  %v4095_v40 = vcombine.high %v4093_v54, %v4093_v54  ;;  %v4347_v50 = vadd.f32 %v4270_v44, %v4094_v9 }
 0x6a5   : > { %v4485_v47 = vcombine.low %v4477_v2, %v4484_v46 }
 0x6a6   : > { %v4348_v48 = vadd.f32 %v7848_v55, %v4095_v40  ;;  %v4487_v21 = vcombine.low %v4346_v6, %v4347_v50 }
 0x6a7   : > { %4533 = vst [vmem:[%s7926_s27 + $0x28] sm:$0xff] %v4485_v47 }
 0x6a8   : > { %v4501_v1 = vrot.slane %v4487_v21, %v7705_v45  ;;  %v4503_v22 = vcombine.low %v4348_v48, %v4349_v31 }
 0x6aa   : > { %v4502_v32 = vcombine.low %v4494_v51, %v4501_v1  ;;  %v4511_v59 = vrot.slane %v4503_v22, %v7705_v45 }
 0x6ac   : > { %v4519_v10 = vcombine.low %v4511_v59, %v4518_v52  ;;  %4534 = vst [vmem:[%s7926_s27 + $0x30] sm:$0xff] %v4502_v32 }
 0x6ae   : > { %4535 = vst [vmem:[%s7926_s27 + $0x38] sm:$0xff] %v4519_v10 }
 0x6af PF: > { %s21_s13 = sadd.s32 1, %s6399_s13  }
 0x6b0   : > { %p18_p1 = scmp.ge.s32.totalorder %s21_s13, 4  }
 0x6b2   :  { %20 = sbr.rel (!%p18_p1) target bundleno = 1 (0x1), region = 111 }
 0x6b7   :  { %4557 = vsyncpa [#allocation4], 1 }
 0x6b8   :  { %4559 = vsyncpa [#allocation4 + $0x1], 1 }

</bundles_post_ra>
